<compile_context>
chip_gen: v5e
topology: v5e:2x2
jax: 0.10.0
libtpu: 0.0.40
codegen_flags: <defaults>
</compile_context>

<pallas_src>
import functools
import numpy as np

import jax
import jax.numpy as jnp
from jax import lax
from jax.experimental import pallas as pl
from jax.experimental.pallas import tpu as pltpu


# ----------------------------------------------------------------------------
# Chip-adaptive sizing (v5e/v6e: 128 MiB VMEM; v7x: 64 MiB)
# ----------------------------------------------------------------------------
def _vmem_capacity_bytes():
    try:
        return int(pltpu.get_tpu_info().vmem_capacity_bytes)
    except Exception:
        return 64 * 1024 * 1024          # conservative default (v7x)


_VMEM_CAP = _vmem_capacity_bytes()
_VMEM_LIMIT = int(min(_VMEM_CAP // 2, 64 << 20))


def _vq_tile_n(vocab_size):
    """VQ token-tile size, capped by the (T, V) score/iota VMEM footprint."""
    budget = _VMEM_LIMIT // 3                       # headroom for x/et + pipelining
    per_token = 12 * max(int(vocab_size), 128)      # score f32 + iota i32 + select i32
    t = int(max(128, min(1024, budget // per_token)))
    return (t // 8) * 8


# ----------------------------------------------------------------------------
# Pallas kernels
# ----------------------------------------------------------------------------
def _vq_kernel(x_ref, et_ref, e2_ref, idx_ref, *, vocab_size, using_znorm):
    """Nearest-codeword indices for one (T, C) token tile.

    x_ref  : (T, C)  bf16 residual tile (streamed over the grid)
    et_ref : (C, V)  bf16 pre-scaled codebook^T: -2*E^T (L2) / -normalize(E)^T (znorm)
    e2_ref : (1, V)  f32 per-codeword squared norms (zeros when using_znorm)
    idx_ref: (T, 1)  int32 argmin index
    """
    xe = jnp.dot(x_ref[...], et_ref[...], preferred_element_type=jnp.float32)  # (T,V)
    # Row-constant terms (||x||^2, 1/||x||) never change the row-wise arg-extreme.
    score = xe if using_znorm else xe + e2_ref[...]
    col = lax.broadcasted_iota(jnp.int32, score.shape, 1)
    s_min = jnp.min(score, axis=1, keepdims=True)
    # first-occurrence tie break, like torch.argmin / torch.argmax
    idx_ref[...] = jnp.min(jnp.where(score <= s_min, col, jnp.int32(vocab_size)),
                           axis=1, keepdims=True)


def _scale_tail_kernel(im2col_ref, h_ref, fhat_ref, frest_ref, w_ref, b_ref,
                       fhat_out, frest_out, *, resi_ratio):
    """Fused Phi 3x3 conv + residual mix + f_hat/f_rest update for one batch elem.

    im2col_ref : (H*W, 9*C) bf16 shifted 3x3 windows (built in plain JAX)
    h_ref      : (H*W, C)   f32 upsampled codewords (kept f32 for the (1-r)*h term)
    fhat/frest : (H*W, C)   f32 running reconstruction / residual (aliased outputs)
    w_ref      : (9*C, C)   bf16 raw conv taps, (ky, kx, cin) x cout
    b_ref      : (1, C)     f32 conv bias
    """
    conv = jnp.dot(im2col_ref[...], w_ref[...],
                   preferred_element_type=jnp.float32) + b_ref[...]
    phi = h_ref[...] * (1.0 - resi_ratio) + conv * resi_ratio
    fhat_out[...] = fhat_ref[...] + phi
    frest_out[...] = frest_ref[...] - phi


# ----------------------------------------------------------------------------
# Kernel wrappers
# ----------------------------------------------------------------------------
def vq_lookup_indices(rest_NC, et_scaled, e2, using_znorm, tile_n):
    """Nearest-codeword search; returns (N,) int32 indices."""
    N, C = rest_NC.shape
    V = e2.shape[1]
    n_tiles = int(pl.cdiv(N, tile_n))
    n_pad = n_tiles * tile_n
    if n_pad != N:
        rest_NC = jnp.pad(rest_NC, ((0, n_pad - N), (0, 0)))   # fixed tile reuse
    x_bf = rest_NC.astype(jnp.bfloat16)

    kern = functools.partial(_vq_kernel, vocab_size=V, using_znorm=using_znorm)
    idx = pl.pallas_call(
        kern,
        grid=(n_tiles,),
        in_specs=[
            pl.BlockSpec((tile_n, C), lambda i: (i, 0)),   # streamed token tiles
            pl.BlockSpec((C, V), lambda i: (0, 0)),        # resident codebook^T
            pl.BlockSpec((1, V), lambda i: (0, 0)),        # resident ||e||^2
        ],
        out_specs=pl.BlockSpec((tile_n, 1), lambda i: (i, 0)),
        out_shape=jax.ShapeDtypeStruct((n_pad, 1), jnp.int32),
        compiler_params=pltpu.CompilerParams(
            dimension_semantics=("parallel",),
            vmem_limit_bytes=_VMEM_LIMIT),
    )(x_bf, et_scaled, e2)
    return idx[:N, 0]


def scale_tail(im2col, h_tok, f_hat_tok, f_rest_tok, w9, brow, resi_ratio):
    """Fused Phi + f_hat/f_rest update.  Token-major (B, H*W, C) layout."""
    B, HW, C = h_tok.shape
    K9 = im2col.shape[-1]
    kern = functools.partial(_scale_tail_kernel, resi_ratio=float(resi_ratio))

    def feat_spec():
        return pl.BlockSpec((None, HW, C), lambda b: (b, 0, 0))

    f_hat_o, f_rest_o = pl.pallas_call(
        kern,
        grid=(B,),
        in_specs=[
            pl.BlockSpec((None, HW, K9), lambda b: (b, 0, 0)),  # im2col patches
            feat_spec(),                                        # h (conv input)
            feat_spec(),                                        # f_hat (aliased)
            feat_spec(),                                        # f_rest (aliased)
            pl.BlockSpec((K9, C), lambda b: (0, 0)),            # resident raw taps
            pl.BlockSpec((1, C), lambda b: (0, 0)),             # resident bias
        ],
        out_specs=(feat_spec(), feat_spec()),
        out_shape=(jax.ShapeDtypeStruct((B, HW, C), jnp.float32),
                   jax.ShapeDtypeStruct((B, HW, C), jnp.float32)),
        input_output_aliases={2: 0, 3: 1},
        compiler_params=pltpu.CompilerParams(
            dimension_semantics=("parallel",),     # per-batch blocks are disjoint
            vmem_limit_bytes=_VMEM_LIMIT),
    )(im2col, h_tok, f_hat_tok, f_rest_tok, w9, brow)
    return f_hat_o, f_rest_o


# ----------------------------------------------------------------------------
# Plain-JAX glue
# ----------------------------------------------------------------------------
def area_downsample(x_nhwc, pn):
    """F.interpolate(mode='area') for integer downscale factors (avg pool)."""
    B, H, W, C = x_nhwc.shape
    # TODO(synk): adaptive (non-integer factor) 'area' pooling not implemented.
    assert H % pn == 0 and W % pn == 0
    fh, fw = H // pn, W // pn
    return x_nhwc.reshape(B, pn, fh, pn, fw, C).mean(axis=(2, 4))


def bicubic_upsample(x_nhwc, H, W):
    B, _, _, C = x_nhwc.shape
    # TODO(synk): jax.image.resize bicubic uses Keys a=-0.5 vs PyTorch a=-0.75.
    return jax.image.resize(x_nhwc, (B, H, W, C), method="bicubic")


def build_im2col(h_bhwc):
    """3x3 SAME im2col: (B, H, W, C) -> (B, H*W, 9*C) bf16 (cheap JAX glue)."""
    B, H, W, C = h_bhwc.shape
    hp = jnp.pad(h_bhwc, ((0, 0), (1, 1), (1, 1), (0, 0)))
    cols = [hp[:, dy:dy + H, dx:dx + W, :] for dy in range(3) for dx in range(3)]
    return jnp.concatenate(cols, axis=-1).reshape(B, H * W, 9 * C).astype(jnp.bfloat16)


# ----------------------------------------------------------------------------
# VectorQuantizer2 (forward only, inference/eval semantics)
# ----------------------------------------------------------------------------
class VectorQuantizer2Pallas:
    def __init__(self, vocab_size, Cvae, using_znorm=False, beta=0.25,
                 v_patch_nums=(1, 2, 4, 8), quant_resi=0.5,
                 share_quant_resi=4, key=None):
        self.vocab_size = vocab_size
        self.Cvae = Cvae
        self.using_znorm = using_znorm
        self.beta = beta
        self.v_patch_nums = tuple(v_patch_nums)
        self.quant_resi_ratio = abs(quant_resi)
        # TODO(synk): quant_resi ~ 0 (nn.Identity Phi) path not implemented.

        # PhiPartiallyShared ticks (share_quant_resi >= 2 path of the module)
        K = share_quant_resi
        self.ticks = (np.linspace(1 / 3 / K, 1 - 1 / 3 / K, K) if K == 4
                      else np.linspace(1 / 2 / K, 1 - 1 / 2 / K, K))

        if key is None:
            key = jax.random.PRNGKey(0)
        keys = jax.random.split(key, 1 + 2 * K)
        # nn.Embedding default init ~ N(0, 1) (synthetic; no checkpoint load)
        self.embedding = jax.random.normal(keys[0], (vocab_size, Cvae), jnp.float32)
        bound = 1.0 / np.sqrt(Cvae * 9)      # conv2d kaiming-uniform-ish bound
        self.phi_w, self.phi_b = [], []
        for k in range(K):
            w = jax.random.uniform(keys[1 + 2 * k], (3, 3, Cvae, Cvae),
                                   jnp.float32, -bound, bound)   # (ky, kx, cin, cout)
            b = jax.random.uniform(keys[2 + 2 * k], (Cvae,), jnp.float32, -bound, bound)
            self.phi_w.append(w)
            self.phi_b.append(b)

        # ---- hoisted, kernel-ready parameter forms (computed once) -----------
        emb = self.embedding
        if using_znorm:
            en = emb / jnp.maximum(
                jnp.sqrt(jnp.sum(emb * emb, axis=1, keepdims=True)), 1e-12)
            self._et_scaled = (-en.T).astype(jnp.bfloat16)            # (C, V)
            self._e2 = jnp.zeros((1, vocab_size), jnp.float32)
        else:
            self._et_scaled = (-2.0 * emb.T).astype(jnp.bfloat16)     # (C, V)
            self._e2 = jnp.sum(emb * emb, axis=1)[None, :]            # (1, V)
        self._phi_w9 = [w.reshape(9 * Cvae, Cvae).astype(jnp.bfloat16)
                        for w in self.phi_w]                          # raw taps
        self._phi_b_row = [b[None, :] for b in self.phi_b]            # (1, C)
        self._vq_tile = _vq_tile_n(vocab_size)

    # --- forward ---------------------------------------------------------------
    def forward(self, f_BChw):
        f_BChw = f_BChw.astype(jnp.float32)
        B, C, H, W = f_BChw.shape
        f_nhwc = jnp.transpose(f_BChw, (0, 2, 3, 1))          # internal NHWC
        f_tok = f_nhwc.reshape(B, H * W, C)                    # token-major layout

        f_rest = f_nhwc
        f_hat_tok = jnp.zeros((B, H * W, C), jnp.float32)

        SN = len(self.v_patch_nums)
        mean_vq_loss = jnp.float32(0.0)

        for si, pn in enumerate(self.v_patch_nums):
            rest = f_rest if si == SN - 1 else area_downsample(f_rest, pn)
            idx = vq_lookup_indices(rest.reshape(-1, C), self._et_scaled,
                                    self._e2, self.using_znorm, self._vq_tile)
            # exact f32 codeword gather outside the kernel (index-only VQ kernel)
            h = jnp.take(self.embedding, idx, axis=0).reshape(B, pn, pn, C)
            if si != SN - 1:
                h = bicubic_upsample(h, H, W)

            k = int(np.argmin(np.abs(self.ticks - si / (SN - 1))))
            f_hat_tok, f_rest_tok = scale_tail(
                build_im2col(h), h.reshape(B, H * W, C),
                f_hat_tok, f_rest.reshape(B, H * W, C),
                self._phi_w9[k], self._phi_b_row[k], self.quant_resi_ratio)
            f_rest = f_rest_tok.reshape(B, H, W, C)

            # forward value of mse(f_hat.data, f)*beta + mse(f_hat, f.detach());
            # one fused XLA reduction (keeps the tail batch grid 'parallel').
            mean_vq_loss = mean_vq_loss + (1.0 + self.beta) * jnp.mean(
                (f_hat_tok - f_tok) ** 2)

        mean_vq_loss = mean_vq_loss / SN
        f_hat_BChw = jnp.transpose(f_hat_tok.reshape(B, H, W, C), (0, 3, 1, 2))
        # TODO(synk): training-only vocab-hit EMA / dist.all_reduce, ret_usages
        # stats and the STE gradient trick affect training only, not eval outputs.
        return f_hat_BChw, None, mean_vq_loss

    # --- pure-JAX reference (sanity check only) --------------------------------
    def reference_forward(self, f_BChw):
        f = f_BChw.astype(jnp.float32)
        B, C, H, W = f.shape
        f_nhwc = jnp.transpose(f, (0, 2, 3, 1))
        f_rest = f_nhwc
        f_hat = jnp.zeros_like(f_nhwc)
        SN = len(self.v_patch_nums)
        loss = jnp.float32(0.0)
        for si, pn in enumerate(self.v_patch_nums):
            rest = f_rest if si == SN - 1 else area_downsample(f_rest, pn)
            x = rest.reshape(-1, C)
            if self.using_znorm:
                xn = x / jnp.maximum(jnp.sqrt(jnp.sum(x * x, 1, keepdims=True)), 1e-12)
                en = self.embedding / jnp.maximum(
                    jnp.sqrt(jnp.sum(self.embedding ** 2, 1, keepdims=True)), 1e-12)
                idx = jnp.argmax(xn @ en.T, axis=1)
            else:
                d = (jnp.sum(x * x, 1, keepdims=True)
                     + jnp.sum(self.embedding ** 2, 1)[None, :]
                     - 2.0 * (x @ self.embedding.T))
                idx = jnp.argmin(d, axis=1)
            h = self.embedding[idx].reshape(B, pn, pn, C)
            if si != SN - 1:
                h = bicubic_upsample(h, H, W)
            k = int(np.argmin(np.abs(self.ticks - si / (SN - 1))))
            conv = lax.conv_general_dilated(
                h, self.phi_w[k], (1, 1), 'SAME',
                dimension_numbers=('NHWC', 'HWIO', 'NHWC')) + self.phi_b[k]
            h = h * (1.0 - self.quant_resi_ratio) + conv * self.quant_resi_ratio
            f_hat = f_hat + h
            f_rest = f_rest - h
            loss = loss + (1.0 + self.beta) * jnp.mean((f_hat - f_nhwc) ** 2)
        return jnp.transpose(f_hat, (0, 3, 1, 2)), loss / SN


# ----------------------------------------------------------------------------
if __name__ == "__main__":
    key = jax.random.PRNGKey(0)
    k_data, k_params = jax.random.split(key)

    B, C, H, W = 2, 32, 8, 8
    vq = VectorQuantizer2Pallas(vocab_size=64, Cvae=C, using_znorm=False,
                                beta=0.25, v_patch_nums=(1, 2, 4, 8),
                                quant_resi=0.5, share_quant_resi=4, key=k_params)

    f = jax.random.normal(k_data, (B, C, H, W), jnp.float32)

    fwd = jax.jit(vq.forward)
    f_hat, usages, loss = fwd(f)
    jax.block_until_ready((f_hat, loss))

    assert f_hat.shape == (B, C, H, W) and f_hat.dtype == jnp.float32
    assert loss.shape == () and bool(jnp.isfinite(loss))

    # Aggregate sanity check against a pure-JAX/XLA f32 reference (the kernel
    # path uses bf16 matmuls for the VQ score and the Phi conv, so exact
    # element-wise matching is not expected; the loss is stable to << 10%).
    _, loss_ref = vq.reference_forward(f)
    rel = abs(float(loss) - float(loss_ref)) / max(float(loss_ref), 1e-6)
    assert rel < 0.1, f"loss mismatch: kernel={float(loss)} ref={float(loss_ref)}"

    print("KERNEL_OK")
</pallas_src>

<mosaic_0001>
module attributes {stable_mosaic.version = 11 : i64} {
  func.func @_vq_kernel(%arg0: i32, %arg1: memref<1024x32xbf16, #tpu.memory_space<vmem>>, %arg2: memref<32x64xbf16, #tpu.memory_space<vmem>>, %arg3: memref<1x64xf32, #tpu.memory_space<vmem>>, %arg4: memref<1024x1xi32, #tpu.memory_space<vmem>>) attributes {dimension_semantics = [#tpu.dimension_semantics<parallel>], iteration_bounds = array<i64: 1>, scalar_prefetch = 0 : i64, scratch_operands = 0 : i64, tpu.core_type = #tpu.core_type<tc>, window_params = [{transform_indices = @transform_0, window_bounds = array<i64: 1024, 32>}, {pipeline_mode = #tpu.pipeline_mode<synchronous>, transform_indices = @transform_1, window_bounds = array<i64: 32, 64>}, {pipeline_mode = #tpu.pipeline_mode<synchronous>, transform_indices = @transform_2, window_bounds = array<i64: 1, 64>}, {transform_indices = @transform_3, window_bounds = array<i64: 1024, 1>}]} {
    %c0 = arith.constant 0 : index
    %c0_0 = arith.constant 0 : index
    %0 = vector.load %arg1[%c0, %c0_0] : memref<1024x32xbf16, #tpu.memory_space<vmem>>, vector<1024x32xbf16>
    %c0_1 = arith.constant 0 : index
    %c0_2 = arith.constant 0 : index
    %1 = vector.load %arg2[%c0_1, %c0_2] : memref<32x64xbf16, #tpu.memory_space<vmem>>, vector<32x64xbf16>
    %cst = arith.constant dense<0.000000e+00> : vector<1024x64xf32>
    %2 = tpu.matmul %0, %1, %cst {dimension_numbers = #tpu.dot_dimension_numbers<[1], [0], [0], [1], [0, 0, 1, 1], [], []>} : vector<1024x32xbf16>, vector<32x64xbf16>, vector<1024x64xf32> -> vector<1024x64xf32>
    %c0_3 = arith.constant 0 : index
    %c0_4 = arith.constant 0 : index
    %3 = vector.load %arg3[%c0_3, %c0_4] : memref<1x64xf32, #tpu.memory_space<vmem>>, vector<1x64xf32>
    %4 = vector.broadcast %3 : vector<1x64xf32> to vector<1024x64xf32>
    %5 = arith.addf %2, %4 : vector<1024x64xf32>
    %6 = tpu.iota {dimensions = array<i32: 1>} : vector<1024x64xi32>
    %cst_5 = arith.constant dense<0x7F800000> : vector<1024xf32>
    %7 = vector.multi_reduction <minimumf>, %5, %cst_5 [1] : vector<1024x64xf32> to vector<1024xf32>
    %8 = vector.shape_cast %7 : vector<1024xf32> to vector<1024x1xf32>
    %9 = vector.broadcast %8 : vector<1024x1xf32> to vector<1024x64xf32>
    %10 = arith.cmpf ole, %5, %9 : vector<1024x64xf32>
    %c64_i32 = arith.constant 64 : i32
    %11 = vector.broadcast %c64_i32 : i32 to vector<1024x64xi32>
    %12 = arith.select %10, %6, %11 : vector<1024x64xi1>, vector<1024x64xi32>
    %cst_6 = arith.constant dense<2147483647> : vector<1024xi32>
    %13 = vector.multi_reduction <minsi>, %12, %cst_6 [1] : vector<1024x64xi32> to vector<1024xi32>
    %14 = vector.shape_cast %13 : vector<1024xi32> to vector<1024x1xi32>
    %c0_7 = arith.constant 0 : index
    %c0_8 = arith.constant 0 : index
    %15 = vector.load %arg4[%c0_7, %c0_8] : memref<1024x1xi32, #tpu.memory_space<vmem>>, vector<1024x1xi32>
    tpu.vector_store %arg4[%c0_7, %c0_8], %14 {strides = array<i32>} : memref<1024x1xi32, #tpu.memory_space<vmem>>, vector<1024x1xi32>,
    return
  }
  func.func @transform_0(%arg0: i32) -> (i32, i32) {
    %c0_i32 = arith.constant 0 : i32
    %c0_i32_0 = arith.constant 0 : i32
    return %arg0, %c0_i32 : i32, i32
  }
  func.func @transform_1(%arg0: i32) -> (i32, i32) {
    %c0_i32 = arith.constant 0 : i32
    %c0_i32_0 = arith.constant 0 : i32
    %c0_i32_1 = arith.constant 0 : i32
    return %c0_i32, %c0_i32_0 : i32, i32
  }
  func.func @transform_2(%arg0: i32) -> (i32, i32) {
    %c0_i32 = arith.constant 0 : i32
    %c0_i32_0 = arith.constant 0 : i32
    %c0_i32_1 = arith.constant 0 : i32
    return %c0_i32, %c0_i32_0 : i32, i32
  }
  func.func @transform_3(%arg0: i32) -> (i32, i32) {
    %c0_i32 = arith.constant 0 : i32
    %c0_i32_0 = arith.constant 0 : i32
    return %arg0, %c0_i32 : i32, i32
  }
}

module attributes {stable_mosaic.version = 11 : i64} {
  func.func @_scale_tail_kernel(%arg0: i32, %arg1: memref<1x64x288xbf16, #tpu.memory_space<vmem>>, %arg2: memref<1x64x32xf32, #tpu.memory_space<vmem>>, %arg3: memref<1x64x32xf32, #tpu.memory_space<vmem>>, %arg4: memref<1x64x32xf32, #tpu.memory_space<vmem>>, %arg5: memref<288x32xbf16, #tpu.memory_space<vmem>>, %arg6: memref<1x32xf32, #tpu.memory_space<vmem>>, %arg7: memref<1x64x32xf32, #tpu.memory_space<vmem>>, %arg8: memref<1x64x32xf32, #tpu.memory_space<vmem>>) attributes {dimension_semantics = [#tpu.dimension_semantics<parallel>], iteration_bounds = array<i64: 2>, scalar_prefetch = 0 : i64, scratch_operands = 0 : i64, tpu.core_type = #tpu.core_type<tc>, window_params = [{transform_indices = @transform_0, window_bounds = array<i64: 1, 64, 288>}, {transform_indices = @transform_1, window_bounds = array<i64: 1, 64, 32>}, {transform_indices = @transform_2, window_bounds = array<i64: 1, 64, 32>}, {transform_indices = @transform_3, window_bounds = array<i64: 1, 64, 32>}, {pipeline_mode = #tpu.pipeline_mode<synchronous>, transform_indices = @transform_4, window_bounds = array<i64: 288, 32>}, {pipeline_mode = #tpu.pipeline_mode<synchronous>, transform_indices = @transform_5, window_bounds = array<i64: 1, 32>}, {transform_indices = @transform_6, window_bounds = array<i64: 1, 64, 32>}, {transform_indices = @transform_7, window_bounds = array<i64: 1, 64, 32>}]} {
    %c0 = arith.constant 0 : index
    %c0_0 = arith.constant 0 : index
    %c0_1 = arith.constant 0 : index
    %0 = vector.load %arg1[%c0, %c0_0, %c0_1] : memref<1x64x288xbf16, #tpu.memory_space<vmem>>, vector<1x64x288xbf16>
    %1 = vector.shape_cast %0 : vector<1x64x288xbf16> to vector<64x288xbf16>
    %c0_2 = arith.constant 0 : index
    %c0_3 = arith.constant 0 : index
    %2 = vector.load %arg5[%c0_2, %c0_3] : memref<288x32xbf16, #tpu.memory_space<vmem>>, vector<288x32xbf16>
    %cst = arith.constant dense<0.000000e+00> : vector<64x32xf32>
    %3 = tpu.matmul %1, %2, %cst {dimension_numbers = #tpu.dot_dimension_numbers<[1], [0], [0], [1], [0, 0, 1, 1], [], []>} : vector<64x288xbf16>, vector<288x32xbf16>, vector<64x32xf32> -> vector<64x32xf32>
    %c0_4 = arith.constant 0 : index
    %c0_5 = arith.constant 0 : index
    %4 = vector.load %arg6[%c0_4, %c0_5] : memref<1x32xf32, #tpu.memory_space<vmem>>, vector<1x32xf32>
    %5 = vector.broadcast %4 : vector<1x32xf32> to vector<64x32xf32>
    %6 = arith.addf %3, %5 : vector<64x32xf32>
    %c0_6 = arith.constant 0 : index
    %c0_7 = arith.constant 0 : index
    %c0_8 = arith.constant 0 : index
    %7 = vector.load %arg2[%c0_6, %c0_7, %c0_8] : memref<1x64x32xf32, #tpu.memory_space<vmem>>, vector<1x64x32xf32>
    %8 = vector.shape_cast %7 : vector<1x64x32xf32> to vector<64x32xf32>
    %cst_9 = arith.constant 5.000000e-01 : f32
    %9 = vector.broadcast %cst_9 : f32 to vector<64x32xf32>
    %10 = arith.mulf %8, %9 : vector<64x32xf32>
    %cst_10 = arith.constant 5.000000e-01 : f32
    %11 = vector.broadcast %cst_10 : f32 to vector<64x32xf32>
    %12 = arith.mulf %6, %11 : vector<64x32xf32>
    %13 = arith.addf %10, %12 : vector<64x32xf32>
    %c0_11 = arith.constant 0 : index
    %c0_12 = arith.constant 0 : index
    %c0_13 = arith.constant 0 : index
    %14 = vector.load %arg3[%c0_11, %c0_12, %c0_13] : memref<1x64x32xf32, #tpu.memory_space<vmem>>, vector<1x64x32xf32>
    %15 = vector.shape_cast %14 : vector<1x64x32xf32> to vector<64x32xf32>
    %16 = arith.addf %15, %13 : vector<64x32xf32>
    %c0_14 = arith.constant 0 : index
    %c0_15 = arith.constant 0 : index
    %c0_16 = arith.constant 0 : index
    %17 = vector.load %arg7[%c0_14, %c0_15, %c0_16] : memref<1x64x32xf32, #tpu.memory_space<vmem>>, vector<1x64x32xf32>
    %18 = vector.shape_cast %17 : vector<1x64x32xf32> to vector<64x32xf32>
    %19 = vector.shape_cast %16 : vector<64x32xf32> to vector<1x64x32xf32>
    tpu.vector_store %arg7[%c0_14, %c0_15, %c0_16], %19 {strides = array<i32>} : memref<1x64x32xf32, #tpu.memory_space<vmem>>, vector<1x64x32xf32>,
    %c0_17 = arith.constant 0 : index
    %c0_18 = arith.constant 0 : index
    %c0_19 = arith.constant 0 : index
    %20 = vector.load %arg4[%c0_17, %c0_18, %c0_19] : memref<1x64x32xf32, #tpu.memory_space<vmem>>, vector<1x64x32xf32>
    %21 = vector.shape_cast %20 : vector<1x64x32xf32> to vector<64x32xf32>
    %22 = arith.subf %21, %13 : vector<64x32xf32>
    %c0_20 = arith.constant 0 : index
    %c0_21 = arith.constant 0 : index
    %c0_22 = arith.constant 0 : index
    %23 = vector.load %arg8[%c0_20, %c0_21, %c0_22] : memref<1x64x32xf32, #tpu.memory_space<vmem>>, vector<1x64x32xf32>
    %24 = vector.shape_cast %23 : vector<1x64x32xf32> to vector<64x32xf32>
    %25 = vector.shape_cast %22 : vector<64x32xf32> to vector<1x64x32xf32>
    tpu.vector_store %arg8[%c0_20, %c0_21, %c0_22], %25 {strides = array<i32>} : memref<1x64x32xf32, #tpu.memory_space<vmem>>, vector<1x64x32xf32>,
    return
  }
  func.func @transform_0(%arg0: i32) -> (i32, i32, i32) {
    %c0_i32 = arith.constant 0 : i32
    %c0_i32_0 = arith.constant 0 : i32
    %c0_i32_1 = arith.constant 0 : i32
    return %arg0, %c0_i32, %c0_i32_0 : i32, i32, i32
  }
  func.func @transform_1(%arg0: i32) -> (i32, i32, i32) {
    %c0_i32 = arith.constant 0 : i32
    %c0_i32_0 = arith.constant 0 : i32
    %c0_i32_1 = arith.constant 0 : i32
    return %arg0, %c0_i32, %c0_i32_0 : i32, i32, i32
  }
  func.func @transform_2(%arg0: i32) -> (i32, i32, i32) {
    %c0_i32 = arith.constant 0 : i32
    %c0_i32_0 = arith.constant 0 : i32
    %c0_i32_1 = arith.constant 0 : i32
    return %arg0, %c0_i32, %c0_i32_0 : i32, i32, i32
  }
  func.func @transform_3(%arg0: i32) -> (i32, i32, i32) {
    %c0_i32 = arith.constant 0 : i32
    %c0_i32_0 = arith.constant 0 : i32
    %c0_i32_1 = arith.constant 0 : i32
    return %arg0, %c0_i32, %c0_i32_0 : i32, i32, i32
  }
  func.func @transform_4(%arg0: i32) -> (i32, i32) {
    %c0_i32 = arith.constant 0 : i32
    %c0_i32_0 = arith.constant 0 : i32
    %c0_i32_1 = arith.constant 0 : i32
    return %c0_i32, %c0_i32_0 : i32, i32
  }
  func.func @transform_5(%arg0: i32) -> (i32, i32) {
    %c0_i32 = arith.constant 0 : i32
    %c0_i32_0 = arith.constant 0 : i32
    %c0_i32_1 = arith.constant 0 : i32
    return %c0_i32, %c0_i32_0 : i32, i32
  }
  func.func @transform_6(%arg0: i32) -> (i32, i32, i32) {
    %c0_i32 = arith.constant 0 : i32
    %c0_i32_0 = arith.constant 0 : i32
    %c0_i32_1 = arith.constant 0 : i32
    return %arg0, %c0_i32, %c0_i32_0 : i32, i32, i32
  }
  func.func @transform_7(%arg0: i32) -> (i32, i32, i32) {
    %c0_i32 = arith.constant 0 : i32
    %c0_i32_0 = arith.constant 0 : i32
    %c0_i32_1 = arith.constant 0 : i32
    return %arg0, %c0_i32, %c0_i32_0 : i32, i32, i32
  }
}

</mosaic_0001>

<bundles_post_ra>
// kernel: forward.9
= control target key start
LH: loop header
LB: loop body
LE: loop exit
PB: predicated region body
PF: predicated region fallthrough
CT: control target
= control target key end

     0   :  { %s1132_s24 = smov 0   ;;  %s1355_s0 = inlined_call_operand.vmem [shape: bf16[2,64,288], index: 0, kind: input, shape index: {}]   ;;  %s1356_s1 = inlined_call_operand.vmem [shape: f32[2,64,32], index: 1, kind: input, shape index: {}]   ;;  %s1357_s2 = inlined_call_operand.vmem [shape: f32[2,64,32], index: 2, kind: input, shape index: {}, may-alias: {2,6}]   ;;  %s1358_s3 = inlined_call_operand.vmem [shape: f32[2,64,32], index: 3, kind: input, shape index: {}, may-alias: {3,7}]   ;;  %s1359_s4 = inlined_call_operand.vmem [shape: bf16[288,32], index: 4, kind: input, shape index: {}]   ;;  %s1360_s5 = inlined_call_operand.vmem [shape: f32[1,32], index: 5, kind: input, shape index: {}]   ;;  %s1361_s6 = inlined_call_operand.vmem [shape: f32[2,64,32], index: 6, kind: output, shape index: {0}, may-alias: {2,6}]   ;;  %s1362_s7 = inlined_call_operand.vmem [shape: f32[2,64,32], index: 7, kind: output, shape index: {1}, may-alias: {3,7}]  }
   0x1 LB: > { %s881_s25 = sadd.s32 4294967295, %s1090_s24   ;;  %p885_p0 = scmp.ge.s32.totalorder %s1090_s24, 1  ;;  %s1090_s24 = sphi %s1132_s24, %s18_s24  }
   0x2   : > { %p270_p1 = scmp.lt.s32.totalorder %s1090_s24, 3 }
   0x4   : > { %p271_p2 = pnand %p885_p0, %p270_p1 }
   0x5   : > { %p322_p3 = scmp.lt.s32.totalorder (!%p271_p2), %s881_s25, 1 }
   0x6   : > { %274 = sbr.rel (%p271_p2) target bundleno = 229 (0xe5), region = 44 }
   0xb   : > { %v1047_v0 = vld [vmem:[%s1359_s4 + $0x38] sm:$0xff]  ;;  %v1057_v2 = vld [vmem:[%s1359_s4 + $0x88] sm:$0xff]  ;;  %v1046_v3 = vld [vmem:[%s1359_s4 + $0x30] sm:$0xff]  ;;  %s1364_s25 = smov (!%p322_p3, %s881_s25), 1  ;;  %vm577_vm0 = vcmask 261120  }
   0xc   : > { %v1146_v1 = vld [vmem:[%s1359_s4 + $0x78] sm:$0xff]  ;;  %590 = vmatpush.bf16.msra.mxu0 %v1047_v0  ;;  %1058 = vmatpush.bf16.msra.mxu3 %v1047_v0  ;;  %v1054_v4 = vld [vmem:[%s1359_s4 + $0x70] sm:$0xff]  ;;  %v1056_v5 = vld [vmem:[%s1359_s4 + $0x80] sm:$0xff]  ;;  %s1074_s15 = smul.u32 96, %s1364_s25  ;;  %s1239_s23 = sshll.u32 %s1364_s25, 6 }
   0xd   : > { %1066 = vmatpush.bf16.msra.mxu1 %v1146_v1  ;;  %654 = vmatpush.bf16.msra.mxu2 %v1057_v2  ;;  %v1045_v6 = vld [vmem:[%s1359_s4 + $0x28] sm:$0xff]  ;;  %v1044_v11 = vld [vmem:[%s1359_s4 + $0x20] sm:$0xff]  ;;  %v1043_v13 = vld [vmem:[%s1359_s4 + $0x18] sm:$0xff]  ;;  %s1250_s29 = scalar_lea.vmem %s1356_s1, %s1239_s23  ;;  %s336_s8 = scalar_lea.vmem %s1357_s2, %s1239_s23 }
   0xe   : > { %s1170_s20 = scalar_lea.vmem %s1355_s0, %s1074_s15  ;;  %v1053_v7 = vld [vmem:[%s1359_s4 + $0x68] sm:$0xff]  ;;  %v1052_v12 = vld [vmem:[%s1359_s4 + $0x60] sm:$0xff]  ;;  %v1051_v14 = vld [vmem:[%s1359_s4 + $0x58] sm:$0xff]  ;;  %s341_s11 = scalar_lea.vmem %s1358_s3, %s1239_s23 }
   0xf   : > { %v907_v8 = vld [vmem:[%s1170_s20 + $0x8] sm:$0xf]  ;;  %v1030_v9 = vld [vmem:[%s1170_s20 + $0x10] sm:$0xf0]  ;;  %v919_v17 = vld [vmem:[%s1170_s20 + $0x20] sm:$0xf]  ;;  %s1276_s14 = scalar_lea.vmem %s1361_s6, %s1239_s23  ;;  %s1288_s17 = scalar_lea.vmem %s1362_s7, %s1239_s23 }
  0x10   : > { %591 = vmatpush.bf16.msra.mxu0 %v1046_v3  ;;  %1059 = vmatpush.bf16.msra.mxu3 %v1046_v3  ;;  %v908_v10 = vor.u32 %v1030_v9, %v907_v8  ;;  %v1042_v15 = vld [vmem:[%s1359_s4 + $0x10] sm:$0xff]  ;;  %v1033_v18 = vld [vmem:[%s1170_s20 + $0x28] sm:$0xf0]  ;;  %v1040_v22 = vld [vmem:[%s1359_s4] sm:$0xff] }
  0x11   : > { %1067 = vmatpush.bf16.msra.mxu1 %v1054_v4  ;;  %655 = vmatpush.bf16.msra.mxu2 %v1056_v5  ;;  %v1050_v16 = vld [vmem:[%s1359_s4 + $0x50] sm:$0xff]  ;;  %v1041_v19 = vld [vmem:[%s1359_s4 + $0x8] sm:$0xff]  ;;  %v920_v21 = vor.u32 %v1033_v18, %v919_v17  ;;  %v911_v23 = vld [vmem:[%s1170_s20 + $0x18] sm:$0xf] }
  0x12   : > { %v1049_v20 = vld [vmem:[%s1359_s4 + $0x48] sm:$0xff]  ;;  %v1032_v24 = vld [vmem:[%s1170_s20 + $0x20] sm:$0xf0]  ;;  %v899_v25 = vld [vmem:[%s1170_s20] sm:$0xf] }
  0x13   : > { %v1029_v26 = vld [vmem:[%s1170_s20 + $0x8] sm:$0xf0]  ;;  %v1048_v27 = vld [vmem:[%s1359_s4 + $0x40] sm:$0xff]  ;;  %v1031_v28 = vld [vmem:[%s1170_s20 + $0x1c] sm:$0xf]  ;;  %v912_v30 = vor.u32 %v1032_v24, %v911_v23 }
  0x14   : > { %592 = vmatpush.bf16.msra.mxu0 %v1045_v6  ;;  %1060 = vmatpush.bf16.msra.mxu3 %v1045_v6  ;;  %v913_v29 = vld [vmem:[%s1170_s20 + $0x24] sm:$0xf0]  ;;  %v900_v31 = vor.u32 %v1029_v26, %v899_v25  ;;  %v931_v33 = vld [vmem:[%s1170_s20 + $0x38] sm:$0xf]  ;;  %v1036_v34 = vld [vmem:[%s1170_s20 + $0x40] sm:$0xf0] }
  0x15   : > { %1068 = vmatpush.bf16.msra.mxu1 %v1053_v7  ;;  %1017 = vmatmul.msk.bf16.vlgmr.msra.gmra.mxu2 %vm577_vm0, %v908_v10  ;;  %v916_v32 = vor.u32 %v1031_v28, %v913_v29  ;;  %v932_v35 = vor.u32 %v1036_v34, %v931_v33  ;;  %v923_v36 = vld [vmem:[%s1170_s20 + $0x30] sm:$0xf]  ;;  %v1035_v37 = vld [vmem:[%s1170_s20 + $0x38] sm:$0xf0]  ;;  %v1034_v38 = vld [vmem:[%s1170_s20 + $0x34] sm:$0xf] }
  0x16   : > { %v925_v39 = vld [vmem:[%s1170_s20 + $0x3c] sm:$0xf0]  ;;  %v924_v40 = vor.u32 %v1035_v37, %v923_v36  ;;  %v943_v42 = vld [vmem:[%s1170_s20 + $0x50] sm:$0xf]  ;;  %v1039_v43 = vld [vmem:[%s1170_s20 + $0x58] sm:$0xf0] }
  0x17   : > { %v928_v41 = vor.u32 %v1034_v38, %v925_v39  ;;  %v944_v44 = vor.u32 %v1039_v43, %v943_v42  ;;  %v1028_v45 = vld [vmem:[%s1170_s20 + $0x4] sm:$0xf]  ;;  %v901_v46 = vld [vmem:[%s1170_s20 + $0xc] sm:$0xf0]  ;;  %v935_v48 = vld [vmem:[%s1170_s20 + $0x48] sm:$0xf] }
  0x18   : > { %593 = vmatpush.bf16.msra.mxu0 %v1044_v11  ;;  %1061 = vmatpush.bf16.msra.mxu3 %v1044_v11  ;;  %v904_v47 = vor.u32 %v1028_v45, %v901_v46  ;;  %v1038_v49 = vld [vmem:[%s1170_s20 + $0x50] sm:$0xf0]  ;;  %v1037_v50 = vld [vmem:[%s1170_s20 + $0x4c] sm:$0xf]  ;;  %v937_v51 = vld [vmem:[%s1170_s20 + $0x54] sm:$0xf0] }
  0x19   : > { %1069 = vmatpush.bf16.msra.mxu1 %v1052_v12  ;;  %v936_v52 = vor.u32 %v1038_v49, %v935_v48  ;;  %v940_v53 = vor.u32 %v1037_v50, %v937_v51  ;;  %v1244_v58 = vld [vmem:[%s1360_s5] ss:$0 sm:$0xff]  ;;  %v679_v61 = vld [vmem:[%s1250_s29 + $0x10] sm:$0xff]  ;;  %v680_v8 = vld [vmem:[%s1250_s29 + $0x18] sm:$0xff] }
  0x1a   : > { %v687_v3 = vmul.f32 0.5, %v679_v61  ;;  %v711_v5 = vld [vmem:[%s336_s8 + $0x10] sm:$0xff]  ;;  %v712_v9 = vld [vmem:[%s336_s8 + $0x18] sm:$0xff]  ;;  %v713_v10 = vld [vmem:[%s336_s8 + $0x20] sm:$0xff] }
  0x1b   : > { %v735_v6 = vld [vmem:[%s341_s11 + $0x10] sm:$0xff]  ;;  %v1263_v11 = vld [vmem:[%s336_s8] sm:$0xff]  ;;  %v1268_v17 = vld [vmem:[%s336_s8 + $0x28] sm:$0xff] }
  0x1c   : > { %594 = vmatpush.bf16.msra.mxu0 %v1043_v13  ;;  %1062 = vmatpush.bf16.msra.mxu3 %v1043_v13  ;;  %v1270_v18 = vld [vmem:[%s341_s11 + $0x28] sm:$0xff]  ;;  %v1292_v26 = vld [vmem:[%s341_s11 + $0x30] sm:$0xff]  ;;  %v681_v37 = vld [vmem:[%s1250_s29 + $0x20] sm:$0xff] }
  0x1d   : > { %1070 = vmatpush.bf16.msra.mxu1 %v1051_v14  ;;  %v1290_v25 = vld [vmem:[%s341_s11 + $0x8] sm:$0xff]  ;;  %v689_v42 = vmul.f32 0.5, %v681_v37 }
  0x20   : > { %595 = vmatpush.bf16.msra.mxu0 %v1042_v15  ;;  %1063 = vmatpush.bf16.msra.mxu3 %v1042_v15  ;;  %v737_v15 = vld [vmem:[%s341_s11 + $0x20] sm:$0xff] }
  0x21   : > { %1071 = vmatpush.bf16.msra.mxu1 %v1050_v16 }
  0x24   : > { %596 = vmatpush.bf16.msra.mxu0 %v1041_v19  ;;  %1064 = vmatpush.bf16.msra.mxu3 %v1041_v19  ;;  %v1278_v19 = vld [vmem:[%s336_s8 + $0x8] sm:$0xff] }
  0x25   : > { %1072 = vmatpush.bf16.msra.mxu1 %v1049_v20  ;;  %1018 = vmatmul.msk.bf16.gmra.mxu2 %vm577_vm0, %v920_v21  ;;  %v1282_v21 = vld [vmem:[%s336_s8 + $0x38] sm:$0xff] }
  0x28   : > { %597 = vmatpush.bf16.msra.mxu0 %v1040_v22  ;;  %1065 = vmatpush.bf16.msra.mxu3 %v1040_v22 }
  0x29   : > { %1073 = vmatpush.bf16.msra.mxu1 %v1048_v27 }
  0x2b   : > { %603 = vmatmul.bf16.vlgmr.msra.gmra.mxu3 %v912_v30  ;;  %598 = vmatmul.bf16.vlgmr.msra.gmra.mxu0 %v900_v31  ;;  %v688_v30 = vmul.f32 0.5, %v680_v8 }
  0x2c   : > { %619 = vmatpush.bf16.msrb.mxu0 %v1146_v1  ;;  %632 = vmatmul.bf16.vlgmr.msra.gmra.mxu1 %v916_v32 }
  0x30   : > { %620 = vmatpush.bf16.msrb.mxu0 %v1054_v4 }
  0x34   : > { %621 = vmatpush.bf16.msrb.mxu0 %v1053_v7 }
  0x35   : > { %1019 = vmatmul.msk.bf16.gmra.mxu2 %vm577_vm0, %v932_v35 }
  0x38   : > { %622 = vmatpush.bf16.msrb.mxu0 %v1052_v12 }
  0x3b   : > { %608 = vmatmul.bf16.gmra.mxu3 %v924_v40 }
  0x3c   : > { %623 = vmatpush.bf16.msrb.mxu0 %v1051_v14  ;;  %637 = vmatmul.bf16.gmra.mxu1 %v928_v41  ;;  %v736_v14 = vld [vmem:[%s341_s11 + $0x18] sm:$0xff] }
  0x40   : > { %624 = vmatpush.bf16.msrb.mxu0 %v1050_v16  ;;  %v1266_v16 = vld [vmem:[%s341_s11] sm:$0xff] }
  0x44   : > { %625 = vmatpush.bf16.msrb.mxu0 %v1049_v20  ;;  %v1280_v20 = vld [vmem:[%s336_s8 + $0x30] sm:$0xff] }
  0x45   : > { %1020 = vmatmul.msk.bf16.gmra.mxu2 %vm577_vm0, %v944_v44 }
  0x48   : > { %626 = vmatpush.bf16.msrb.mxu0 %v1048_v27  ;;  %v1294_v27 = vld [vmem:[%s341_s11 + $0x38] sm:$0xff] }
  0x4b   : > { %627 = vmatmul.bf16.vlgmr.msrb.gmra.mxu0 %v904_v47  ;;  %613 = vmatmul.bf16.gmra.mxu3 %v936_v52  ;;  %v677_v47 = vld [vmem:[%s1250_s29] sm:$0xff] }
  0x4c   : > { %642 = vmatmul.bf16.gmra.mxu1 %v940_v53 }
  0x98   : > { %v1234_v54 = vpop.f32.mrf.mxu2 }
  0xa0   : > { %v1236_v55 = vpop.f32.mrf.mxu2 }
  0xa8   : > { %v662_v56 = vpop.f32.mrf.mxu2  ;;  %v599_v0 = vpop.f32.mrf.mxu0 }
  0xa9   : > { %v633_v57 = vpop.f32.mrf.mxu1  ;;  %v600_v43 = vadd.f32 %v1244_v58, %v599_v0 }
  0xae   : > { %v604_v59 = vpop.f32.mrf.mxu3 }
  0xaf   : > { %v605_v60 = vadd.f32 %v1244_v58, %v604_v59 }
  0xb0   : > { %v664_v1 = vpop.f32.mrf.mxu2  ;;  %v601_v31 = vpop.f32.mrf.mxu0 }
  0xb1   : > { %v634_v62 = vadd.f32 %v633_v57, %v605_v60  ;;  %v635_v63 = vpop.f32.mrf.mxu1  ;;  %v682_v57 = vld [vmem:[%s1250_s29 + $0x28] sm:$0xff] }
  0xb2   : > { %v690_v0 = vmul.f32 0.5, %v682_v57 }
  0xb3   : > { %v663_v2 = vadd.f32 %v662_v56, %v634_v62  ;;  %v685_v56 = vmul.f32 0.5, %v677_v47 }
  0xb5   : > { %v695_v4 = vmul.f32 0.5, %v663_v2 }
  0xb6   : > { %v606_v7 = vpop.f32.mrf.mxu3 }
  0xb7   : > { %v703_v12 = vadd.f32 %v695_v4, %v687_v3  ;;  %v607_v13 = vadd.f32 %v1244_v58, %v606_v7 }
  0xb8   : > { %v667_v32 = vpop.f32.mrf.mxu2 }
  0xb9   : > { %v719_v22 = vadd.f32 %v711_v5, %v703_v12  ;;  %v743_v23 = vsub.f32 %v735_v6, %v703_v12  ;;  %v636_v24 = vadd.f32 %v635_v63, %v607_v13  ;;  %v638_v28 = vpop.f32.mrf.mxu1 }
  0xbb   : > { %v665_v29 = vadd.f32 %v664_v1, %v636_v24  ;;  %727 = vst.msk [vmem:[%s1276_s14 + $0x10] sm:$0xff] %vm577_vm0, %v719_v22  ;;  %v602_v1 = vadd.f32 %v1244_v58, %v601_v31  ;;  %v683_v22 = vld [vmem:[%s1250_s29 + $0x30] sm:$0xff] }
  0xbc   : > { %751 = vst.msk [vmem:[%s1288_s17 + $0x10] sm:$0xff] %vm577_vm0, %v743_v23 }
  0xbd   : > { %v696_v33 = vmul.f32 0.5, %v665_v29  ;;  %v691_v29 = vmul.f32 0.5, %v683_v22 }
  0xbe   : > { %v609_v34 = vpop.f32.mrf.mxu3 }
  0xbf   : > { %v704_v35 = vadd.f32 %v696_v33, %v688_v30  ;;  %v610_v36 = vadd.f32 %v1244_v58, %v609_v34 }
  0xc0   : > { %v669_v48 = vpop.f32.mrf.mxu2 }
  0xc1   : > { %v720_v38 = vadd.f32 %v712_v9, %v704_v35  ;;  %v744_v39 = vsub.f32 %v736_v14, %v704_v35  ;;  %v639_v40 = vadd.f32 %v638_v28, %v610_v36  ;;  %v640_v44 = vpop.f32.mrf.mxu1  ;;  %v684_v35 = vld [vmem:[%s1250_s29 + $0x38] sm:$0xff] }
  0xc3   : > { %v668_v41 = vadd.f32 %v667_v32, %v639_v40  ;;  %728 = vst.msk [vmem:[%s1276_s14 + $0x18] sm:$0xff] %vm577_vm0, %v720_v38 }
  0xc4   : > { %752 = vst.msk [vmem:[%s1288_s17 + $0x18] sm:$0xff] %vm577_vm0, %v744_v39 }
  0xc5   : > { %v697_v45 = vmul.f32 0.5, %v668_v41 }
  0xc6   : > { %v611_v50 = vpop.f32.mrf.mxu3 }
  0xc7   : > { %v705_v51 = vadd.f32 %v697_v45, %v689_v42  ;;  %v612_v52 = vadd.f32 %v1244_v58, %v611_v50 }
  0xc8   : > { %v628_v46 = vpop.f32.mrf.mxu0  ;;  %v672_v13 = vpop.f32.mrf.mxu2 }
  0xc9   : > { %v629_v49 = vadd.f32 %v628_v46, %v600_v43  ;;  %v721_v59 = vadd.f32 %v713_v10, %v705_v51  ;;  %v745_v60 = vsub.f32 %v737_v15, %v705_v51  ;;  %v641_v61 = vadd.f32 %v640_v44, %v612_v52  ;;  %v643_v7 = vpop.f32.mrf.mxu1 }
  0xcb   : > { %v658_v53 = vadd.f32 %v1234_v54, %v629_v49  ;;  %v670_v63 = vadd.f32 %v669_v48, %v641_v61  ;;  %729 = vst.msk [vmem:[%s1276_s14 + $0x20] sm:$0xff] %vm577_vm0, %v721_v59  ;;  %v678_v54 = vld [vmem:[%s1250_s29 + $0x8] sm:$0xff] }
  0xcc   : > { %753 = vst.msk [vmem:[%s1288_s17 + $0x20] sm:$0xff] %vm577_vm0, %v745_v60  ;;  %v686_v15 = vmul.f32 0.5, %v678_v54 }
  0xcd   : > { %v693_v62 = vmul.f32 0.5, %v658_v53  ;;  %v698_v3 = vmul.f32 0.5, %v670_v63 }
  0xce   : > { %v614_v9 = vpop.f32.mrf.mxu3 }
  0xcf   : > { %v701_v2 = vadd.f32 %v693_v62, %v685_v56  ;;  %v706_v10 = vadd.f32 %v698_v3, %v690_v0  ;;  %v615_v12 = vadd.f32 %v1244_v58, %v614_v9 }
  0xd0   : > { %v630_v4 = vpop.f32.mrf.mxu0 }
  0xd1   : > { %v717_v5 = vadd.f32 %v1263_v11, %v701_v2  ;;  %v741_v6 = vsub.f32 %v1266_v16, %v701_v2  ;;  %v631_v8 = vadd.f32 %v630_v4, %v602_v1  ;;  %v722_v23 = vadd.f32 %v1268_v17, %v706_v10  ;;  %v645_v34 = vpop.f32.mrf.mxu1 }
  0xd2   : > { %v746_v11 = vsub.f32 %v1270_v18, %v706_v10  ;;  %v644_v16 = vadd.f32 %v643_v7, %v615_v12 }
  0xd3   : > { %v660_v14 = vadd.f32 %v1236_v55, %v631_v8  ;;  %725 = vst.msk [vmem:[%s1276_s14] sm:$0xff] %vm577_vm0, %v717_v5 }
  0xd4   : > { %749 = vst.msk [vmem:[%s1288_s17] sm:$0xff] %vm577_vm0, %v741_v6  ;;  %v673_v28 = vadd.f32 %v672_v13, %v644_v16 }
  0xd5   : > { %v694_v24 = vmul.f32 0.5, %v660_v14  ;;  %730 = vst.msk [vmem:[%s1276_s14 + $0x28] sm:$0xff] %vm577_vm0, %v722_v23 }
  0xd6   : > { %754 = vst.msk [vmem:[%s1288_s17 + $0x28] sm:$0xff] %vm577_vm0, %v746_v11  ;;  %v699_v30 = vmul.f32 0.5, %v673_v28  ;;  %v616_v31 = vpop.f32.mrf.mxu3 }
  0xd7   : > { %v702_v55 = vadd.f32 %v694_v24, %v686_v15  ;;  %v617_v33 = vadd.f32 %v1244_v58, %v616_v31 }
  0xd8   : > { %v707_v32 = vadd.f32 %v699_v30, %v691_v29 }
  0xd9   : > { %v718_v17 = vadd.f32 %v1278_v19, %v702_v55  ;;  %v742_v18 = vsub.f32 %v1290_v25, %v702_v55  ;;  %v646_v38 = vadd.f32 %v645_v34, %v617_v33  ;;  %v674_v19 = vpop.f32.mrf.mxu2  ;;  %v692_v25 = vmul.f32 0.5, %v684_v35 }
  0xda   : > { %v723_v36 = vadd.f32 %v1280_v20, %v707_v32  ;;  %v747_v37 = vsub.f32 %v1292_v26, %v707_v32 }
  0xdb   : > { %726 = vst.msk [vmem:[%s1276_s14 + $0x8] sm:$0xff] %vm577_vm0, %v718_v17  ;;  %v675_v39 = vadd.f32 %v674_v19, %v646_v38 }
  0xdc   : > { %750 = vst.msk [vmem:[%s1288_s17 + $0x8] sm:$0xff] %vm577_vm0, %v742_v18 }
  0xdd   : > { %731 = vst.msk [vmem:[%s1276_s14 + $0x30] sm:$0xff] %vm577_vm0, %v723_v36  ;;  %v700_v58 = vmul.f32 0.5, %v675_v39 }
  0xde   : > { %755 = vst.msk [vmem:[%s1288_s17 + $0x30] sm:$0xff] %vm577_vm0, %v747_v37 }
  0xdf   : > { %v708_v40 = vadd.f32 %v700_v58, %v692_v25 }
  0xe1   : > { %v724_v41 = vadd.f32 %v1282_v21, %v708_v40  ;;  %v748_v42 = vsub.f32 %v1294_v27, %v708_v40 }
  0xe3   : > { %732 = vst.msk [vmem:[%s1276_s14 + $0x38] sm:$0xff] %vm577_vm0, %v724_v41 }
  0xe4   : > { %756 = vst.msk [vmem:[%s1288_s17 + $0x38] sm:$0xff] %vm577_vm0, %v748_v42 }
  0xe5 PF: > { %s18_s24 = sadd.s32 1, %s1090_s24  }
  0xe6   : > { %p15_p4 = scmp.ge.s32.totalorder %s18_s24, 4  }
  0xe8   :  { %17 = sbr.rel (!%p15_p4) target bundleno = 1 (0x1), region = 95 }

// kernel: forward.8
= control target key start
LH: loop header
LB: loop body
LE: loop exit
PB: predicated region body
PF: predicated region fallthrough
CT: control target
= control target key end

     0   :  { %vm483_vm0 = vcmask 261120   ;;  %vm1007_vm1 = vcmask 523264   ;;  %s6957_s1 = inlined_call_operand.vmem [shape: bf16[32,64], index: 1, kind: input, shape index: {}]   ;;  %s6958_s0 = inlined_call_operand.vmem [shape: bf16[1024,32], index: 0, kind: input, shape index: {}]   ;;  %s6959_s2 = inlined_call_operand.vmem [shape: f32[1,64], index: 2, kind: input, shape index: {}]   ;;  %s6960_s3 = inlined_call_operand.vmem [shape: s32[1024,1], index: 3, kind: output, shape index: {}]  }
   0x1   :  { %v4094_v0 = vld [vmem:[%s6957_s1 + $0x8] sm:$0xff]  ;;  %v4093_v1 = vld [vmem:[%s6957_s1] sm:$0xff]  ;;  %v4031_v10 = vld [vmem:[%s6958_s0 + $0x10] sm:$0xff] }
   0x2   :  { %682 = vmatpush.bf16.msra.mxu0 %v4094_v0  ;;  %4095 = vmatpush.bf16.msra.mxu1 %v4094_v0  ;;  %v4029_v2 = vld [vmem:[%s6958_s0] sm:$0xff]  ;;  %v4030_v6 = vld [vmem:[%s6958_s0 + $0x8] sm:$0xff]  ;;  %v4047_v11 = vld [vmem:[%s6958_s0 + $0x90] sm:$0xff] }
   0x3   :  { %4096 = vmatpush.bf16.msra.mxu2 %v4094_v0  ;;  %4097 = vmatpush.bf16.msra.mxu3 %v4094_v0  ;;  %v4045_v3 = vld [vmem:[%s6958_s0 + $0x80] sm:$0xff]  ;;  %v4046_v7 = vld [vmem:[%s6958_s0 + $0x88] sm:$0xff]  ;;  %v4063_v12 = vld [vmem:[%s6958_s0 + $0x110] sm:$0xff] }
   0x4   :  { %v4061_v4 = vld [vmem:[%s6958_s0 + $0x100] sm:$0xff]  ;;  %v4078_v8 = vld [vmem:[%s6958_s0 + $0x188] sm:$0xff]  ;;  %v4079_v13 = vld [vmem:[%s6958_s0 + $0x190] sm:$0xff] }
   0x5   :  { %v4077_v5 = vld [vmem:[%s6958_s0 + $0x180] sm:$0xff]  ;;  %v4062_v9 = vld [vmem:[%s6958_s0 + $0x108] sm:$0xff]  ;;  %v4032_v14 = vld [vmem:[%s6958_s0 + $0x18] sm:$0xff] }
   0x6   :  { %683 = vmatpush.bf16.msra.mxu0 %v4093_v1  ;;  %4098 = vmatpush.bf16.msra.mxu1 %v4093_v1  ;;  %v4048_v15 = vld [vmem:[%s6958_s0 + $0x98] sm:$0xff]  ;;  %v4033_v18 = vld [vmem:[%s6958_s0 + $0x20] sm:$0xff]  ;;  %v4034_v22 = vld [vmem:[%s6958_s0 + $0x28] sm:$0xff] }
   0x7   :  { %4099 = vmatpush.bf16.msra.mxu2 %v4093_v1  ;;  %4100 = vmatpush.bf16.msra.mxu3 %v4093_v1  ;;  %v4064_v16 = vld [vmem:[%s6958_s0 + $0x118] sm:$0xff]  ;;  %v4049_v19 = vld [vmem:[%s6958_s0 + $0xa0] sm:$0xff]  ;;  %v4050_v23 = vld [vmem:[%s6958_s0 + $0xa8] sm:$0xff] }
   0x8   :  { %v4080_v17 = vld [vmem:[%s6958_s0 + $0x198] sm:$0xff]  ;;  %v4065_v20 = vld [vmem:[%s6958_s0 + $0x120] sm:$0xff]  ;;  %v4066_v24 = vld [vmem:[%s6958_s0 + $0x128] sm:$0xff] }
   0x9   :  { %3965 = vmatmul.msk.bf16.vlgmr.msra.gmra.mxu0 %vm483_vm0, %v4029_v2  ;;  %3981 = vmatmul.msk.bf16.vlgmr.msra.gmra.mxu1 %vm483_vm0, %v4045_v3  ;;  %v4081_v21 = vld [vmem:[%s6958_s0 + $0x1a0] sm:$0xff]  ;;  %v4082_v25 = vld [vmem:[%s6958_s0 + $0x1a8] sm:$0xff]  ;;  %v4035_v26 = vld [vmem:[%s6958_s0 + $0x30] sm:$0xff] }
   0xa   :  { %3997 = vmatmul.msk.bf16.vlgmr.msra.gmra.mxu2 %vm483_vm0, %v4061_v4  ;;  %4013 = vmatmul.msk.bf16.vlgmr.msra.gmra.mxu3 %vm483_vm0, %v4077_v5  ;;  %v4067_v27 = vld [vmem:[%s6958_s0 + $0x130] sm:$0xff]  ;;  %v4068_v30 = vld [vmem:[%s6958_s0 + $0x138] sm:$0xff]  ;;  %v4260_v34 = vld [vmem:[%s6959_s2] ss:$0 sm:$0xff] }
   0xb   :  { %v4083_v28 = vld [vmem:[%s6958_s0 + $0x1b0] sm:$0xff]  ;;  %v4036_v31 = vld [vmem:[%s6958_s0 + $0x38] sm:$0xff]  ;;  %v4053_v49 = vld [vmem:[%s6958_s0 + $0xc0] sm:$0xff] }
   0xc   :  { %v4051_v29 = vld [vmem:[%s6958_s0 + $0xb0] sm:$0xff]  ;;  %v4084_v32 = vld [vmem:[%s6958_s0 + $0x1b8] sm:$0xff]  ;;  %v4069_v50 = vld [vmem:[%s6958_s0 + $0x140] sm:$0xff] }
   0xd   :  { %v4052_v33 = vld [vmem:[%s6958_s0 + $0xb8] sm:$0xff]  ;;  %v4037_v58 = vld [vmem:[%s6958_s0 + $0x40] sm:$0xff] }
   0xe   :  { %v4085_v63 = vld [vmem:[%s6958_s0 + $0x1c0] sm:$0xff] }
  0x19   :  { %3966 = vmatmul.msk.bf16.gmra.mxu0 %vm483_vm0, %v4030_v6  ;;  %3982 = vmatmul.msk.bf16.gmra.mxu1 %vm483_vm0, %v4046_v7 }
  0x1a   :  { %4014 = vmatmul.msk.bf16.gmra.mxu3 %vm483_vm0, %v4078_v8  ;;  %3998 = vmatmul.msk.bf16.gmra.mxu2 %vm483_vm0, %v4062_v9 }
  0x29   :  { %3967 = vmatmul.msk.bf16.gmra.mxu0 %vm483_vm0, %v4031_v10  ;;  %3983 = vmatmul.msk.bf16.gmra.mxu1 %vm483_vm0, %v4047_v11 }
  0x2a   :  { %3999 = vmatmul.msk.bf16.gmra.mxu2 %vm483_vm0, %v4063_v12  ;;  %4015 = vmatmul.msk.bf16.gmra.mxu3 %vm483_vm0, %v4079_v13 }
  0x39   :  { %3968 = vmatmul.msk.bf16.gmra.mxu0 %vm483_vm0, %v4032_v14  ;;  %3984 = vmatmul.msk.bf16.gmra.mxu1 %vm483_vm0, %v4048_v15 }
  0x3a   :  { %4000 = vmatmul.msk.bf16.gmra.mxu2 %vm483_vm0, %v4064_v16  ;;  %4016 = vmatmul.msk.bf16.gmra.mxu3 %vm483_vm0, %v4080_v17  ;;  %v4038_v17 = vld [vmem:[%s6958_s0 + $0x48] sm:$0xff] }
  0x49   :  { %3969 = vmatmul.msk.bf16.gmra.mxu0 %vm483_vm0, %v4033_v18  ;;  %3985 = vmatmul.msk.bf16.gmra.mxu1 %vm483_vm0, %v4049_v19 }
  0x4a   :  { %4001 = vmatmul.msk.bf16.gmra.mxu2 %vm483_vm0, %v4065_v20  ;;  %4017 = vmatmul.msk.bf16.gmra.mxu3 %vm483_vm0, %v4081_v21  ;;  %v4086_v20 = vld [vmem:[%s6958_s0 + $0x1c8] sm:$0xff] }
  0x59   :  { %3970 = vmatmul.msk.bf16.gmra.mxu0 %vm483_vm0, %v4034_v22  ;;  %3986 = vmatmul.msk.bf16.gmra.mxu1 %vm483_vm0, %v4050_v23 }
  0x5a   :  { %4002 = vmatmul.msk.bf16.gmra.mxu2 %vm483_vm0, %v4066_v24  ;;  %4018 = vmatmul.msk.bf16.gmra.mxu3 %vm483_vm0, %v4082_v25 }
  0x69   :  { %3971 = vmatmul.msk.bf16.gmra.mxu0 %vm483_vm0, %v4035_v26  ;;  %3987 = vmatmul.msk.bf16.gmra.mxu1 %vm483_vm0, %v4051_v29  ;;  %v4054_v26 = vld [vmem:[%s6958_s0 + $0xc8] sm:$0xff] }
  0x6a   :  { %4003 = vmatmul.msk.bf16.gmra.mxu2 %vm483_vm0, %v4067_v27  ;;  %4019 = vmatmul.msk.bf16.gmra.mxu3 %vm483_vm0, %v4083_v28  ;;  %v4070_v27 = vld [vmem:[%s6958_s0 + $0x148] sm:$0xff] }
  0x79   :  { %3972 = vmatmul.msk.bf16.gmra.mxu0 %vm483_vm0, %v4036_v31  ;;  %3988 = vmatmul.msk.bf16.gmra.mxu1 %vm483_vm0, %v4052_v33 }
  0x7a   :  { %4004 = vmatmul.msk.bf16.gmra.mxu2 %vm483_vm0, %v4068_v30  ;;  %4020 = vmatmul.msk.bf16.gmra.mxu3 %vm483_vm0, %v4084_v32 }
  0x86   :  { %v685_v35 = vpop.f32.mrf.mxu0  ;;  %v765_v36 = vpop.f32.mrf.mxu1 }
  0x87   :  { %v4263_v37 = vadd.f32 %v4260_v34, %v685_v35  ;;  %v4266_v38 = vadd.f32 %v4260_v34, %v765_v36 }
  0x89   :  { %v1104_v39 = vsel %vm1007_vm1, %v4266_v38, inf  ;;  %v1008_v40 = vsel %vm1007_vm1, %v4263_v37, inf  ;;  %3989 = vmatmul.msk.bf16.gmra.mxu1 %vm483_vm0, %v4053_v49  ;;  %3973 = vmatmul.msk.bf16.gmra.mxu0 %vm483_vm0, %v4037_v58 }
  0x8a   :  { %1105 = vmin.xlane.f32.xlu2 %v1104_v39  ;;  %1009 = vmin.xlane.f32.xlu0 %v1008_v40 }
  0x8b   :  { %4005 = vmatmul.msk.bf16.gmra.mxu2 %vm483_vm0, %v4069_v50  ;;  %4021 = vmatmul.msk.bf16.gmra.mxu3 %vm483_vm0, %v4085_v63 }
  0x8d   :  { %v845_v41 = vpop.f32.mrf.mxu2  ;;  %v925_v42 = vpop.f32.mrf.mxu3 }
  0x8e   :  { %v4273_v43 = vadd.f32 %v4260_v34, %v845_v41  ;;  %v4276_v44 = vadd.f32 %v4260_v34, %v925_v42  ;;  %v687_v45 = vpop.f32.mrf.mxu0  ;;  %v767_v46 = vpop.f32.mrf.mxu1 }
  0x8f   :  { %v4291_v51 = vadd.f32 %v4260_v34, %v687_v45  ;;  %v4317_v0 = vadd.f32 %v4260_v34, %v767_v46 }
  0x90   :  { %7076 = vst [vmem:[#allocation2_spill] sm:$0xff] %v4273_v43  ;;  %v1200_v47 = vsel %vm1007_vm1, %v4273_v43, inf  ;;  %v1296_v48 = vsel %vm1007_vm1, %v4276_v44, inf }
  0x91   :  { %7077 = vst [vmem:[#allocation3_spill] sm:$0xff] %v4276_v44  ;;  %1201 = vmin.xlane.f32.xlu1 %v1200_v47  ;;  %v1011_v61 = vsel %vm1007_vm1, %v4291_v51, inf  ;;  %v1107_v8 = vsel %vm1007_vm1, %v4317_v0, inf }
  0x92   :  { %1297 = vmin.xlane.f32.xlu0 %v1296_v48 }
  0x95   :  { %v847_v52 = vpop.f32.mrf.mxu2  ;;  %v927_v53 = vpop.f32.mrf.mxu3 }
  0x96   :  { %v4294_v54 = vadd.f32 %v4260_v34, %v847_v52  ;;  %v4297_v55 = vadd.f32 %v4260_v34, %v927_v53  ;;  %v690_v56 = vpop.f32.mrf.mxu0  ;;  %v770_v57 = vpop.f32.mrf.mxu1 }
  0x97   :  { %v4310_v62 = vadd.f32 %v4260_v34, %v690_v56  ;;  %v4329_v9 = vadd.f32 %v4260_v34, %v770_v57  ;;  %v4071_v56 = vld [vmem:[%s6958_s0 + $0x150] sm:$0xff] }
  0x98   :  { %7078 = vst [vmem:[#allocation4_spill] sm:$0xff] %v4294_v54  ;;  %v1299_v59 = vsel %vm1007_vm1, %v4297_v55, inf  ;;  %v1203_v60 = vsel %vm1007_vm1, %v4294_v54, inf }
  0x99   :  { %7079 = vst [vmem:[#allocation5_spill] sm:$0xff] %v4297_v55  ;;  %1300 = vmin.xlane.f32.xlu1 %v1299_v59  ;;  %1204 = vmin.xlane.f32.xlu2 %v1203_v60  ;;  %v1014_v4 = vsel %vm1007_vm1, %v4310_v62, inf  ;;  %v1110_v14 = vsel %vm1007_vm1, %v4329_v9, inf  ;;  %v4058_v55 = vld [vmem:[%s6958_s0 + $0xe8] sm:$0xff] }
  0x9a   :  { %1012 = vmin.xlane.f32.xlu0 %v1011_v61  ;;  %3974 = vmatmul.msk.bf16.gmra.mxu0 %vm483_vm0, %v4038_v17 }
  0x9b   :  { %4022 = vmatmul.msk.bf16.gmra.mxu3 %vm483_vm0, %v4086_v20  ;;  %3990 = vmatmul.msk.bf16.gmra.mxu1 %vm483_vm0, %v4054_v26 }
  0x9c   :  { %4006 = vmatmul.msk.bf16.gmra.mxu2 %vm483_vm0, %v4070_v27 }
  0x9d   :  { %v930_v1 = vpop.f32.mrf.mxu3  ;;  %v850_v2 = vpop.f32.mrf.mxu2 }
  0x9e   :  { %v4320_v3 = vadd.f32 %v4260_v34, %v930_v1  ;;  %v692_v5 = vpop.f32.mrf.mxu0  ;;  %v772_v6 = vpop.f32.mrf.mxu1  ;;  %v4335_v11 = vadd.f32 %v4260_v34, %v850_v2 }
  0x9f   :  { %v4332_v10 = vadd.f32 %v4260_v34, %v772_v6  ;;  %v4354_v21 = vadd.f32 %v4260_v34, %v692_v5 }
  0xa0   :  { %7080 = vst [vmem:[#allocation6_spill] sm:$0xff] %v4320_v3  ;;  %v1302_v7 = vsel %vm1007_vm1, %v4320_v3, inf  ;;  %v1206_v15 = vsel %vm1007_vm1, %v4335_v11, inf }
  0xa1   :  { %1303 = vmin.xlane.f32.xlu2 %v1302_v7  ;;  %1015 = vmin.xlane.f32.xlu1 %v1014_v4  ;;  %7081 = vst [vmem:[#allocation7_spill] sm:$0xff] %v4335_v11  ;;  %v1113_v13 = vsel %vm1007_vm1, %v4332_v10, inf  ;;  %v1017_v25 = vsel %vm1007_vm1, %v4354_v21, inf  ;;  %v4039_v4 = vld [vmem:[%s6958_s0 + $0x50] sm:$0xff] }
  0xa2   :  { %1108 = vmin.xlane.f32.xlu0 %v1107_v8  ;;  %v4087_v8 = vld [vmem:[%s6958_s0 + $0x1d0] sm:$0xff] }
  0xa5   :  { %v852_v12 = vpop.f32.mrf.mxu2  ;;  %v932_v18 = vpop.f32.mrf.mxu3 }
  0xa6   :  { %v695_v16 = vpop.f32.mrf.mxu0  ;;  %v4358_v22 = vadd.f32 %v4260_v34, %v932_v18  ;;  %v775_v29 = vpop.f32.mrf.mxu1  ;;  %v4381_v32 = vadd.f32 %v4260_v34, %v852_v12  ;;  %v4055_v18 = vld [vmem:[%s6958_s0 + $0xd0] sm:$0xff] }
  0xa7   :  { %v4347_v19 = vadd.f32 %v4260_v34, %v695_v16  ;;  %v4377_v31 = vadd.f32 %v4260_v34, %v775_v29 }
  0xa8   :  { %7082 = vst [vmem:[#allocation8_spill] sm:$0xff] %v4358_v22  ;;  %v1305_v28 = vsel %vm1007_vm1, %v4358_v22, inf  ;;  %v1209_v40 = vsel %vm1007_vm1, %v4381_v32, inf }
  0xa9   :  { %1114 = vmin.xlane.f32.xlu2 %v1113_v13  ;;  %1111 = vmin.xlane.f32.xlu1 %v1110_v14  ;;  %v1020_v23 = vsel %vm1007_vm1, %v4347_v19, inf  ;;  %7084 = vst [vmem:[#allocation10_spill] sm:$0xff] %v4377_v31  ;;  %v1116_v36 = vsel %vm1007_vm1, %v4377_v31, inf }
  0xaa   :  { %1207 = vmin.xlane.f32.xlu0 %v1206_v15  ;;  %7085 = vst [vmem:[#allocation11_spill] sm:$0xff] %v4381_v32  ;;  %3975 = vmatmul.msk.bf16.gmra.mxu0 %vm483_vm0, %v4039_v4  ;;  %v4040_v4 = vld [vmem:[%s6958_s0 + $0x58] sm:$0xff] }
  0xab   :  { %4023 = vmatmul.msk.bf16.gmra.mxu3 %vm483_vm0, %v4087_v8  ;;  %3991 = vmatmul.msk.bf16.gmra.mxu1 %vm483_vm0, %v4055_v18 }
  0xac   :  { %4007 = vmatmul.msk.bf16.gmra.mxu2 %vm483_vm0, %v4071_v56 }
  0xad   :  { %v855_v24 = vpop.f32.mrf.mxu2  ;;  %v935_v33 = vpop.f32.mrf.mxu3 }
  0xae   :  { %v4373_v30 = vadd.f32 %v4260_v34, %v855_v24  ;;  %v697_v39 = vpop.f32.mrf.mxu0  ;;  %v4390_v42 = vadd.f32 %v4260_v34, %v935_v33  ;;  %v777_v48 = vpop.f32.mrf.mxu1 }
  0xaf   :  { %v4393_v45 = vadd.f32 %v4260_v34, %v697_v39  ;;  %v4411_v58 = vadd.f32 %v4260_v34, %v777_v48 }
  0xb0   :  { %7083 = vst [vmem:[#allocation9_spill] sm:$0xff] %v4373_v30  ;;  %v1212_v35 = vsel %vm1007_vm1, %v4373_v30, inf  ;;  %v1308_v47 = vsel %vm1007_vm1, %v4390_v42, inf }
  0xb1   :  { %1021 = vmin.xlane.f32.xlu2 %v1020_v23  ;;  %1018 = vmin.xlane.f32.xlu1 %v1017_v25  ;;  %7086 = vst [vmem:[#allocation12_spill] sm:$0xff] %v4390_v42  ;;  %v1023_v50 = vsel %vm1007_vm1, %v4393_v45, inf  ;;  %v1119_v2 = vsel %vm1007_vm1, %v4411_v58, inf }
  0xb2   :  { %1306 = vmin.xlane.f32.xlu0 %v1305_v28  ;;  %7088 = vst [vmem:[#allocation14_spill] sm:$0xff] %v4411_v58 }
  0xb5   :  { %v857_v41 = vpop.f32.mrf.mxu2  ;;  %v937_v49 = vpop.f32.mrf.mxu3 }
  0xb6   :  { %v4396_v46 = vadd.f32 %v4260_v34, %v857_v41  ;;  %v700_v53 = vpop.f32.mrf.mxu0  ;;  %v4414_v59 = vadd.f32 %v4260_v34, %v937_v49  ;;  %v780_v63 = vpop.f32.mrf.mxu1 }
  0xb7   :  { %v4408_v57 = vadd.f32 %v4260_v34, %v700_v53  ;;  %v4427_v5 = vadd.f32 %v4260_v34, %v780_v63 }
  0xb8   :  { %7087 = vst [vmem:[#allocation13_spill] sm:$0xff] %v4396_v46  ;;  %v1215_v52 = vsel %vm1007_vm1, %v4396_v46, inf  ;;  %v1311_v1 = vsel %vm1007_vm1, %v4414_v59, inf }
  0xb9   :  { %1213 = vmin.xlane.f32.xlu2 %v1212_v35  ;;  %1210 = vmin.xlane.f32.xlu1 %v1209_v40  ;;  %7089 = vst [vmem:[#allocation15_spill] sm:$0xff] %v4414_v59  ;;  %v1026_v61 = vsel %vm1007_vm1, %v4408_v57, inf  ;;  %v1122_v13 = vsel %vm1007_vm1, %v4427_v5, inf  ;;  %v4042_v59 = vld [vmem:[%s6958_s0 + $0x68] sm:$0xff] }
  0xba   :  { %1117 = vmin.xlane.f32.xlu0 %v1116_v36  ;;  %7090 = vst [vmem:[#allocation16_spill] sm:$0xff] %v4427_v5  ;;  %3976 = vmatmul.msk.bf16.gmra.mxu0 %vm483_vm0, %v4040_v4  ;;  %v4089_v4 = vld [vmem:[%s6958_s0 + $0x1e0] sm:$0xff] }
  0xbd   :  { %v860_v60 = vpop.f32.mrf.mxu2  ;;  %v940_v7 = vpop.f32.mrf.mxu3 }
  0xbe   :  { %v4430_v6 = vadd.f32 %v4260_v34, %v860_v60  ;;  %v4437_v12 = vadd.f32 %v4260_v34, %v940_v7  ;;  %v702_v16 = vpop.f32.mrf.mxu0  ;;  %v782_v20 = vpop.f32.mrf.mxu1 }
  0xbf   :  { %v4451_v23 = vadd.f32 %v4260_v34, %v702_v16  ;;  %v4457_v25 = vadd.f32 %v4260_v34, %v782_v20 }
  0xc0   :  { %7091 = vst [vmem:[#allocation17_spill] sm:$0xff] %v4430_v6  ;;  %v1218_v14 = vsel %vm1007_vm1, %v4430_v6, inf  ;;  %v1314_v15 = vsel %vm1007_vm1, %v4437_v12, inf }
  0xc1   :  { %1024 = vmin.xlane.f32.xlu2 %v1023_v50  ;;  %1309 = vmin.xlane.f32.xlu1 %v1308_v47  ;;  %7092 = vst [vmem:[#allocation18_spill] sm:$0xff] %v4437_v12  ;;  %v1029_v29 = vsel %vm1007_vm1, %v4451_v23, inf  ;;  %v1125_v33 = vsel %vm1007_vm1, %v4457_v25, inf }
  0xc2   :  { %1216 = vmin.xlane.f32.xlu0 %v1215_v52  ;;  %7094 = vst [vmem:[#allocation20_spill] sm:$0xff] %v4457_v25  ;;  %v4056_v52 = vld [vmem:[%s6958_s0 + $0xd8] sm:$0xff] }
  0xc3   :  { %3992 = vmatmul.msk.bf16.gmra.mxu1 %vm483_vm0, %v4056_v52 }
  0xc5   :  { %v862_v17 = vpop.f32.mrf.mxu2  ;;  %v942_v26 = vpop.f32.mrf.mxu3 }
  0xc6   :  { %v4454_v24 = vadd.f32 %v4260_v34, %v862_v17  ;;  %v705_v27 = vpop.f32.mrf.mxu0  ;;  %v4472_v40 = vadd.f32 %v4260_v34, %v942_v26  ;;  %v785_v41 = vpop.f32.mrf.mxu1 }
  0xc7   :  { %v4466_v35 = vadd.f32 %v4260_v34, %v705_v27  ;;  %v4484_v56 = vadd.f32 %v4260_v34, %v785_v41 }
  0xc8   :  { %7093 = vst [vmem:[#allocation19_spill] sm:$0xff] %v4454_v24  ;;  %v1221_v28 = vsel %vm1007_vm1, %v4454_v24, inf  ;;  %v1317_v50 = vsel %vm1007_vm1, %v4472_v40, inf }
  0xc9   :  { %1312 = vmin.xlane.f32.xlu2 %v1311_v1  ;;  %1120 = vmin.xlane.f32.xlu1 %v1119_v2  ;;  %7096 = vst [vmem:[#allocation22_spill] sm:$0xff] %v4472_v40  ;;  %v1032_v47 = vsel %vm1007_vm1, %v4466_v35, inf  ;;  %v1128_v2 = vsel %vm1007_vm1, %v4484_v56, inf }
  0xca   :  { %1027 = vmin.xlane.f32.xlu0 %v1026_v61  ;;  %7097 = vst [vmem:[#allocation23_spill] sm:$0xff] %v4484_v56  ;;  %v4072_v61 = vld [vmem:[%s6958_s0 + $0x158] sm:$0xff] }
  0xcb   :  { %4008 = vmatmul.msk.bf16.gmra.mxu2 %vm483_vm0, %v4072_v61  ;;  %v4041_v61 = vld [vmem:[%s6958_s0 + $0x60] sm:$0xff] }
  0xcc   :  { %3977 = vmatmul.msk.bf16.gmra.mxu0 %vm483_vm0, %v4041_v61 }
  0xcd   :  { %v865_v36 = vpop.f32.mrf.mxu2  ;;  %v945_v49 = vpop.f32.mrf.mxu3 }
  0xce   :  { %v4469_v39 = vadd.f32 %v4260_v34, %v865_v36  ;;  %v707_v53 = vpop.f32.mrf.mxu0  ;;  %v4487_v60 = vadd.f32 %v4260_v34, %v945_v49  ;;  %v787_v8 = vpop.f32.mrf.mxu1 }
  0xcf   :  { %v4495_v63 = vadd.f32 %v4260_v34, %v707_v53  ;;  %v4514_v17 = vadd.f32 %v4260_v34, %v787_v8 }
  0xd0   :  { %7095 = vst [vmem:[#allocation21_spill] sm:$0xff] %v4469_v39  ;;  %v1224_v48 = vsel %vm1007_vm1, %v4469_v39, inf  ;;  %v1320_v1 = vsel %vm1007_vm1, %v4487_v60, inf }
  0xd1   :  { %1123 = vmin.xlane.f32.xlu2 %v1122_v13  ;;  %1219 = vmin.xlane.f32.xlu1 %v1218_v14  ;;  %7098 = vst [vmem:[#allocation24_spill] sm:$0xff] %v4487_v60  ;;  %v1035_v13 = vsel %vm1007_vm1, %v4495_v63, inf  ;;  %v1131_v27 = vsel %vm1007_vm1, %v4514_v17, inf  ;;  %v4074_v60 = vld [vmem:[%s6958_s0 + $0x168] sm:$0xff] }
  0xd2   :  { %1315 = vmin.xlane.f32.xlu0 %v1314_v15  ;;  %v4088_v15 = vld [vmem:[%s6958_s0 + $0x1d8] sm:$0xff]  ;;  %7100 = vst [vmem:[#allocation26_spill] sm:$0xff] %v4514_v17 }
  0xd3   :  { %4024 = vmatmul.msk.bf16.gmra.mxu3 %vm483_vm0, %v4088_v15 }
  0xd5   :  { %v867_v7 = vpop.f32.mrf.mxu2  ;;  %v947_v14 = vpop.f32.mrf.mxu3 }
  0xd6   :  { %v4511_v16 = vadd.f32 %v4260_v34, %v867_v7  ;;  %v4518_v18 = vadd.f32 %v4260_v34, %v947_v14  ;;  %v710_v20 = vpop.f32.mrf.mxu0  ;;  %v790_v36 = vpop.f32.mrf.mxu1 }
  0xd8   :  { %7099 = vst [vmem:[#allocation25_spill] sm:$0xff] %v4511_v16 }
  0xd9   :  { %1222 = vmin.xlane.f32.xlu2 %v1221_v28  ;;  %1030 = vmin.xlane.f32.xlu1 %v1029_v29  ;;  %7101 = vst [vmem:[#allocation27_spill] sm:$0xff] %v4518_v18  ;;  %v1227_v28 = vsel %vm1007_vm1, %v4511_v16, inf  ;;  %v1323_v29 = vsel %vm1007_vm1, %v4518_v18, inf }
  0xda   :  { %1126 = vmin.xlane.f32.xlu0 %v1125_v33  ;;  %v4527_v33 = vadd.f32 %v4260_v34, %v710_v20 }
  0xdc   :  { %3978 = vmatmul.msk.bf16.gmra.mxu0 %vm483_vm0, %v4042_v59 }
  0xdd   :  { %v870_v26 = vpop.f32.mrf.mxu2 }
  0xde   :  { %v4530_v41 = vadd.f32 %v4260_v34, %v870_v26  ;;  %v712_v53 = vpop.f32.mrf.mxu0  ;;  %v792_v15 = vpop.f32.mrf.mxu1 }
  0xdf   :  { %v4552_v7 = vadd.f32 %v4260_v34, %v712_v53 }
  0xe0   :  { %7102 = vst [vmem:[#allocation28_spill] sm:$0xff] %v4530_v41  ;;  %v1230_v49 = vsel %vm1007_vm1, %v4530_v41, inf }
  0xe1   :  { %1033 = vmin.xlane.f32.xlu2 %v1032_v47  ;;  %1318 = vmin.xlane.f32.xlu1 %v1317_v50  ;;  %v4533_v47 = vadd.f32 %v4260_v34, %v790_v36  ;;  %v1038_v50 = vsel %vm1007_vm1, %v4527_v33, inf  ;;  %v1041_v26 = vsel %vm1007_vm1, %v4552_v7, inf }
  0xe2   :  { %1225 = vmin.xlane.f32.xlu0 %v1224_v48  ;;  %v950_v48 = vpop.f32.mrf.mxu3 }
  0xe3   :  { %7103 = vst [vmem:[#allocation29_spill] sm:$0xff] %v4533_v47  ;;  %v1134_v52 = vsel %vm1007_vm1, %v4533_v47, inf  ;;  %4025 = vmatmul.msk.bf16.gmra.mxu3 %vm483_vm0, %v4089_v4 }
  0xe6   :  { %v715_v36 = vpop.f32.mrf.mxu0 }
  0xe9   :  { %1321 = vmin.xlane.f32.xlu2 %v1320_v1  ;;  %1129 = vmin.xlane.f32.xlu1 %v1128_v2  ;;  %v872_v1 = vpop.f32.mrf.mxu2  ;;  %v4545_v2 = vadd.f32 %v4260_v34, %v950_v48  ;;  %v4574_v48 = vadd.f32 %v4260_v34, %v715_v36 }
  0xea   :  { %1036 = vmin.xlane.f32.xlu0 %v1035_v13  ;;  %v4556_v8 = vadd.f32 %v4260_v34, %v872_v1  ;;  %v952_v20 = vpop.f32.mrf.mxu3 }
  0xeb   :  { %7104 = vst [vmem:[#allocation30_spill] sm:$0xff] %v4545_v2  ;;  %v1326_v14 = vsel %vm1007_vm1, %v4545_v2, inf  ;;  %v1044_v4 = vsel %vm1007_vm1, %v4574_v48, inf }
  0xec   :  { %7105 = vst [vmem:[#allocation31_spill] sm:$0xff] %v4556_v8 }
  0xf1   :  { %1132 = vmin.xlane.f32.xlu2 %v1131_v27  ;;  %1228 = vmin.xlane.f32.xlu1 %v1227_v28  ;;  %v4057_v27 = vld [vmem:[%s6958_s0 + $0xe0] sm:$0xff]  ;;  %v875_v1 = vpop.f32.mrf.mxu2 }
  0xf2   :  { %1324 = vmin.xlane.f32.xlu0 %v1323_v29  ;;  %v4073_v28 = vld [vmem:[%s6958_s0 + $0x160] sm:$0xff]  ;;  %v1233_v29 = vsel %vm1007_vm1, %v4556_v8, inf  ;;  %3993 = vmatmul.msk.bf16.gmra.mxu1 %vm483_vm0, %v4057_v27  ;;  %v4599_v27 = vadd.f32 %v4260_v34, %v875_v1 }
  0xf3   :  { %4009 = vmatmul.msk.bf16.gmra.mxu2 %vm483_vm0, %v4073_v28  ;;  %v955_v28 = vpop.f32.mrf.mxu3 }
  0xf4   :  { %7111 = vst [vmem:[#allocation37_spill] sm:$0xff] %v4599_v27 }
  0xf9   :  { %1231 = vmin.xlane.f32.xlu2 %v1230_v49  ;;  %1039 = vmin.xlane.f32.xlu1 %v1038_v50  ;;  %v4578_v49 = vadd.f32 %v4260_v34, %v792_v15 }
  0xfa   :  { %1135 = vmin.xlane.f32.xlu0 %v1134_v52  ;;  %v4583_v52 = vadd.f32 %v4260_v34, %v952_v20 }
  0xfb   :  { %7106 = vst [vmem:[#allocation32_spill] sm:$0xff] %v4578_v49  ;;  %v1137_v15 = vsel %vm1007_vm1, %v4578_v49, inf }
  0xfc   :  { %7107 = vst [vmem:[#allocation33_spill] sm:$0xff] %v4583_v52 }
  0xfd   :  { %v4558_v13 = vpop.xlane.xlu0 %1009  ;;  %v4580_v50 = vpop.xlane.xlu2 %1105 }
  0xfe   :  { %vm1392_vm2 = vcmp.le.f32.partialorder %v4263_v37, %v4558_v13 }
 0x101   :  { %1042 = vmin.xlane.f32.xlu2 %v1041_v26  ;;  %1327 = vmin.xlane.f32.xlu1 %v1326_v14  ;;  %v795_v14 = vpop.f32.mrf.mxu1  ;;  %v1329_v26 = vsel %vm1007_vm1, %v4583_v52, inf }
 0x102   :  { %1234 = vmin.xlane.f32.xlu0 %v1233_v29  ;;  %v4596_v20 = vadd.f32 %v4260_v34, %v795_v14  ;;  %v4602_v29 = vadd.f32 %v4260_v34, %v955_v28  ;;  %v1236_v14 = vsel %vm1007_vm1, %v4599_v27, inf  ;;  %3994 = vmatmul.msk.bf16.gmra.mxu1 %vm483_vm0, %v4058_v55 }
 0x103   :  { %4010 = vmatmul.msk.bf16.gmra.mxu2 %vm483_vm0, %v4074_v60 }
 0x104   :  { %v4585_v53 = vpop.xlane.xlu1 %1201  ;;  %7110 = vst [vmem:[#allocation36_spill] sm:$0xff] %v4596_v20  ;;  %v1332_v1 = vsel %vm1007_vm1, %v4602_v29, inf }
 0x105   :  { %7108 = vst [vmem:[#allocation34_spill] sm:$0xff] %v4585_v53  ;;  %v4587_v61 = vpop.xlane.xlu0 %1297 }
 0x106   :  { %7109 = vst [vmem:[#allocation35_spill] sm:$0xff] %v4587_v61 }
 0x107   :  { %7112 = vst [vmem:[#allocation38_spill] sm:$0xff] %v4602_v29 }
 0x109   :  { %1330 = vmin.xlane.f32.xlu2 %v1329_v26  ;;  %1138 = vmin.xlane.f32.xlu1 %v1137_v15  ;;  %v1140_v26 = vsel %vm1007_vm1, %v4596_v20, inf  ;;  %v717_v15 = vpop.f32.mrf.mxu0  ;;  %v797_v28 = vpop.f32.mrf.mxu1 }
 0x10a   :  { %1045 = vmin.xlane.f32.xlu0 %v1044_v4  ;;  %v877_v4 = vpop.f32.mrf.mxu2  ;;  %v4620_v18 = vadd.f32 %v4260_v34, %v717_v15 }
 0x10b   :  { %v4623_v12 = vadd.f32 %v4260_v34, %v877_v4 }
 0x10c   :  { %v4604_v36 = vpop.xlane.xlu1 %1300  ;;  %v4606_v2 = vpop.xlane.xlu2 %1204  ;;  %v1047_v4 = vsel %vm1007_vm1, %v4620_v18, inf }
 0x10d   :  { %7113 = vst [vmem:[#allocation39_spill] sm:$0xff] %v4604_v36  ;;  %v4608_v52 = vpop.xlane.xlu0 %1012  ;;  %v1239_v15 = vsel %vm1007_vm1, %v4623_v12, inf }
 0x10e   :  { %7114 = vst [vmem:[#allocation40_spill] sm:$0xff] %v4606_v2  ;;  %vm1393_vm3 = vcmp.le.f32.partialorder %v4291_v51, %v4608_v52 }
 0x10f   :  { %7115 = vst [vmem:[#allocation41_spill] sm:$0xff] %v4623_v12 }
 0x111   :  { %1141 = vmin.xlane.f32.xlu2 %v1140_v26  ;;  %1237 = vmin.xlane.f32.xlu1 %v1236_v14  ;;  %v4631_v26 = vadd.f32 %v4260_v34, %v797_v28  ;;  %v720_v29 = vpop.f32.mrf.mxu0 }
 0x112   :  { %1333 = vmin.xlane.f32.xlu0 %v1332_v1  ;;  %v957_v1 = vpop.f32.mrf.mxu3  ;;  %v4645_v28 = vadd.f32 %v4260_v34, %v720_v29  ;;  %v880_v3 = vpop.f32.mrf.mxu2 }
 0x113   :  { %7117 = vst [vmem:[#allocation43_spill] sm:$0xff] %v4631_v26  ;;  %v1143_v60 = vsel %vm1007_vm1, %v4631_v26, inf  ;;  %v4652_v22 = vadd.f32 %v4260_v34, %v880_v3 }
 0x114   :  { %v4625_v40 = vpop.xlane.xlu2 %1303  ;;  %v4627_v42 = vpop.xlane.xlu1 %1015  ;;  %v1050_v59 = vsel %vm1007_vm1, %v4645_v28, inf }
 0x115   :  { %7116 = vst [vmem:[#allocation42_spill] sm:$0xff] %v4625_v40  ;;  %v4633_v14 = vpop.xlane.xlu0 %1108  ;;  %v4090_v40 = vld [vmem:[%s6958_s0 + $0x1e8] sm:$0xff]  ;;  %v1242_v61 = vsel %vm1007_vm1, %v4652_v22, inf  ;;  %vm1394_vm4 = vcmp.le.f32.partialorder %v4310_v62, %v4627_v42 }
 0x116   :  { %7118 = vst [vmem:[#allocation44_spill] sm:$0xff] %v4652_v22  ;;  %4026 = vmatmul.msk.bf16.gmra.mxu3 %vm483_vm0, %v4090_v40 }
 0x119   :  { %1240 = vmin.xlane.f32.xlu2 %v1239_v15  ;;  %1048 = vmin.xlane.f32.xlu1 %v1047_v4  ;;  %v4655_v15 = vadd.f32 %v4260_v34, %v957_v1  ;;  %v722_v40 = vpop.f32.mrf.mxu0 }
 0x11a   :  { %1144 = vmin.xlane.f32.xlu0 %v1143_v60  ;;  %v800_v60 = vpop.f32.mrf.mxu1  ;;  %v960_v3 = vpop.f32.mrf.mxu3  ;;  %v4685_v41 = vadd.f32 %v4260_v34, %v722_v40 }
 0x11b   :  { %7119 = vst [vmem:[#allocation45_spill] sm:$0xff] %v4655_v15  ;;  %v1335_v1 = vsel %vm1007_vm1, %v4655_v15, inf  ;;  %v4674_v36 = vadd.f32 %v4260_v34, %v800_v60  ;;  %v4677_v27 = vadd.f32 %v4260_v34, %v960_v3  ;;  %v1005_v15 = vlaneseq  ;;  %v882_v55 = vpop.f32.mrf.mxu2 }
 0x11c   :  { %v4657_v4 = vpop.xlane.xlu2 %1114  ;;  %v4659_v44 = vpop.xlane.xlu1 %1111  ;;  %v1053_v8 = vsel %vm1007_vm1, %v4685_v41, inf }
 0x11d   :  { %v4662_v29 = vpop.xlane.xlu0 %1207  ;;  %7121 = vst [vmem:[#allocation47_spill] sm:$0xff] %v4674_v36  ;;  %v1338_v60 = vsel %vm1007_vm1, %v4677_v27, inf  ;;  %v1146_v3 = vsel %vm1007_vm1, %v4674_v36, inf }
 0x11e   :  { %7120 = vst [vmem:[#allocation46_spill] sm:$0xff] %v4662_v29 }
 0x11f   :  { %7122 = vst [vmem:[#allocation48_spill] sm:$0xff] %v4677_v27 }
 0x121   :  { %1051 = vmin.xlane.f32.xlu2 %v1050_v59  ;;  %1336 = vmin.xlane.f32.xlu1 %v1335_v1  ;;  %v725_v37 = vpop.f32.mrf.mxu0 }
 0x122   :  { %1243 = vmin.xlane.f32.xlu0 %v1242_v61  ;;  %v802_v1 = vpop.f32.mrf.mxu1  ;;  %v4693_v61 = vand.u32 127, %v1005_v15  ;;  %v962_v40 = vpop.f32.mrf.mxu3  ;;  %v4730_v24 = vadd.f32 %v4260_v34, %v725_v37 }
 0x123   :  { %v4703_v27 = vadd.f32 %v4260_v34, %v802_v1 }
 0x124   :  { %v4680_v22 = vpop.xlane.xlu2 %1021  ;;  %v4682_v12 = vpop.xlane.xlu1 %1018  ;;  %v1521_v37 = vsel %vm1393_vm3, %v4693_v61, 64  ;;  %v1056_v62 = vsel %vm1007_vm1, %v4730_v24, inf }
 0x125   :  { %v4687_v59 = vpop.xlane.xlu0 %1306  ;;  %7125 = vst [vmem:[#allocation51_spill] sm:$0xff] %v4703_v27  ;;  %vm1395_vm5 = vcmp.le.f32.partialorder %v4354_v21, %v4682_v12  ;;  %vm1396_vm6 = vcmp.le.f32.partialorder %v4347_v19, %v4680_v22 }
 0x126   :  { %7123 = vst [vmem:[#allocation49_spill] sm:$0xff] %v4687_v59  ;;  %v4700_v59 = vadd.f32 %v4260_v34, %v882_v55  ;;  %v1523_v12 = vsel %vm1395_vm5, %v4693_v61, 64 }
 0x128   :  { %7124 = vst [vmem:[#allocation50_spill] sm:$0xff] %v4700_v59  ;;  %v1245_v13 = vsel %vm1007_vm1, %v4700_v59, inf }
 0x129   :  { %1339 = vmin.xlane.f32.xlu2 %v1338_v60  ;;  %1147 = vmin.xlane.f32.xlu1 %v1146_v3  ;;  %v1520_v60 = vsel %vm1392_vm2, %v4693_v61, 64  ;;  %v4711_v3 = vadd.f32 %v4260_v34, %v962_v40  ;;  %v4059_v40 = vld [vmem:[%s6958_s0 + $0xf0] sm:$0xff] }
 0x12a   :  { %1054 = vmin.xlane.f32.xlu0 %v1053_v8  ;;  %v1149_v8 = vsel %vm1007_vm1, %v4703_v27, inf  ;;  %v4720_v1 = vsel %vm1007_vm1, %v1520_v60, 2147483647  ;;  %v805_v6 = vpop.f32.mrf.mxu1  ;;  %v4075_v60 = vld [vmem:[%s6958_s0 + $0x170] sm:$0xff]  ;;  %3995 = vmatmul.msk.bf16.gmra.mxu1 %vm483_vm0, %v4059_v40 }
 0x12b   :  { %7128 = vst [vmem:[#allocation54_spill] sm:$0xff] %v4711_v3  ;;  %v1341_v55 = vsel %vm1007_vm1, %v4711_v3, inf  ;;  %4011 = vmatmul.msk.bf16.gmra.mxu2 %vm483_vm0, %v4075_v60  ;;  %v1522_v3 = vsel %vm1394_vm4, %v4693_v61, 64  ;;  %v4043_v40 = vld [vmem:[%s6958_s0 + $0x70] sm:$0xff]  ;;  %v4761_v60 = vsel %vm1007_vm1, %v1521_v37, 2147483647 }
 0x12c   :  { %v4705_v39 = vpop.xlane.xlu2 %1213  ;;  %v4707_v15 = vpop.xlane.xlu1 %1210  ;;  %v4765_v59 = vsel %vm1007_vm1, %v1522_v3, 2147483647  ;;  %3979 = vmatmul.msk.bf16.gmra.mxu0 %vm483_vm0, %v4043_v40  ;;  %v1665_v30 = vshra.s32 %v4761_v60, 16  ;;  %v4091_v40 = vld [vmem:[%s6958_s0 + $0x1f0] sm:$0xff] }
 0x12d   :  { %7126 = vst [vmem:[#allocation52_spill] sm:$0xff] %v4705_v39  ;;  %v4713_v16 = vpop.xlane.xlu0 %1117  ;;  %v1680_v37 = vshra.s32 %v4765_v59, 16  ;;  %4027 = vmatmul.msk.bf16.gmra.mxu3 %vm483_vm0, %v4091_v40 }
 0x12e   :  { %7127 = vst [vmem:[#allocation53_spill] sm:$0xff] %v4707_v15  ;;  %v4781_v11 = vcvt.s32.f32 %v1665_v30 }
 0x12f   :  { %7129 = vst [vmem:[#allocation55_spill] sm:$0xff] %v4713_v16 }
 0x131   :  { %1150 = vmin.xlane.f32.xlu2 %v1149_v8  ;;  %1246 = vmin.xlane.f32.xlu1 %v1245_v13  ;;  %v4738_v8 = vadd.f32 %v4260_v34, %v805_v6  ;;  %v1650_v13 = vshra.s32 %v4720_v1, 16 }
 0x132   :  { %1342 = vmin.xlane.f32.xlu0 %v1341_v55  ;;  %v807_v15 = vpop.f32.mrf.mxu1 }
 0x133   :  { %7130 = vst [vmem:[#allocation56_spill] sm:$0xff] %v4738_v8  ;;  %v4753_v42 = vcvt.s32.f32 %v1650_v13  ;;  %v1152_v6 = vsel %vm1007_vm1, %v4738_v8, inf }
 0x134   :  { %v4742_v51 = vpop.xlane.xlu2 %1024  ;;  %v4744_v52 = vpop.xlane.xlu1 %1309 }
 0x135   :  { %7131 = vst [vmem:[#allocation57_spill] sm:$0xff] %v4744_v52  ;;  %v4748_v55 = vpop.xlane.xlu0 %1216  ;;  %v885_v52 = vpop.f32.mrf.mxu2  ;;  %vm1397_vm7 = vcmp.le.f32.partialorder %v4393_v45, %v4742_v51 }
 0x136   :  { %7132 = vst [vmem:[#allocation58_spill] sm:$0xff] %v4748_v55  ;;  %v4768_v13 = vadd.f32 %v4260_v34, %v885_v52  ;;  %v965_v55 = vpop.f32.mrf.mxu3  ;;  %v727_v52 = vpop.f32.mrf.mxu0 }
 0x137   :  { %v4790_v29 = vadd.f32 %v4260_v34, %v965_v55  ;;  %v4795_v30 = vadd.f32 %v4260_v34, %v727_v52 }
 0x138   :  { %7133 = vst [vmem:[#allocation59_spill] sm:$0xff] %v4768_v13  ;;  %v1248_v3 = vsel %vm1007_vm1, %v4768_v13, inf }
 0x139   :  { %1057 = vmin.xlane.f32.xlu1 %v1056_v62  ;;  %1653 = vmin.xlane.f32.xlu2 %v4753_v42  ;;  %7136 = vst [vmem:[#allocation62_spill] sm:$0xff] %v4790_v29  ;;  %v1344_v55 = vsel %vm1007_vm1, %v4790_v29, inf  ;;  %v1059_v40 = vsel %vm1007_vm1, %v4795_v30, inf  ;;  %v4820_v29 = vadd.f32 %v4260_v34, %v807_v15 }
 0x13a   :  { %1153 = vmin.xlane.f32.xlu0 %v1152_v6  ;;  %v4783_v6 = vcvt.s32.f32 %v1680_v37 }
 0x13b   :  { %7141 = vst [vmem:[#allocation67_spill] sm:$0xff] %v4820_v29  ;;  %v1155_v15 = vsel %vm1007_vm1, %v4820_v29, inf }
 0x13c   :  { %v4772_v39 = vpop.xlane.xlu2 %1312  ;;  %v4774_v46 = vpop.xlane.xlu1 %1120 }
 0x13d   :  { %7134 = vst [vmem:[#allocation60_spill] sm:$0xff] %v4772_v39  ;;  %v4777_v62 = vpop.xlane.xlu0 %1027  ;;  %v887_v39 = vpop.f32.mrf.mxu2 }
 0x13e   :  { %7135 = vst [vmem:[#allocation61_spill] sm:$0xff] %v4774_v46  ;;  %v4802_v13 = vadd.f32 %v4260_v34, %v887_v39  ;;  %v967_v43 = vpop.f32.mrf.mxu3  ;;  %v4044_v39 = vld [vmem:[%s6958_s0 + $0x78] sm:$0xff]  ;;  %vm1398_vm8 = vcmp.le.f32.partialorder %v4408_v57, %v4777_v62 }
 0x13f   :  { %3980 = vmatmul.msk.bf16.gmra.mxu0 %vm483_vm0, %v4044_v39 }
 0x140   :  { %7139 = vst [vmem:[#allocation65_spill] sm:$0xff] %v4802_v13  ;;  %v1251_v52 = vsel %vm1007_vm1, %v4802_v13, inf }
 0x141   :  { %1249 = vmin.xlane.f32.xlu2 %v1248_v3  ;;  %1668 = vmin.xlane.f32.xlu1 %v4781_v11 }
 0x142   :  { %1683 = vmin.xlane.f32.xlu0 %v4783_v6 }
 0x144   :  { %v4797_v37 = vpop.xlane.xlu2 %1123  ;;  %v4799_v3 = vpop.xlane.xlu1 %1219 }
 0x145   :  { %7137 = vst [vmem:[#allocation63_spill] sm:$0xff] %v4797_v37  ;;  %v4804_v32 = vpop.xlane.xlu0 %1315  ;;  %v890_v54 = vpop.f32.mrf.mxu2 }
 0x146   :  { %7138 = vst [vmem:[#allocation64_spill] sm:$0xff] %v4799_v3  ;;  %v730_v3 = vpop.f32.mrf.mxu0  ;;  %v970_v2 = vpop.f32.mrf.mxu3  ;;  %v4846_v8 = vadd.f32 %v4260_v34, %v890_v54 }
 0x147   :  { %7140 = vst [vmem:[#allocation66_spill] sm:$0xff] %v4804_v32  ;;  %v4816_v32 = vadd.f32 %v4260_v34, %v730_v3  ;;  %v810_v3 = vpop.f32.mrf.mxu1 }
 0x148   :  { %7146 = vst [vmem:[#allocation72_spill] sm:$0xff] %v4846_v8 }
 0x149   :  { %1060 = vmin.xlane.f32.xlu2 %v1059_v40  ;;  %1345 = vmin.xlane.f32.xlu1 %v1344_v55  ;;  %v4823_v40 = vadd.f32 %v4260_v34, %v967_v43  ;;  %v4076_v43 = vld [vmem:[%s6958_s0 + $0x178] sm:$0xff] }
 0x14a   :  { %1252 = vmin.xlane.f32.xlu0 %v1251_v52  ;;  %v1062_v52 = vsel %vm1007_vm1, %v4816_v32, inf  ;;  %4012 = vmatmul.msk.bf16.gmra.mxu2 %vm483_vm0, %v4076_v43  ;;  %v4060_v43 = vld [vmem:[%s6958_s0 + $0xf8] sm:$0xff] }
 0x14b   :  { %7142 = vst [vmem:[#allocation68_spill] sm:$0xff] %v4823_v40  ;;  %v1347_v39 = vsel %vm1007_vm1, %v4823_v40, inf  ;;  %3996 = vmatmul.msk.bf16.gmra.mxu1 %vm483_vm0, %v4060_v43 }
 0x14c   :  { %v4825_v55 = vpop.xlane.xlu2 %1222  ;;  %v4827_v13 = vpop.xlane.xlu1 %1030 }
 0x14d   :  { %7143 = vst [vmem:[#allocation69_spill] sm:$0xff] %v4825_v55  ;;  %v4829_v53 = vpop.xlane.xlu0 %1126  ;;  %v4843_v55 = vadd.f32 %v4260_v34, %v810_v3  ;;  %v1254_v3 = vsel %vm1007_vm1, %v4846_v8, inf  ;;  %v892_v45 = vpop.f32.mrf.mxu2  ;;  %vm1399_vm9 = vcmp.le.f32.partialorder %v4451_v23, %v4827_v13 }
 0x14e   :  { %7144 = vst [vmem:[#allocation70_spill] sm:$0xff] %v4829_v53 }
 0x14f   :  { %7145 = vst [vmem:[#allocation71_spill] sm:$0xff] %v4843_v55  ;;  %v1158_v54 = vsel %vm1007_vm1, %v4843_v55, inf }
 0x151   :  { %1348 = vmin.xlane.f32.xlu2 %v1347_v39  ;;  %1156 = vmin.xlane.f32.xlu1 %v1155_v15  ;;  %v4092_v39 = vld [vmem:[%s6958_s0 + $0x1f8] sm:$0xff]  ;;  %v4852_v15 = vadd.f32 %v4260_v34, %v970_v2 }
 0x152   :  { %1063 = vmin.xlane.f32.xlu0 %v1062_v52  ;;  %4028 = vmatmul.msk.bf16.gmra.mxu3 %vm483_vm0, %v4092_v39  ;;  %v732_v39 = vpop.f32.mrf.mxu0 }
 0x153   :  { %7147 = vst [vmem:[#allocation73_spill] sm:$0xff] %v4852_v15  ;;  %v1350_v2 = vsel %vm1007_vm1, %v4852_v15, inf  ;;  %v4882_v8 = vadd.f32 %v4260_v34, %v732_v39 }
 0x154   :  { %v4855_v40 = vpop.xlane.xlu2 %1033  ;;  %v4857_v21 = vpop.xlane.xlu1 %1318 }
 0x155   :  { %7148 = vst [vmem:[#allocation74_spill] sm:$0xff] %v4857_v21  ;;  %v4861_v52 = vpop.xlane.xlu0 %1225  ;;  %v4873_v21 = vsel %vm1007_vm1, %v1523_v12, 2147483647  ;;  %v1065_v51 = vsel %vm1007_vm1, %v4882_v8, inf  ;;  %vm1400_vm10 = vcmp.le.f32.partialorder %v4466_v35, %v4855_v40 }
 0x156   :  { %7149 = vst [vmem:[#allocation75_spill] sm:$0xff] %v4861_v52  ;;  %v812_v52 = vpop.f32.mrf.mxu1  ;;  %v1695_v15 = vshra.s32 %v4873_v21, 16  ;;  %v1528_v35 = vsel %vm1400_vm10, %v4693_v61, 64 }
 0x157   :  { %v4890_v19 = vadd.f32 %v4260_v34, %v812_v52 }
 0x159   :  { %1159 = vmin.xlane.f32.xlu2 %v1158_v54  ;;  %1255 = vmin.xlane.f32.xlu1 %v1254_v3  ;;  %v1524_v54 = vsel %vm1396_vm6, %v4693_v61, 64  ;;  %7152 = vst [vmem:[#allocation78_spill] sm:$0xff] %v4890_v19  ;;  %v1525_v3 = vsel %vm1397_vm7, %v4693_v61, 64  ;;  %v1161_v52 = vsel %vm1007_vm1, %v4890_v19, inf  ;;  %v972_v19 = vpop.f32.mrf.mxu3  ;;  %vm1425_vm7 = vcmp.le.f32.partialorder %v4317_v0, %v4633_v14 }
 0x15a   :  { %1351 = vmin.xlane.f32.xlu0 %v1350_v2  ;;  %v4895_v2 = vcvt.s32.f32 %v1695_v15  ;;  %v4900_v43 = vsel %vm1007_vm1, %v1524_v54, 2147483647  ;;  %v4906_v39 = vsel %vm1007_vm1, %v1525_v3, 2147483647  ;;  %v735_v20 = vpop.f32.mrf.mxu0 }
 0x15b   :  { %v1710_v15 = vshra.s32 %v4900_v43, 16  ;;  %v1725_v54 = vshra.s32 %v4906_v39, 16 }
 0x15c   :  { %v4884_v12 = vpop.xlane.xlu2 %1321  ;;  %v4886_v55 = vpop.xlane.xlu1 %1129 }
 0x15d   :  { %7150 = vst [vmem:[#allocation76_spill] sm:$0xff] %v4884_v12  ;;  %v4892_v22 = vpop.xlane.xlu0 %1036  ;;  %v4910_v12 = vadd.f32 %v4260_v34, %v892_v45  ;;  %v4927_v45 = vadd.f32 %v4260_v34, %v735_v20 }
 0x15e   :  { %7151 = vst [vmem:[#allocation77_spill] sm:$0xff] %v4886_v55  ;;  %vm1401_vm11 = vcmp.le.f32.partialorder %v4495_v63, %v4892_v22 }
 0x15f   :  { %7153 = vst [vmem:[#allocation79_spill] sm:$0xff] %v4910_v12  ;;  %v1257_v3 = vsel %vm1007_vm1, %v4910_v12, inf  ;;  %v1068_v20 = vsel %vm1007_vm1, %v4927_v45, inf }
 0x161   :  { %1698 = vmin.xlane.f32.xlu2 %v4895_v2  ;;  %1066 = vmin.xlane.f32.xlu1 %v1065_v51  ;;  %v4919_v51 = vcvt.s32.f32 %v1710_v15  ;;  %v4934_v15 = vadd.f32 %v4260_v34, %v972_v19  ;;  %v975_v49 = vpop.f32.mrf.mxu3 }
 0x162   :  { %1162 = vmin.xlane.f32.xlu0 %v1161_v52  ;;  %v4923_v52 = vcvt.s32.f32 %v1725_v54  ;;  %v737_v19 = vpop.f32.mrf.mxu0  ;;  %v4952_v56 = vadd.f32 %v4260_v34, %v975_v49 }
 0x163   :  { %7158 = vst [vmem:[#allocation84_spill] sm:$0xff] %v4934_v15 }
 0x164   :  { %v4912_v29 = vpop.xlane.xlu2 %1132  ;;  %v4914_v36 = vpop.xlane.xlu1 %1228  ;;  %7162 = vst [vmem:[#allocation88_spill] sm:$0xff] %v4952_v56 }
 0x165   :  { %7154 = vst [vmem:[#allocation80_spill] sm:$0xff] %v4912_v29  ;;  %v4917_v27 = vpop.xlane.xlu0 %1324 }
 0x166   :  { %7155 = vst [vmem:[#allocation81_spill] sm:$0xff] %v4914_v36  ;;  %v895_v36 = vpop.f32.mrf.mxu2 }
 0x167   :  { %7156 = vst [vmem:[#allocation82_spill] sm:$0xff] %v4917_v27  ;;  %v4931_v27 = vadd.f32 %v4260_v34, %v895_v36  ;;  %v1353_v36 = vsel %vm1007_vm1, %v4934_v15, inf }
 0x169   :  { %1258 = vmin.xlane.f32.xlu2 %v1257_v3  ;;  %1713 = vmin.xlane.f32.xlu1 %v4919_v51  ;;  %7157 = vst [vmem:[#allocation83_spill] sm:$0xff] %v4931_v27  ;;  %v815_v3 = vpop.f32.mrf.mxu1  ;;  %v1260_v47 = vsel %vm1007_vm1, %v4931_v27, inf  ;;  %v4959_v27 = vadd.f32 %v4260_v34, %v737_v19  ;;  %v977_v49 = vpop.f32.mrf.mxu3 }
 0x16a   :  { %1728 = vmin.xlane.f32.xlu0 %v4923_v52  ;;  %v740_v57 = vpop.f32.mrf.mxu0 }
 0x16b   :  { %7164 = vst [vmem:[#allocation90_spill] sm:$0xff] %v4959_v27 }
 0x16c   :  { %v4936_v26 = vpop.xlane.xlu2 %1231  ;;  %v4938_v12 = vpop.xlane.xlu1 %1039 }
 0x16d   :  { %7159 = vst [vmem:[#allocation85_spill] sm:$0xff] %v4936_v26  ;;  %v4940_v54 = vpop.xlane.xlu0 %1135  ;;  %v4949_v26 = vadd.f32 %v4260_v34, %v815_v3  ;;  %vm1402_vm12 = vcmp.le.f32.partialorder %v4527_v33, %v4938_v12 }
 0x16e   :  { %7160 = vst [vmem:[#allocation86_spill] sm:$0xff] %v4940_v54  ;;  %v897_v15 = vpop.f32.mrf.mxu2 }
 0x16f   :  { %7161 = vst [vmem:[#allocation87_spill] sm:$0xff] %v4949_v26  ;;  %v1164_v3 = vsel %vm1007_vm1, %v4949_v26, inf  ;;  %v4972_v19 = vadd.f32 %v4260_v34, %v897_v15 }
 0x171   :  { %1069 = vmin.xlane.f32.xlu2 %v1068_v20  ;;  %1354 = vmin.xlane.f32.xlu1 %v1353_v36  ;;  %v1356_v20 = vsel %vm1007_vm1, %v4952_v56, inf  ;;  %v817_v36 = vpop.f32.mrf.mxu1  ;;  %7166 = vst [vmem:[#allocation92_spill] sm:$0xff] %v4972_v19  ;;  %v1263_v15 = vsel %vm1007_vm1, %v4972_v19, inf }
 0x172   :  { %1261 = vmin.xlane.f32.xlu0 %v1260_v47  ;;  %v1071_v47 = vsel %vm1007_vm1, %v4959_v27, inf  ;;  %v4975_v56 = vadd.f32 %v4260_v34, %v817_v36  ;;  %v742_v29 = vpop.f32.mrf.mxu0 }
 0x174   :  { %v4954_v54 = vpop.xlane.xlu2 %1042  ;;  %v4956_v55 = vpop.xlane.xlu1 %1327  ;;  %7167 = vst [vmem:[#allocation93_spill] sm:$0xff] %v4975_v56  ;;  %v1167_v62 = vsel %vm1007_vm1, %v4975_v56, inf }
 0x175   :  { %7163 = vst [vmem:[#allocation89_spill] sm:$0xff] %v4956_v55  ;;  %v4961_v17 = vpop.xlane.xlu0 %1234  ;;  %vm1403_vm13 = vcmp.le.f32.partialorder %v4552_v7, %v4954_v54 }
 0x176   :  { %7165 = vst [vmem:[#allocation91_spill] sm:$0xff] %v4961_v17  ;;  %v1531_v12 = vsel %vm1403_vm13, %v4693_v61, 64 }
 0x179   :  { %1357 = vmin.xlane.f32.xlu2 %v1356_v20  ;;  %1165 = vmin.xlane.f32.xlu1 %v1164_v3  ;;  %v1526_v20 = vsel %vm1398_vm8, %v4693_v61, 64  ;;  %v4983_v3 = vadd.f32 %v4260_v34, %v977_v49  ;;  %v820_v49 = vpop.f32.mrf.mxu1 }
 0x17a   :  { %1072 = vmin.xlane.f32.xlu0 %v1071_v47  ;;  %v4992_v36 = vsel %vm1007_vm1, %v1526_v20, 2147483647  ;;  %v5006_v20 = vld [vmem:[%s6959_s2] ss:$0 sm:$0xff]  ;;  %v745_v53 = vpop.f32.mrf.mxu0 }
 0x17b   :  { %7170 = vst [vmem:[#allocation96_spill] sm:$0xff] %v4983_v3  ;;  %v1359_v47 = vsel %vm1007_vm1, %v4983_v3, inf }
 0x17c   :  { %v4977_v55 = vpop.xlane.xlu2 %1330  ;;  %v4979_v17 = vpop.xlane.xlu1 %1138 }
 0x17d   :  { %7168 = vst [vmem:[#allocation94_spill] sm:$0xff] %v4977_v55  ;;  %v4985_v26 = vpop.xlane.xlu0 %1045  ;;  %v4999_v55 = vadd.f32 %v4260_v34, %v740_v57  ;;  %v1527_v34 = vsel %vm1399_vm9, %v4693_v61, 64  ;;  %vm1424_vm9 = vcmp.le.f32.partialorder %v4266_v38, %v4580_v50 }
 0x17e   :  { %7169 = vst [vmem:[#allocation95_spill] sm:$0xff] %v4979_v17  ;;  %v5027_v19 = vsel %vm1007_vm1, %v1527_v34, 2147483647  ;;  %vm1404_vm14 = vcmp.le.f32.partialorder %v4574_v48, %v4985_v26 }
 0x17f   :  { %v1074_v40 = vsel %vm1007_vm1, %v4999_v55, inf  ;;  %7175 = vst [vmem:[#allocation101_spill] sm:$0xff] %v5027_v19 }
 0x181   :  { %1168 = vmin.xlane.f32.xlu2 %v1167_v62  ;;  %1264 = vmin.xlane.f32.xlu1 %v1263_v15  ;;  %v5009_v62 = vadd.f32 %v5006_v20, %v820_v49  ;;  %v1740_v15 = vshra.s32 %v4992_v36, 16  ;;  %v900_v49 = vpop.f32.mrf.mxu2  ;;  %v822_v37 = vpop.f32.mrf.mxu1 }
 0x182   :  { %1360 = vmin.xlane.f32.xlu0 %v1359_v47 }
 0x183   :  { %7171 = vst [vmem:[#allocation97_spill] sm:$0xff] %v5009_v62  ;;  %v5022_v57 = vcvt.s32.f32 %v1740_v15  ;;  %v1170_v47 = vsel %vm1007_vm1, %v5009_v62, inf  ;;  %v1755_v15 = vshra.s32 %v5027_v19, 16 }
 0x184   :  { %v5012_v3 = vpop.xlane.xlu2 %1141  ;;  %v5014_v23 = vpop.xlane.xlu1 %1237 }
 0x185   :  { %7172 = vst [vmem:[#allocation98_spill] sm:$0xff] %v5012_v3  ;;  %v5017_v13 = vpop.xlane.xlu0 %1333 }
 0x186   :  { %7173 = vst [vmem:[#allocation99_spill] sm:$0xff] %v5014_v23  ;;  %v5031_v23 = vsel %vm1007_vm1, %v1528_v35, 2147483647  ;;  %v5046_v35 = vcvt.s32.f32 %v1755_v15 }
 0x187   :  { %7174 = vst [vmem:[#allocation100_spill] sm:$0xff] %v5017_v13  ;;  %v5034_v13 = vadd.f32 %v5006_v20, %v900_v49  ;;  %v1770_v62 = vshra.s32 %v5031_v23, 16 }
 0x188   :  { %7179 = vst [vmem:[#allocation105_spill] sm:$0xff] %v5046_v35 }
 0x189   :  { %1075 = vmin.xlane.f32.xlu1 %v1074_v40  ;;  %1743 = vmin.xlane.f32.xlu2 %v5022_v57  ;;  %7176 = vst [vmem:[#allocation102_spill] sm:$0xff] %v5034_v13  ;;  %v980_v40 = vpop.f32.mrf.mxu3  ;;  %v1266_v17 = vsel %vm1007_vm1, %v5034_v13, inf  ;;  %v5048_v49 = vcvt.s32.f32 %v1770_v62 }
 0x18a   :  { %1171 = vmin.xlane.f32.xlu0 %v1170_v47  ;;  %v902_v47 = vpop.f32.mrf.mxu2 }
 0x18b   :  { %v5063_v15 = vadd.f32 %v5006_v20, %v902_v47  ;;  %v5074_v47 = vadd.f32 %v5006_v20, %v745_v53 }
 0x18c   :  { %v5037_v56 = vpop.xlane.xlu2 %1240  ;;  %v5039_v3 = vpop.xlane.xlu1 %1048 }
 0x18d   :  { %7177 = vst [vmem:[#allocation103_spill] sm:$0xff] %v5037_v56  ;;  %v5042_v34 = vpop.xlane.xlu0 %1144  ;;  %v5052_v56 = vadd.f32 %v5006_v20, %v980_v40  ;;  %vm1405_vm15 = vcmp.le.f32.partialorder %v4620_v18, %v5039_v3 }
 0x18e   :  { %7178 = vst [vmem:[#allocation104_spill] sm:$0xff] %v5042_v34  ;;  %v5056_v34 = vadd.f32 %v5006_v20, %v742_v29  ;;  %v1269_v29 = vsel %vm1007_vm1, %v5063_v15, inf }
 0x18f   :  { %7180 = vst [vmem:[#allocation106_spill] sm:$0xff] %v5052_v56 }
 0x190   :  { %7182 = vst [vmem:[#allocation108_spill] sm:$0xff] %v5063_v15  ;;  %v1077_v25 = vsel %vm1007_vm1, %v5056_v34, inf }
 0x191   :  { %1758 = vmin.xlane.f32.xlu1 %v5046_v35  ;;  %1267 = vmin.xlane.f32.xlu2 %v1266_v17  ;;  %v1362_v17 = vsel %vm1007_vm1, %v5052_v56, inf  ;;  %v982_v40 = vpop.f32.mrf.mxu3  ;;  %7184 = vst [vmem:[#allocation110_spill] sm:$0xff] %v5074_v47 }
 0x192   :  { %1773 = vmin.xlane.f32.xlu0 %v5048_v49  ;;  %v5080_v56 = vadd.f32 %v5006_v20, %v982_v40  ;;  %v905_v15 = vpop.f32.mrf.mxu2 }
 0x194   :  { %v5058_v5 = vpop.xlane.xlu2 %1051  ;;  %v5060_v13 = vpop.xlane.xlu1 %1336  ;;  %7186 = vst [vmem:[#allocation112_spill] sm:$0xff] %v5080_v56 }
 0x195   :  { %7181 = vst [vmem:[#allocation107_spill] sm:$0xff] %v5060_v13  ;;  %v5065_v62 = vpop.xlane.xlu0 %1243  ;;  %v5077_v13 = vadd.f32 %v5006_v20, %v822_v37  ;;  %v1365_v37 = vsel %vm1007_vm1, %v5080_v56, inf  ;;  %vm1406_vm0 = vcmp.le.f32.partialorder %v4645_v28, %v5058_v5 }
 0x196   :  { %7183 = vst [vmem:[#allocation109_spill] sm:$0xff] %v5065_v62  ;;  %v1534_v3 = vsel %vm1406_vm0, %v4693_v61, 64 }
 0x197   :  { %7185 = vst [vmem:[#allocation111_spill] sm:$0xff] %v5077_v13  ;;  %v1173_v53 = vsel %vm1007_vm1, %v5077_v13, inf }
 0x199   :  { %1363 = vmin.xlane.f32.xlu1 %v1362_v17  ;;  %1078 = vmin.xlane.f32.xlu2 %v1077_v25  ;;  %v1080_v25 = vsel %vm1007_vm1, %v5074_v47, inf }
 0x19a   :  { %1270 = vmin.xlane.f32.xlu0 %v1269_v29  ;;  %v825_v29 = vpop.f32.mrf.mxu1  ;;  %v907_v7 = vpop.f32.mrf.mxu2 }
 0x19b   :  { %v5097_v40 = vadd.f32 %v5006_v20, %v825_v29 }
 0x19c   :  { %v5082_v62 = vpop.xlane.xlu2 %1339  ;;  %v5084_v35 = vpop.xlane.xlu1 %1147 }
 0x19d   :  { %7187 = vst [vmem:[#allocation113_spill] sm:$0xff] %v5082_v62  ;;  %v5086_v17 = vpop.xlane.xlu0 %1054  ;;  %v985_v62 = vpop.f32.mrf.mxu3  ;;  %v1176_v22 = vsel %vm1007_vm1, %v5097_v40, inf }
 0x19e   :  { %7188 = vst [vmem:[#allocation114_spill] sm:$0xff] %v5084_v35  ;;  %v5100_v35 = vadd.f32 %v5006_v20, %v905_v15  ;;  %v5103_v47 = vadd.f32 %v5006_v20, %v985_v62  ;;  %vm1407_vm2 = vcmp.le.f32.partialorder %v4685_v41, %v5086_v17 }
 0x19f   :  { %7189 = vst [vmem:[#allocation115_spill] sm:$0xff] %v5097_v40 }
 0x1a0   :  { %7190 = vst [vmem:[#allocation116_spill] sm:$0xff] %v5100_v35  ;;  %v1272_v63 = vsel %vm1007_vm1, %v5100_v35, inf  ;;  %v1368_v15 = vsel %vm1007_vm1, %v5103_v47, inf  ;;  %v5151_v35 = vsel %vm1007_vm1, %v1531_v12, 2147483647 }
 0x1a1   :  { %1174 = vmin.xlane.f32.xlu1 %v1173_v53  ;;  %1366 = vmin.xlane.f32.xlu2 %v1365_v37  ;;  %7191 = vst [vmem:[#allocation117_spill] sm:$0xff] %v5103_v47  ;;  %v1529_v53 = vsel %vm1401_vm11, %v4693_v61, 64 }
 0x1a2   :  { %1081 = vmin.xlane.f32.xlu0 %v1080_v25  ;;  %v5119_v62 = vsel %vm1007_vm1, %v1529_v53, 2147483647  ;;  %v747_v25 = vpop.f32.mrf.mxu0  ;;  %v827_v29 = vpop.f32.mrf.mxu1  ;;  %7199 = vst [vmem:[#allocation125_spill] sm:$0xff] %v5151_v35 }
 0x1a3   :  { %v1785_v56 = vshra.s32 %v5119_v62, 16 }
 0x1a4   :  { %v5105_v13 = vpop.xlane.xlu2 %1150  ;;  %v5107_v19 = vpop.xlane.xlu1 %1246 }
 0x1a5   :  { %7192 = vst [vmem:[#allocation118_spill] sm:$0xff] %v5105_v13  ;;  %v5110_v37 = vpop.xlane.xlu0 %1342 }
 0x1a6   :  { %7193 = vst [vmem:[#allocation119_spill] sm:$0xff] %v5107_v19  ;;  %v5155_v19 = vadd.f32 %v5006_v20, %v907_v7 }
 0x1a7   :  { %7194 = vst [vmem:[#allocation120_spill] sm:$0xff] %v5110_v37  ;;  %v5127_v37 = vadd.f32 %v5006_v20, %v747_v25 }
 0x1a8   :  { %7200 = vst [vmem:[#allocation126_spill] sm:$0xff] %v5155_v19  ;;  %v1275_v12 = vsel %vm1007_vm1, %v5155_v19, inf }
 0x1a9   :  { %1273 = vmin.xlane.f32.xlu1 %v1272_v63  ;;  %1177 = vmin.xlane.f32.xlu2 %v1176_v22  ;;  %7195 = vst [vmem:[#allocation121_spill] sm:$0xff] %v5127_v37  ;;  %v1530_v63 = vsel %vm1402_vm12, %v4693_v61, 64  ;;  %v5135_v22 = vadd.f32 %v5006_v20, %v827_v29  ;;  %v1083_v54 = vsel %vm1007_vm1, %v5127_v37, inf }
 0x1aa   :  { %1369 = vmin.xlane.f32.xlu0 %v1368_v15  ;;  %v5140_v15 = vcvt.s32.f32 %v1785_v56  ;;  %v5145_v25 = vsel %vm1007_vm1, %v1530_v63, 2147483647  ;;  %v1815_v63 = vshra.s32 %v5151_v35, 16  ;;  %v750_v31 = vpop.f32.mrf.mxu0 }
 0x1ab   :  { %7196 = vst [vmem:[#allocation122_spill] sm:$0xff] %v5135_v22  ;;  %v1179_v29 = vsel %vm1007_vm1, %v5135_v22, inf  ;;  %v1800_v56 = vshra.s32 %v5145_v25, 16  ;;  %v987_v22 = vpop.f32.mrf.mxu3  ;;  %v5172_v7 = vadd.f32 %v5006_v20, %v750_v31 }
 0x1ac   :  { %v5129_v47 = vpop.xlane.xlu1 %1057  ;;  %v5131_v53 = vpop.xlane.xlu2 %1653  ;;  %7198 = vst [vmem:[#allocation124_spill] sm:$0xff] %v5145_v25 }
 0x1ad   :  { %v5137_v33 = vpop.xlane.xlu0 %1153  ;;  %v5164_v13 = vcvt.s32.f32 %v1800_v56  ;;  %v5179_v56 = vadd.f32 %v5006_v20, %v987_v22  ;;  %v1086_v31 = vsel %vm1007_vm1, %v5172_v7, inf  ;;  %vm1655_vm3 = vcmp.eq.f32.partialorder %v4753_v42, %v5131_v53 }
 0x1ae   :  { %7197 = vst [vmem:[#allocation123_spill] sm:$0xff] %v5137_v33  ;;  %vm1408_vm4 = vcmp.le.f32.partialorder %v4730_v24, %v5129_v47 }
 0x1af   :  { %7202 = vst [vmem:[#allocation128_spill] sm:$0xff] %v5164_v13 }
 0x1b0   :  { %7205 = vst [vmem:[#allocation131_spill] sm:$0xff] %v5179_v56 }
 0x1b1   :  { %1084 = vmin.xlane.f32.xlu1 %v1083_v54  ;;  %1788 = vmin.xlane.f32.xlu2 %v5140_v15 }
 0x1b2   :  { %1180 = vmin.xlane.f32.xlu0 %v1179_v29  ;;  %v5168_v29 = vcvt.s32.f32 %v1815_v63  ;;  %v752_v22 = vpop.f32.mrf.mxu0 }
 0x1b4   :  { %v5157_v40 = vpop.xlane.xlu2 %1249  ;;  %v5159_v33 = vpop.xlane.xlu1 %1668  ;;  %7203 = vst [vmem:[#allocation129_spill] sm:$0xff] %v5168_v29 }
 0x1b5   :  { %7201 = vst [vmem:[#allocation127_spill] sm:$0xff] %v5157_v40  ;;  %v5162_v54 = vpop.xlane.xlu0 %1683  ;;  %v910_v40 = vpop.f32.mrf.mxu2  ;;  %vm1670_vm6 = vcmp.eq.f32.partialorder %v4781_v11, %v5159_v33 }
 0x1b6   :  { %v5176_v25 = vadd.f32 %v5006_v20, %v910_v40  ;;  %v1371_v40 = vsel %vm1007_vm1, %v5179_v56, inf  ;;  %vm1685_vm10 = vcmp.eq.f32.partialorder %v4783_v6, %v5162_v54 }
 0x1b8   :  { %7204 = vst [vmem:[#allocation130_spill] sm:$0xff] %v5176_v25 }
 0x1b9   :  { %1803 = vmin.xlane.f32.xlu1 %v5164_v13  ;;  %1276 = vmin.xlane.f32.xlu2 %v1275_v12  ;;  %v830_v13 = vpop.f32.mrf.mxu1  ;;  %v1278_v12 = vsel %vm1007_vm1, %v5176_v25, inf  ;;  %v5204_v25 = vadd.f32 %v5006_v20, %v752_v22 }
 0x1ba   :  { %1818 = vmin.xlane.f32.xlu0 %v5168_v29  ;;  %v990_v29 = vpop.f32.mrf.mxu3  ;;  %v5194_v35 = vadd.f32 %v5006_v20, %v830_v13  ;;  %v755_v48 = vpop.f32.mrf.mxu0 }
 0x1bb   :  { %7212 = vst [vmem:[#allocation138_spill] sm:$0xff] %v5204_v25 }
 0x1bc   :  { %v5181_v16 = vpop.xlane.xlu2 %1060  ;;  %v5183_v19 = vpop.xlane.xlu1 %1345  ;;  %7208 = vst [vmem:[#allocation134_spill] sm:$0xff] %v5194_v35 }
 0x1bd   :  { %7206 = vst [vmem:[#allocation132_spill] sm:$0xff] %v5183_v19  ;;  %v5185_v63 = vpop.xlane.xlu0 %1252  ;;  %v5197_v19 = vadd.f32 %v5006_v20, %v990_v29  ;;  %v912_v56 = vpop.f32.mrf.mxu2  ;;  %v1089_v29 = vsel %vm1007_vm1, %v5204_v25, inf  ;;  %vm1409_vm5 = vcmp.le.f32.partialorder %v4795_v30, %v5181_v16 }
 0x1be   :  { %7207 = vst [vmem:[#allocation133_spill] sm:$0xff] %v5185_v63  ;;  %v5217_v22 = vadd.f32 %v5006_v20, %v912_v56 }
 0x1bf   :  { %7209 = vst [vmem:[#allocation135_spill] sm:$0xff] %v5197_v19  ;;  %v1374_v13 = vsel %vm1007_vm1, %v5197_v19, inf }
 0x1c0   :  { %7213 = vst [vmem:[#allocation139_spill] sm:$0xff] %v5217_v22  ;;  %v1281_v26 = vsel %vm1007_vm1, %v5217_v22, inf }
 0x1c1   :  { %1372 = vmin.xlane.f32.xlu1 %v1371_v40  ;;  %1087 = vmin.xlane.f32.xlu2 %v1086_v31  ;;  %v1182_v31 = vsel %vm1007_vm1, %v5194_v35, inf  ;;  %v832_v40 = vpop.f32.mrf.mxu1 }
 0x1c2   :  { %1279 = vmin.xlane.f32.xlu0 %v1278_v12  ;;  %v992_v12 = vpop.f32.mrf.mxu3 }
 0x1c4   :  { %v5199_v63 = vpop.xlane.xlu2 %1348  ;;  %v5201_v58 = vpop.xlane.xlu1 %1156 }
 0x1c5   :  { %7210 = vst [vmem:[#allocation136_spill] sm:$0xff] %v5199_v63  ;;  %v5206_v46 = vpop.xlane.xlu0 %1063  ;;  %v5220_v63 = vadd.f32 %v5006_v20, %v832_v40  ;;  %v915_v28 = vpop.f32.mrf.mxu2 }
 0x1c6   :  { %7211 = vst [vmem:[#allocation137_spill] sm:$0xff] %v5201_v58  ;;  %vm1410_vm8 = vcmp.le.f32.partialorder %v4816_v32, %v5206_v46  ;;  %v1552_v32 = vsel %vm1424_vm9, %v4693_v61, 64 }
 0x1c7   :  { %7214 = vst [vmem:[#allocation140_spill] sm:$0xff] %v5220_v63  ;;  %v1185_v56 = vsel %vm1007_vm1, %v5220_v63, inf  ;;  %v5274_v63 = vadd.f32 %v5006_v20, %v915_v28 }
 0x1c9   :  { %1183 = vmin.xlane.f32.xlu1 %v1182_v31  ;;  %1375 = vmin.xlane.f32.xlu2 %v1374_v13  ;;  %v1532_v31 = vsel %vm1404_vm14, %v4693_v61, 64  ;;  %v5228_v13 = vadd.f32 %v5006_v20, %v992_v12  ;;  %v835_v12 = vpop.f32.mrf.mxu1  ;;  %7224 = vst [vmem:[#allocation150_spill] sm:$0xff] %v5274_v63  ;;  %v1284_v25 = vsel %vm1007_vm1, %v5274_v63, inf }
 0x1ca   :  { %1090 = vmin.xlane.f32.xlu0 %v1089_v29  ;;  %v5237_v40 = vsel %vm1007_vm1, %v1532_v31, 2147483647  ;;  %v5249_v22 = vadd.f32 %v5006_v20, %v835_v12 }
 0x1cb   :  { %7217 = vst [vmem:[#allocation143_spill] sm:$0xff] %v5228_v13  ;;  %v1377_v29 = vsel %vm1007_vm1, %v5228_v13, inf  ;;  %v1830_v31 = vshra.s32 %v5237_v40, 16  ;;  %v1533_v13 = vsel %vm1405_vm15, %v4693_v61, 64  ;;  %vm3568_vm15 = vcmask 7168  }
 0x1cc   :  { %v5222_v35 = vpop.xlane.xlu2 %1159  ;;  %v5224_v19 = vpop.xlane.xlu1 %1255  ;;  %7220 = vst [vmem:[#allocation146_spill] sm:$0xff] %v5249_v22  ;;  %v1188_v5 = vsel %vm1007_vm1, %v5249_v22, inf  ;;  %v5267_v12 = vsel %vm1007_vm1, %v1533_v13, 2147483647 }
 0x1cd   :  { %7215 = vst [vmem:[#allocation141_spill] sm:$0xff] %v5222_v35  ;;  %v5230_v58 = vpop.xlane.xlu0 %1351 }
 0x1ce   :  { %7216 = vst [vmem:[#allocation142_spill] sm:$0xff] %v5224_v19  ;;  %v5271_v19 = vsel %vm1007_vm1, %v1534_v3, 2147483647 }
 0x1cf   :  { %7218 = vst [vmem:[#allocation144_spill] sm:$0xff] %v5230_v58  ;;  %v5244_v58 = vadd.f32 %v5006_v20, %v755_v48  ;;  %v1860_v22 = vshra.s32 %v5271_v19, 16 }
 0x1d0   :  { %7222 = vst [vmem:[#allocation148_spill] sm:$0xff] %v5267_v12 }
 0x1d1   :  { %1282 = vmin.xlane.f32.xlu1 %v1281_v26  ;;  %1186 = vmin.xlane.f32.xlu2 %v1185_v56  ;;  %7219 = vst [vmem:[#allocation145_spill] sm:$0xff] %v5244_v58  ;;  %v1092_v48 = vsel %vm1007_vm1, %v5244_v58, inf  ;;  %v757_v58 = vpop.f32.mrf.mxu0  ;;  %v5288_v28 = vcvt.s32.f32 %v1860_v22 }
 0x1d2   :  { %1378 = vmin.xlane.f32.xlu0 %v1377_v29  ;;  %v5262_v29 = vcvt.s32.f32 %v1830_v31  ;;  %7223 = vst [vmem:[#allocation149_spill] sm:$0xff] %v5271_v19  ;;  %v1845_v31 = vshra.s32 %v5267_v12, 16  ;;  %v5296_v12 = vadd.f32 %v5006_v20, %v757_v58 }
 0x1d3   :  { %7227 = vst [vmem:[#allocation153_spill] sm:$0xff] %v5288_v28 }
 0x1d4   :  { %v5252_v26 = vpop.xlane.xlu2 %1698  ;;  %v5254_v56 = vpop.xlane.xlu1 %1066  ;;  %v5286_v3 = vcvt.s32.f32 %v1845_v31 }
 0x1d5   :  { %v5257_v18 = vpop.xlane.xlu0 %1162  ;;  %vm1700_vm11 = vcmp.eq.f32.partialorder %v4895_v2, %v5252_v26 }
 0x1d6   :  { %7221 = vst [vmem:[#allocation147_spill] sm:$0xff] %v5257_v18 }
 0x1d7   :  { %7226 = vst [vmem:[#allocation152_spill] sm:$0xff] %v5286_v3 }
 0x1d9   :  { %1093 = vmin.xlane.f32.xlu1 %v1092_v48  ;;  %1833 = vmin.xlane.f32.xlu2 %v5262_v29  ;;  %v995_v48 = vpop.f32.mrf.mxu3  ;;  %v760_v27 = vpop.f32.mrf.mxu0 }
 0x1da   :  { %1189 = vmin.xlane.f32.xlu0 %v1188_v5  ;;  %v917_v5 = vpop.f32.mrf.mxu2 }
 0x1db   :  { %v5303_v31 = vadd.f32 %v5006_v20, %v917_v5 }
 0x1dc   :  { %v5277_v35 = vpop.xlane.xlu2 %1258  ;;  %v5279_v18 = vpop.xlane.xlu1 %1713 }
 0x1dd   :  { %7225 = vst [vmem:[#allocation151_spill] sm:$0xff] %v5277_v35  ;;  %v5282_v13 = vpop.xlane.xlu0 %1728  ;;  %v5293_v35 = vadd.f32 %v5006_v20, %v995_v48  ;;  %v1095_v48 = vsel %vm1007_vm1, %v5296_v12, inf  ;;  %v1287_v58 = vsel %vm1007_vm1, %v5303_v31, inf  ;;  %vm1715_vm13 = vcmp.eq.f32.partialorder %v4919_v51, %v5279_v18 }
 0x1de   :  { %7230 = vst [vmem:[#allocation156_spill] sm:$0xff] %v5303_v31  ;;  %vm1730_vm9 = vcmp.eq.f32.partialorder %v4923_v52, %v5282_v13 }
 0x1df   :  { %7228 = vst [vmem:[#allocation154_spill] sm:$0xff] %v5293_v35 }
 0x1e1   :  { %1848 = vmin.xlane.f32.xlu1 %v5286_v3  ;;  %1285 = vmin.xlane.f32.xlu2 %v1284_v25  ;;  %v1380_v25 = vsel %vm1007_vm1, %v5293_v35, inf  ;;  %v837_v3 = vpop.f32.mrf.mxu1 }
 0x1e2   :  { %1863 = vmin.xlane.f32.xlu0 %v5288_v28  ;;  %v997_v28 = vpop.f32.mrf.mxu3  ;;  %v5320_v35 = vadd.f32 %v5006_v20, %v837_v3  ;;  %v920_v31 = vpop.f32.mrf.mxu2 }
 0x1e3   :  { %v5314_v5 = vadd.f32 %v5006_v20, %v997_v28 }
 0x1e4   :  { %v5298_v19 = vpop.xlane.xlu2 %1069  ;;  %v5300_v63 = vpop.xlane.xlu1 %1354  ;;  %7234 = vst [vmem:[#allocation160_spill] sm:$0xff] %v5320_v35 }
 0x1e5   :  { %7229 = vst [vmem:[#allocation155_spill] sm:$0xff] %v5300_v63  ;;  %v5305_v22 = vpop.xlane.xlu0 %1261  ;;  %v5317_v63 = vadd.f32 %v5006_v20, %v760_v27  ;;  %v1191_v27 = vsel %vm1007_vm1, %v5320_v35, inf  ;;  %v1535_v35 = vsel %vm1407_vm2, %v4693_v61, 64  ;;  %vm1412_vm12 = vcmp.le.f32.partialorder %v4927_v45, %v5298_v19 }
 0x1e6   :  { %7231 = vst [vmem:[#allocation157_spill] sm:$0xff] %v5305_v22  ;;  %v1709_v45 = vand.u32 65535, %v4900_v43  ;;  %v1739_v43 = vand.u32 65535, %v4992_v36 }
 0x1e7   :  { %7232 = vst [vmem:[#allocation158_spill] sm:$0xff] %v5314_v5 }
 0x1e8   :  { %7233 = vst [vmem:[#allocation159_spill] sm:$0xff] %v5317_v63 }
 0x1e9   :  { %1381 = vmin.xlane.f32.xlu1 %v1380_v25  ;;  %1096 = vmin.xlane.f32.xlu2 %v1095_v48  ;;  %v1383_v48 = vsel %vm1007_vm1, %v5314_v5, inf  ;;  %v840_v28 = vpop.f32.mrf.mxu1  ;;  %v1649_v5 = vand.u32 65535, %v4720_v1  ;;  %v5357_v1 = vsel %vm1007_vm1, %v1535_v35, 2147483647 }
 0x1ea   :  { %1288 = vmin.xlane.f32.xlu0 %v1287_v58  ;;  %v1098_v58 = vsel %vm1007_vm1, %v5317_v63, inf  ;;  %v5337_v3 = vadd.f32 %v5006_v20, %v840_v28  ;;  %v1000_v28 = vpop.f32.mrf.mxu3  ;;  %v922_v16 = vpop.f32.mrf.mxu2 }
 0x1eb   :  { %v5412_v11 = vadd.f32 %v5006_v20, %v922_v16  ;;  %v1679_v16 = vand.u32 65535, %v4765_v59 }
 0x1ec   :  { %v5322_v22 = vpop.xlane.xlu2 %1357  ;;  %v5324_v37 = vpop.xlane.xlu1 %1165  ;;  %7237 = vst [vmem:[#allocation163_spill] sm:$0xff] %v5337_v3  ;;  %v1194_v17 = vsel %vm1007_vm1, %v5337_v3, inf }
 0x1ed   :  { %7235 = vst [vmem:[#allocation161_spill] sm:$0xff] %v5322_v22  ;;  %v5326_v25 = vpop.xlane.xlu0 %1072  ;;  %v5340_v22 = vadd.f32 %v5006_v20, %v920_v31  ;;  %v1651_v31 = vcvt.s32.f32 %v1649_v5  ;;  %v1293_v0 = vsel %vm1007_vm1, %v5412_v11, inf  ;;  %v1681_v46 = vcvt.s32.f32 %v1679_v16 }
 0x1ee   :  { %7236 = vst [vmem:[#allocation162_spill] sm:$0xff] %v5324_v37 }
 0x1ef   :  { %7238 = vst [vmem:[#allocation164_spill] sm:$0xff] %v5340_v22  ;;  %v1290_v41 = vsel %vm1007_vm1, %v5340_v22, inf  ;;  %v1875_v22 = vshra.s32 %v5357_v1, 16 }
 0x1f0   :  { %7248 = vst [vmem:[#allocation174_spill] sm:$0xff] %v5412_v11 }
 0x1f1   :  { %1192 = vmin.xlane.f32.xlu1 %v1191_v27  ;;  %1384 = vmin.xlane.f32.xlu2 %v1383_v48  ;;  %v762_v48 = vpop.f32.mrf.mxu0 }
 0x1f2   :  { %1099 = vmin.xlane.f32.xlu0 %v1098_v58  ;;  %v1656_v58 = vsel %vm1655_vm3, %v1651_v31, inf  ;;  %v5366_v42 = vadd.f32 %v5006_v20, %v762_v48  ;;  %v5375_v31 = vcvt.s32.f32 %v1875_v22  ;;  %v842_v48 = vpop.f32.mrf.mxu1  ;;  %vm1411_vm3 = vcmp.le.f32.partialorder %v4882_v8, %v5254_v56 }
 0x1f3   :  { %v5394_v3 = vadd.f32 %v5006_v20, %v842_v48 }
 0x1f4   :  { %v5343_v37 = vpop.xlane.xlu2 %1168  ;;  %v5345_v63 = vpop.xlane.xlu1 %1264  ;;  %7243 = vst [vmem:[#allocation169_spill] sm:$0xff] %v5366_v42  ;;  %v1101_v47 = vsel %vm1007_vm1, %v5366_v42, inf }
 0x1f5   :  { %7239 = vst [vmem:[#allocation165_spill] sm:$0xff] %v5343_v37  ;;  %v5348_v27 = vpop.xlane.xlu0 %1360  ;;  %v1002_v37 = vpop.f32.mrf.mxu3  ;;  %v1197_v48 = vsel %vm1007_vm1, %v5394_v3, inf }
 0x1f6   :  { %7240 = vst [vmem:[#allocation166_spill] sm:$0xff] %v5345_v63 }
 0x1f7   :  { %7241 = vst [vmem:[#allocation167_spill] sm:$0xff] %v5348_v27  ;;  %v5362_v27 = vadd.f32 %v5006_v20, %v1000_v28  ;;  %v1664_v28 = vand.u32 65535, %v4761_v60 }
 0x1f8   :  { %7246 = vst [vmem:[#allocation172_spill] sm:$0xff] %v5394_v3  ;;  %v1741_v3 = vcvt.s32.f32 %v1739_v43 }
 0x1f9   :  { %1291 = vmin.xlane.f32.xlu1 %v1290_v41  ;;  %1195 = vmin.xlane.f32.xlu2 %v1194_v17  ;;  %7242 = vst [vmem:[#allocation168_spill] sm:$0xff] %v5362_v27  ;;  %v1536_v41 = vsel %vm1408_vm4, %v4693_v61, 64  ;;  %v1386_v24 = vsel %vm1007_vm1, %v5362_v27, inf  ;;  %v1666_v60 = vcvt.s32.f32 %v1664_v28  ;;  %v5415_v28 = vadd.f32 %v5006_v20, %v1002_v37 }
 0x1fa   :  { %1657 = vmin.xlane.f32.xlu0 %v1656_v58  ;;  %v5382_v58 = vsel %vm1007_vm1, %v1536_v41, 2147483647 }
 0x1fb   :  { %v1890_v22 = vshra.s32 %v5382_v58, 16  ;;  %v1671_v30 = vsel %vm1670_vm6, %v1666_v60, inf  ;;  %7249 = vst [vmem:[#allocation175_spill] sm:$0xff] %v5415_v28  ;;  %v1389_v20 = vsel %vm1007_vm1, %v5415_v28, inf }
 0x1fc   :  { %v5368_v5 = vpop.xlane.xlu1 %1075  ;;  %v5370_v35 = vpop.xlane.xlu2 %1743 }
 0x1fd   :  { %v5373_v17 = vpop.xlane.xlu0 %1171  ;;  %vm1745_vm14 = vcmp.eq.f32.partialorder %v5022_v57, %v5370_v35 }
 0x1fe   :  { %7244 = vst [vmem:[#allocation170_spill] sm:$0xff] %v5373_v17  ;;  %v1746_v51 = vsel %vm1745_vm14, %v1741_v3, inf }
 0x201   :  { %1102 = vmin.xlane.f32.xlu1 %v1101_v47  ;;  %1878 = vmin.xlane.f32.xlu2 %v5375_v31  ;;  %v5401_v47 = vcvt.s32.f32 %v1890_v22 }
 0x202   :  { %1387 = vmin.xlane.f32.xlu0 %v1386_v24  ;;  %v1537_v24 = vsel %vm1409_vm5, %v4693_v61, 64  ;;  %vm1427_vm5 = vcmp.le.f32.partialorder %v4332_v10, %v4657_v4 }
 0x203   :  { %v5404_v17 = vsel %vm1007_vm1, %v1537_v24, 2147483647 }
 0x204   :  { %v5389_v63 = vpop.xlane.xlu1 %1758  ;;  %v5391_v27 = vpop.xlane.xlu2 %1267  ;;  %7247 = vst [vmem:[#allocation173_spill] sm:$0xff] %v5404_v17  ;;  %v1905_v60 = vshra.s32 %v5404_v17, 16 }
 0x205   :  { %7245 = vst [vmem:[#allocation171_spill] sm:$0xff] %v5391_v27  ;;  %v5396_v41 = vpop.xlane.xlu0 %1773 }
 0x206   :  { %v5432_v37 = vcvt.s32.f32 %v1905_v60 }
 0x208   :  { %7252 = vst [vmem:[#allocation178_spill] sm:$0xff] %v5432_v37 }
 0x209   :  { %1893 = vmin.xlane.f32.xlu1 %v5401_v47  ;;  %1672 = vmin.xlane.f32.xlu2 %v1671_v30  ;;  %v1553_v30 = vsel %vm1425_vm7, %v4693_v61, 64 }
 0x20a   :  { %1198 = vmin.xlane.f32.xlu0 %v1197_v48  ;;  %v5428_v14 = vsel %vm1007_vm1, %v1553_v30, 2147483647  ;;  %v1694_v48 = vand.u32 65535, %v4873_v21  ;;  %v1686_v21 = vsel %vm1685_vm10, %v1681_v46, inf  ;;  %vm1414_vm10 = vcmp.le.f32.partialorder %v4999_v55, %v5368_v5 }
 0x20b   :  { %v2145_v30 = vshra.s32 %v5428_v14, 16  ;;  %v1829_v55 = vand.u32 65535, %v5237_v40 }
 0x20c   :  { %v5417_v22 = vpop.xlane.xlu1 %1363  ;;  %v5419_v24 = vpop.xlane.xlu2 %1078  ;;  %v1696_v50 = vcvt.s32.f32 %v1694_v48 }
 0x20d   :  { %7250 = vst [vmem:[#allocation176_spill] sm:$0xff] %v5417_v22  ;;  %v5423_v27 = vpop.xlane.xlu0 %1270  ;;  %v5454_v38 = vcvt.s32.f32 %v2145_v30  ;;  %vm1415_vm0 = vcmp.le.f32.partialorder %v5056_v34, %v5419_v24 }
 0x20e   :  { %7251 = vst [vmem:[#allocation177_spill] sm:$0xff] %v5423_v27  ;;  %v1701_v6 = vsel %vm1700_vm11, %v1696_v50, inf }
 0x211   :  { %1390 = vmin.xlane.f32.xlu1 %v1389_v20  ;;  %1294 = vmin.xlane.f32.xlu2 %v1293_v0  ;;  %v1538_v0 = vsel %vm1410_vm8, %v4693_v61, 64  ;;  %vm1426_vm8 = vcmp.le.f32.partialorder %v4329_v9, %v4659_v44 }
 0x212   :  { %1908 = vmin.xlane.f32.xlu0 %v5432_v37  ;;  %v5457_v59 = vsel %vm1007_vm1, %v1538_v0, 2147483647 }
 0x213   :  { %v1920_v2 = vshra.s32 %v5457_v59, 16 }
 0x214   :  { %v5442_v22 = vpop.xlane.xlu1 %1174  ;;  %v5444_v60 = vpop.xlane.xlu2 %1366 }
 0x215   :  { %7253 = vst [vmem:[#allocation179_spill] sm:$0xff] %v5442_v22  ;;  %v5447_v20 = vpop.xlane.xlu0 %1081  ;;  %v5474_v46 = vcvt.s32.f32 %v1920_v2  ;;  %v1711_v2 = vcvt.s32.f32 %v1709_v45 }
 0x216   :  { %7254 = vst [vmem:[#allocation180_spill] sm:$0xff] %v5444_v60  ;;  %v5460_v60 = vsel %vm1007_vm1, %v1552_v32, 2147483647  ;;  %v1540_v32 = vsel %vm1412_vm12, %v4693_v61, 64  ;;  %vm1775_vm12 = vcmp.eq.f32.partialorder %v5048_v49, %v5396_v41 }
 0x217   :  { %v2130_v30 = vshra.s32 %v5460_v60, 16  ;;  %7258 = vst [vmem:[#allocation184_spill] sm:$0xff] %v5474_v46  ;;  %v5479_v50 = vsel %vm1007_vm1, %v1540_v32, 2147483647 }
 0x218   :  { %7259 = vst [vmem:[#allocation185_spill] sm:$0xff] %v5479_v50 }
 0x219   :  { %2148 = vmin.xlane.f32.xlu2 %v5454_v38  ;;  %1687 = vmin.xlane.f32.xlu1 %v1686_v21  ;;  %v5476_v21 = vcvt.s32.f32 %v2130_v30  ;;  %v1716_v30 = vsel %vm1715_vm13, %v1711_v2, inf }
 0x21a   :  { %1702 = vmin.xlane.f32.xlu0 %v1701_v6 }
 0x21c   :  { %v5466_v16 = vpop.xlane.xlu1 %1273  ;;  %v5468_v48 = vpop.xlane.xlu2 %1177 }
 0x21d   :  { %7255 = vst [vmem:[#allocation181_spill] sm:$0xff] %v5466_v16  ;;  %v5471_v0 = vpop.xlane.xlu0 %1369 }
 0x21e   :  { %7256 = vst [vmem:[#allocation182_spill] sm:$0xff] %v5468_v48 }
 0x21f   :  { %7257 = vst [vmem:[#allocation183_spill] sm:$0xff] %v5471_v0  ;;  %v1950_v0 = vshra.s32 %v5479_v50, 16 }
 0x221   :  { %1923 = vmin.xlane.f32.xlu2 %v5474_v46  ;;  %v5493_v32 = vcvt.s32.f32 %v1950_v0 }
 0x222   :  { %2133 = vmin.xlane.f32.xlu0 %v5476_v21 }
 0x223   :  { %7261 = vst [vmem:[#allocation187_spill] sm:$0xff] %v5493_v32 }
 0x224   :  { %v5484_v19 = vpop.xlane.xlu1 %1084  ;;  %v5486_v6 = vpop.xlane.xlu2 %1788 }
 0x225   :  { %v5489_v28 = vpop.xlane.xlu0 %1180  ;;  %vm1790_vm6 = vcmp.eq.f32.partialorder %v5140_v15, %v5486_v6  ;;  %v1724_v15 = vand.u32 65535, %v4906_v39 }
 0x226   :  { %7260 = vst [vmem:[#allocation186_spill] sm:$0xff] %v5489_v28 }
 0x227   :  { %v1726_v9 = vcvt.s32.f32 %v1724_v15 }
 0x229   :  { %1717 = vmin.xlane.f32.xlu2 %v1716_v30 }
 0x22a   :  { %1953 = vmin.xlane.f32.xlu0 %v5493_v32 }
 0x22c   :  { %v5497_v11 = vpop.xlane.xlu1 %1803  ;;  %v5499_v16 = vpop.xlane.xlu2 %1276 }
 0x22d   :  { %7262 = vst [vmem:[#allocation188_spill] sm:$0xff] %v5499_v16  ;;  %v5501_v27 = vpop.xlane.xlu0 %1818 }
 0x232   :  { %1747 = vmin.xlane.f32.xlu0 %v1746_v51 }
 0x234   :  { %v5505_v45 = vpop.xlane.xlu1 %1372  ;;  %v5507_v0 = vpop.xlane.xlu2 %1087 }
 0x235   :  { %7263 = vst [vmem:[#allocation189_spill] sm:$0xff] %v5505_v45  ;;  %v5509_v2 = vpop.xlane.xlu0 %1279  ;;  %vm1418_vm7 = vcmp.le.f32.partialorder %v5172_v7, %v5507_v0  ;;  %v1554_v7 = vsel %vm1426_vm8, %v4693_v61, 64 }
 0x236   :  { %7264 = vst [vmem:[#allocation190_spill] sm:$0xff] %v5509_v2 }
 0x23c   :  { %v5511_v30 = vpop.xlane.xlu1 %1183  ;;  %v5513_v36 = vpop.xlane.xlu2 %1375 }
 0x23d   :  { %7265 = vst [vmem:[#allocation191_spill] sm:$0xff] %v5511_v30  ;;  %v5515_v48 = vpop.xlane.xlu0 %1090 }
 0x23e   :  { %7266 = vst [vmem:[#allocation192_spill] sm:$0xff] %v5513_v36 }
 0x244   :  { %v5517_v16 = vpop.xlane.xlu1 %1282  ;;  %v5519_v28 = vpop.xlane.xlu2 %1186 }
 0x245   :  { %7267 = vst [vmem:[#allocation193_spill] sm:$0xff] %v5517_v16  ;;  %v5521_v57 = vpop.xlane.xlu0 %1378 }
 0x246   :  { %7268 = vst [vmem:[#allocation194_spill] sm:$0xff] %v5519_v28 }
 0x247   :  { %7269 = vst [vmem:[#allocation195_spill] sm:$0xff] %v5521_v57 }
 0x24c   :  { %v5523_v3 = vpop.xlane.xlu1 %1093  ;;  %v5525_v43 = vpop.xlane.xlu2 %1833 }
 0x24d   :  { %v5527_v51 = vpop.xlane.xlu0 %1189  ;;  %vm1835_vm11 = vcmp.eq.f32.partialorder %v5262_v29, %v5525_v43 }
 0x24e   :  { %7270 = vst [vmem:[#allocation196_spill] sm:$0xff] %v5527_v51  ;;  %v1660_v51 = vcvt.f32.s32 %v5131_v53  ;;  %v1675_v53 = vcvt.f32.s32 %v5159_v33  ;;  %v2144_v33 = vand.u32 65535, %v5428_v14 }
 0x250   :  { %v1661_v17 = vshll.u32 %v1660_v51, 16  ;;  %v1676_v51 = vshll.u32 %v1675_v53, 16  ;;  %v1705_v53 = vcvt.f32.s32 %v5252_v26 }
 0x254   :  { %v5529_v45 = vpop.xlane.xlu1 %1848  ;;  %v5531_v2 = vpop.xlane.xlu2 %1285 }
 0x255   :  { %7271 = vst [vmem:[#allocation197_spill] sm:$0xff] %v5531_v2  ;;  %v5533_v30 = vpop.xlane.xlu0 %1863 }
 0x25c   :  { %v5535_v36 = vpop.xlane.xlu1 %1381  ;;  %v5537_v22 = vpop.xlane.xlu2 %1096 }
 0x25d   :  { %7272 = vst [vmem:[#allocation198_spill] sm:$0xff] %v5535_v36  ;;  %v5539_v16 = vpop.xlane.xlu0 %1288 }
 0x25e   :  { %7273 = vst [vmem:[#allocation199_spill] sm:$0xff] %v5539_v16 }
 0x264   :  { %v5541_v28 = vpop.xlane.xlu1 %1192  ;;  %v5543_v57 = vpop.xlane.xlu2 %1384 }
 0x265   :  { %7274 = vst [vmem:[#allocation200_spill] sm:$0xff] %v5541_v28  ;;  %v5545_v32 = vpop.xlane.xlu0 %1099 }
 0x266   :  { %7275 = vst [vmem:[#allocation201_spill] sm:$0xff] %v5543_v57 }
 0x26c   :  { %v5548_v50 = vpop.xlane.xlu1 %1291  ;;  %v5550_v37 = vpop.xlane.xlu2 %1195 }
 0x26d   :  { %7276 = vst [vmem:[#allocation202_spill] sm:$0xff] %v5548_v50  ;;  %v1658_v2 = vpop.xlane.xlu0 %1657 }
 0x26e   :  { %7277 = vst [vmem:[#allocation203_spill] sm:$0xff] %v5550_v37  ;;  %v1659_v46 = vcvt.f32.s32 %v1658_v2 }
 0x270   :  { %v1662_v36 = vadd.s32 %v1661_v17, %v1659_v46 }
 0x272   :  { %3569 = vst.msk [vmem:[%s6960_s3] sm:$0xff] %vm3568_vm15, %v1662_v36 }
 0x274   :  { %v5556_v16 = vpop.xlane.xlu1 %1102  ;;  %v5558_v57 = vpop.xlane.xlu2 %1878 }
 0x275   :  { %7278 = vst [vmem:[#allocation204_spill] sm:$0xff] %v5556_v16  ;;  %v5560_v28 = vpop.xlane.xlu0 %1387 }
 0x276   :  { %7279 = vst [vmem:[#allocation205_spill] sm:$0xff] %v5560_v28 }
 0x27c   :  { %v5563_v50 = vpop.xlane.xlu1 %1893  ;;  %v1673_v37 = vpop.xlane.xlu2 %1672 }
 0x27d   :  { %v1674_v2 = vcvt.f32.s32 %v1673_v37  ;;  %v5565_v42 = vpop.xlane.xlu0 %1198  ;;  %v1690_v37 = vcvt.f32.s32 %v5162_v54 }
 0x27e   :  { %7280 = vst [vmem:[#allocation206_spill] sm:$0xff] %v5565_v42  ;;  %v2146_v42 = vcvt.s32.f32 %v2144_v33 }
 0x27f   :  { %v1677_v17 = vadd.s32 %v1676_v51, %v1674_v2  ;;  %v1543_v51 = vsel %vm1415_vm0, %v4693_v61, 64 }
 0x280   :  { %v5588_v34 = vsel %vm1007_vm1, %v1543_v51, 2147483647  ;;  %v1555_v51 = vsel %vm1427_vm5, %v4693_v61, 64 }
 0x281   :  { %3570 = vst.msk [vmem:[%s6960_s3 + $0x8] sm:$0xff] %vm3568_vm15, %v1677_v17  ;;  %v1995_v33 = vshra.s32 %v5588_v34, 16  ;;  %v5626_v10 = vsel %vm1007_vm1, %v1555_v51, 2147483647 }
 0x283   :  { %v5607_v8 = vcvt.s32.f32 %v1995_v33  ;;  %v1750_v33 = vcvt.f32.s32 %v5370_v35  ;;  %v1731_v35 = vsel %vm1730_vm9, %v1726_v9, inf }
 0x284   :  { %v5571_v46 = vpop.xlane.xlu1 %1390  ;;  %v5573_v36 = vpop.xlane.xlu2 %1294 }
 0x285   :  { %7281 = vst [vmem:[#allocation207_spill] sm:$0xff] %v5571_v46  ;;  %v5575_v28 = vpop.xlane.xlu0 %1908  ;;  %v1691_v46 = vshll.u32 %v1690_v37, 16  ;;  %v1720_v37 = vcvt.f32.s32 %v5279_v18  ;;  %v1751_v39 = vshll.u32 %v1750_v33, 16 }
 0x286   :  { %7282 = vst [vmem:[#allocation208_spill] sm:$0xff] %v5573_v36 }
 0x287   :  { %7283 = vst [vmem:[#allocation209_spill] sm:$0xff] %v5575_v28  ;;  %v1706_v28 = vshll.u32 %v1705_v53, 16 }
 0x28c   :  { %v5583_v2 = vpop.xlane.xlu2 %2148  ;;  %v1688_v17 = vpop.xlane.xlu1 %1687 }
 0x28d   :  { %v1689_v16 = vcvt.f32.s32 %v1688_v17  ;;  %v1703_v36 = vpop.xlane.xlu0 %1702  ;;  %vm2150_vm2 = vcmp.eq.f32.partialorder %v5454_v38, %v5583_v2  ;;  %v2129_v38 = vand.u32 65535, %v5460_v60 }
 0x28e   :  { %v1704_v24 = vcvt.f32.s32 %v1703_v36  ;;  %v2151_v54 = vsel %vm2150_vm2, %v2146_v42, inf  ;;  %v1539_v42 = vsel %vm1411_vm3, %v4693_v61, 64  ;;  %v1784_v36 = vand.u32 65535, %v5119_v62 }
 0x28f   :  { %v1692_v14 = vadd.s32 %v1691_v46, %v1689_v16  ;;  %2152 = vmin.xlane.f32.xlu0 %v2151_v54  ;;  %v2131_v56 = vcvt.s32.f32 %v2129_v38  ;;  %v5612_v46 = vsel %vm1007_vm1, %v1539_v42, 2147483647  ;;  %v1546_v38 = vsel %vm1418_vm7, %v4693_v61, 64 }
 0x290   :  { %v1707_v26 = vadd.s32 %v1706_v28, %v1704_v24  ;;  %v1935_v53 = vshra.s32 %v5612_v46, 16  ;;  %v1786_v17 = vcvt.s32.f32 %v1784_v36  ;;  %v1721_v24 = vshll.u32 %v1720_v37, 16 }
 0x291   :  { %3571 = vst.msk [vmem:[%s6960_s3 + $0x10] sm:$0xff] %vm3568_vm15, %v1692_v14  ;;  %v5649_v42 = vsel %vm1007_vm1, %v1546_v38, 2147483647 }
 0x292   :  { %3572 = vst.msk [vmem:[%s6960_s3 + $0x18] sm:$0xff] %vm3568_vm15, %v1707_v26  ;;  %v1791_v4 = vsel %vm1790_vm6, %v1786_v17, inf  ;;  %v5628_v62 = vcvt.s32.f32 %v1935_v53  ;;  %v2175_v26 = vshra.s32 %v5626_v10, 16  ;;  %v2040_v52 = vshra.s32 %v5649_v42, 16 }
 0x293   :  { %v1542_v53 = vsel %vm1414_vm10, %v4693_v61, 64 }
 0x294   :  { %v5603_v28 = vpop.xlane.xlu2 %1923  ;;  %v5646_v44 = vcvt.s32.f32 %v2175_v26  ;;  %v5664_v51 = vcvt.s32.f32 %v2040_v52  ;;  %v5669_v17 = vsel %vm1007_vm1, %v1542_v53, 2147483647  ;;  %v2155_v26 = vcvt.f32.s32 %v5583_v2 }
 0x295   :  { %v5605_v16 = vpop.xlane.xlu0 %2133  ;;  %v1980_v5 = vshra.s32 %v5669_v17, 16 }
 0x296   :  { %vm2135_vm4 = vcmp.eq.f32.partialorder %v5476_v21, %v5605_v16  ;;  %v2156_v38 = vshll.u32 %v2155_v26, 16 }
 0x297   :  { %1998 = vmin.xlane.f32.xlu0 %v5607_v8  ;;  %v2136_v60 = vsel %vm2135_vm4, %v2131_v56, inf }
 0x298   :  { %2137 = vmin.xlane.f32.xlu1 %v2136_v60  ;;  %v5652_v60 = vsel %vm1007_vm1, %v1554_v7, 2147483647 }
 0x299   :  { %v2160_v37 = vshra.s32 %v5652_v60, 16 }
 0x29c   :  { %v1718_v21 = vpop.xlane.xlu2 %1717 }
 0x29d   :  { %v1719_v54 = vcvt.f32.s32 %v1718_v21  ;;  %v5623_v14 = vpop.xlane.xlu0 %1953  ;;  %v5666_v21 = vcvt.s32.f32 %v2160_v37 }
 0x29f   :  { %v1722_v18 = vadd.s32 %v1721_v24, %v1719_v54  ;;  %1792 = vmin.xlane.f32.xlu0 %v1791_v4  ;;  %v1831_v24 = vcvt.s32.f32 %v1829_v55  ;;  %v5677_v4 = vcvt.s32.f32 %v1980_v5  ;;  %v2174_v55 = vand.u32 65535, %v5626_v10 }
 0x2a0   :  { %1938 = vmin.xlane.f32.xlu1 %v5628_v62 }
 0x2a1   :  { %3573 = vst.msk [vmem:[%s6960_s3 + $0x20] sm:$0xff] %vm3568_vm15, %v1722_v18  ;;  %v1836_v54 = vsel %vm1835_vm11, %v1831_v24, inf  ;;  %v1769_v18 = vand.u32 65535, %v5031_v23 }
 0x2a3   :  { %v1771_v40 = vcvt.s32.f32 %v1769_v18 }
 0x2a5   :  { %v1748_v0 = vpop.xlane.xlu0 %1747  ;;  %v1776_v15 = vsel %vm1775_vm12, %v1771_v40, inf }
 0x2a6   :  { %v1749_v56 = vcvt.f32.s32 %v1748_v0  ;;  %v2140_v0 = vcvt.f32.s32 %v5605_v16  ;;  %v7284_v16 = vld [vmem:[#allocation121_spill] sm:$0xff] }
 0x2a7   :  { %2178 = vmin.xlane.f32.xlu0 %v5646_v44  ;;  %vm1417_vm13 = vcmp.le.f32.partialorder %v7284_v16, %v5484_v19 }
 0x2a8   :  { %v1752_v36 = vadd.s32 %v1751_v39, %v1749_v56  ;;  %1732 = vmin.xlane.f32.xlu1 %v1731_v35  ;;  %v2141_v49 = vshll.u32 %v2140_v0, 16  ;;  %v1795_v35 = vcvt.f32.s32 %v5486_v6  ;;  %v1735_v6 = vcvt.f32.s32 %v5282_v13 }
 0x2a9   :  { %v1545_v5 = vsel %vm1417_vm13, %v4693_v61, 64  ;;  %vm1421_vm13 = vcmp.le.f32.partialorder %v5296_v12, %v5537_v22 }
 0x2aa   :  { %3575 = vst.msk [vmem:[%s6960_s3 + $0x30] sm:$0xff] %vm3568_vm15, %v1752_v36  ;;  %v1796_v36 = vshll.u32 %v1795_v35, 16  ;;  %v1736_v40 = vshll.u32 %v1735_v6, 16  ;;  %v5712_v19 = vsel %vm1007_vm1, %v1545_v5, 2147483647 }
 0x2ab   :  { %v2025_v13 = vshra.s32 %v5712_v19, 16 }
 0x2ad   :  { %v5727_v0 = vcvt.s32.f32 %v2025_v13 }
 0x2af   :  { %2043 = vmin.xlane.f32.xlu0 %v5664_v51 }
 0x2b0   :  { %2163 = vmin.xlane.f32.xlu1 %v5666_v21 }
 0x2b7   :  { %1837 = vmin.xlane.f32.xlu0 %v1836_v54  ;;  %v2176_v54 = vcvt.s32.f32 %v2174_v55 }
 0x2b8   :  { %1983 = vmin.xlane.f32.xlu1 %v5677_v4 }
 0x2c0   :  { %1777 = vmin.xlane.f32.xlu1 %v1776_v15 }
 0x302   :  { %v2153_v33 = vpop.xlane.xlu0 %2152 }
 0x303   :  { %v2154_v29 = vcvt.f32.s32 %v2153_v33  ;;  %v7285_v33 = vld [vmem:[#allocation90_spill] sm:$0xff] }
 0x304   :  { %vm1413_vm0 = vcmp.le.f32.partialorder %v7285_v33, %v5326_v25  ;;  %v7293_v33 = vld [vmem:[#allocation101_spill] sm:$0xff] }
 0x305   :  { %v2157_v7 = vadd.s32 %v2156_v38, %v2154_v29  ;;  %v2159_v38 = vand.u32 65535, %v5652_v60  ;;  %v1754_v13 = vand.u32 65535, %v7293_v33  ;;  %v7297_v33 = vld [vmem:[#allocation153_spill] sm:$0xff] }
 0x306   :  { %vm1865_vm9 = vcmp.eq.f32.partialorder %v7297_v33, %v5533_v30  ;;  %v1825_v33 = vcvt.f32.s32 %v5501_v27 }
 0x307   :  { %3602 = vst.msk [vmem:[%s6960_s3 + $0x108] sm:$0xff] %vm3568_vm15, %v2157_v7 }
 0x30a   :  { %v5689_v23 = vpop.xlane.xlu0 %1998 }
 0x30b   :  { %v2138_v9 = vpop.xlane.xlu1 %2137 }
 0x30c   :  { %v2139_v39 = vcvt.f32.s32 %v2138_v9  ;;  %v2161_v9 = vcvt.s32.f32 %v2159_v38 }
 0x30e   :  { %v2142_v56 = vadd.s32 %v2141_v49, %v2139_v39  ;;  %v7286_v49 = vld [vmem:[#allocation61_spill] sm:$0xff]  ;;  %v7287_v39 = vld [vmem:[#allocation14_spill] sm:$0xff] }
 0x30f   :  { %vm1429_vm3 = vcmp.le.f32.partialorder %v7287_v39, %v7286_v49 }
 0x310   :  { %3601 = vst.msk [vmem:[%s6960_s3 + $0x100] sm:$0xff] %vm3568_vm15, %v2142_v56  ;;  %v7288_v56 = vld [vmem:[#allocation125_spill] sm:$0xff] }
 0x311   :  { %v1814_v35 = vand.u32 65535, %v7288_v56  ;;  %v1756_v56 = vcvt.s32.f32 %v1754_v13 }
 0x312   :  { %v1793_v2 = vpop.xlane.xlu0 %1792 }
 0x313   :  { %v1794_v52 = vcvt.f32.s32 %v1793_v2  ;;  %v5696_v37 = vpop.xlane.xlu1 %1938  ;;  %v1840_v2 = vcvt.f32.s32 %v5525_v43  ;;  %v1816_v16 = vcvt.s32.f32 %v1814_v35 }
 0x315   :  { %v1797_v53 = vadd.s32 %v1796_v36, %v1794_v52  ;;  %v1557_v52 = vsel %vm1429_vm3, %v4693_v61, 64  ;;  %v1841_v55 = vshll.u32 %v1840_v2, 16 }
 0x317   :  { %3578 = vst.msk [vmem:[%s6960_s3 + $0x48] sm:$0xff] %vm3568_vm15, %v1797_v53 }
 0x31a   :  { %v5707_v24 = vpop.xlane.xlu0 %2178 }
 0x31b   :  { %v1733_v18 = vpop.xlane.xlu1 %1732  ;;  %vm2180_vm14 = vcmp.eq.f32.partialorder %v5646_v44, %v5707_v24  ;;  %v1541_v44 = vsel %vm1413_vm0, %v4693_v61, 64 }
 0x31c   :  { %v1734_v10 = vcvt.f32.s32 %v1733_v18  ;;  %v2181_v15 = vsel %vm2180_vm14, %v2176_v54, inf  ;;  %v5732_v25 = vsel %vm1007_vm1, %v1541_v44, 2147483647  ;;  %v5746_v54 = vsel %vm1007_vm1, %v1557_v52, 2147483647 }
 0x31d   :  { %2182 = vmin.xlane.f32.xlu1 %v2181_v15  ;;  %v1965_v36 = vshra.s32 %v5732_v25, 16  ;;  %v7291_v15 = vld [vmem:[#allocation55_spill] sm:$0xff]  ;;  %v2205_v38 = vshra.s32 %v5746_v54, 16  ;;  %v1780_v44 = vcvt.f32.s32 %v5396_v41 }
 0x31e   :  { %v1737_v26 = vadd.s32 %v1736_v40, %v1734_v10  ;;  %v7290_v10 = vld [vmem:[#allocation145_spill] sm:$0xff] }
 0x31f   :  { %v5748_v40 = vcvt.s32.f32 %v1965_v36  ;;  %vm1420_vm5 = vcmp.le.f32.partialorder %v7290_v10, %v5523_v3  ;;  %v5766_v39 = vcvt.s32.f32 %v2205_v38  ;;  %v1781_v35 = vshll.u32 %v1780_v44, 16 }
 0x320   :  { %3574 = vst.msk [vmem:[%s6960_s3 + $0x28] sm:$0xff] %vm3568_vm15, %v1737_v26  ;;  %v7292_v26 = vld [vmem:[#allocation10_spill] sm:$0xff] }
 0x321   :  { %vm1428_vm6 = vcmp.le.f32.partialorder %v7292_v26, %v7291_v15 }
 0x322   :  { %v5723_v29 = vpop.xlane.xlu0 %2043  ;;  %v1556_v3 = vsel %vm1428_vm6, %v4693_v61, 64  ;;  %vm1895_vm6 = vcmp.eq.f32.partialorder %v5401_v47, %v5563_v50 }
 0x323   :  { %v5725_v7 = vpop.xlane.xlu1 %2163  ;;  %v5772_v52 = vsel %vm1007_vm1, %v1556_v3, 2147483647 }
 0x324   :  { %vm2165_vm2 = vcmp.eq.f32.partialorder %v5666_v21, %v5725_v7  ;;  %v7289_v21 = vld [vmem:[#allocation129_spill] sm:$0xff] }
 0x325   :  { %2028 = vmin.xlane.f32.xlu1 %v5727_v0  ;;  %v2166_v60 = vsel %vm2165_vm2, %v2161_v9, inf  ;;  %vm1820_vm4 = vcmp.eq.f32.partialorder %v7289_v21, %v5501_v27  ;;  %v1548_v9 = vsel %vm1420_vm5, %v4693_v61, 64  ;;  %v1765_v27 = vcvt.f32.s32 %v5389_v63 }
 0x326   :  { %2167 = vmin.xlane.f32.xlu2 %v2166_v60  ;;  %v1821_v18 = vsel %vm1820_vm4, %v1816_v16, inf  ;;  %v7294_v60 = vld [vmem:[#allocation105_spill] sm:$0xff]  ;;  %v5769_v2 = vsel %vm1007_vm1, %v1548_v9, 2147483647  ;;  %v7298_v9 = vld [vmem:[#allocation124_spill] sm:$0xff]  ;;  %vm1880_vm5 = vcmp.eq.f32.partialorder %v5375_v31, %v5558_v57 }
 0x327   :  { %vm1760_vm7 = vcmp.eq.f32.partialorder %v7294_v60, %v5389_v63  ;;  %v2070_v16 = vshra.s32 %v5769_v2, 16  ;;  %v1799_v3 = vand.u32 65535, %v7298_v9  ;;  %v7299_v60 = vld [vmem:[#allocation128_spill] sm:$0xff] }
 0x328   :  { %v1761_v41 = vsel %vm1760_vm7, %v1756_v56, inf  ;;  %vm1805_vm10 = vcmp.eq.f32.partialorder %v7299_v60, %v5497_v11  ;;  %v2204_v60 = vand.u32 65535, %v5746_v54 }
 0x32a   :  { %v1838_v53 = vpop.xlane.xlu0 %1837 }
 0x32b   :  { %v1839_v6 = vcvt.f32.s32 %v1838_v53  ;;  %v5743_v5 = vpop.xlane.xlu1 %1983  ;;  %v7295_v53 = vld [vmem:[#allocation110_spill] sm:$0xff] }
 0x32c   :  { %vm1416_vm8 = vcmp.le.f32.partialorder %v7295_v53, %v5447_v20  ;;  %v7296_v20 = vld [vmem:[#allocation149_spill] sm:$0xff] }
 0x32d   :  { %v1842_v43 = vadd.s32 %v1841_v55, %v1839_v6  ;;  %1822 = vmin.xlane.f32.xlu1 %v1821_v18  ;;  %v2190_v55 = vshra.s32 %v5772_v52, 16  ;;  %v1544_v6 = vsel %vm1416_vm8, %v4693_v61, 64  ;;  %v5784_v18 = vcvt.s32.f32 %v2070_v16 }
 0x32e   :  { %1968 = vmin.xlane.f32.xlu2 %v5748_v40  ;;  %v5789_v10 = vsel %vm1007_vm1, %v1544_v6, 2147483647  ;;  %v1859_v15 = vand.u32 65535, %v7296_v20  ;;  %v2170_v16 = vcvt.f32.s32 %v5725_v7  ;;  %v7300_v7 = vld [vmem:[#allocation138_spill] sm:$0xff] }
 0x32f   :  { %3581 = vst.msk [vmem:[%s6960_s3 + $0x60] sm:$0xff] %vm3568_vm15, %v1842_v43  ;;  %v5786_v43 = vcvt.s32.f32 %v2190_v55  ;;  %v2010_v26 = vshra.s32 %v5789_v10, 16  ;;  %vm1419_vm11 = vcmp.le.f32.partialorder %v7300_v7, %v5515_v48 }
 0x330   :  { %v1861_v13 = vcvt.s32.f32 %v1859_v15  ;;  %v2171_v20 = vshll.u32 %v2170_v16, 16  ;;  %v2189_v16 = vand.u32 65535, %v5772_v52  ;;  %v7301_v52 = vld [vmem:[#allocation70_spill] sm:$0xff] }
 0x331   :  { %v5797_v44 = vcvt.s32.f32 %v2010_v26 }
 0x332   :  { %v1866_v38 = vsel %vm1865_vm9, %v1861_v13, inf  ;;  %v1826_v13 = vshll.u32 %v1825_v33, 16  ;;  %v7302_v33 = vld [vmem:[#allocation20_spill] sm:$0xff] }
 0x333   :  { %v1778_v49 = vpop.xlane.xlu1 %1777  ;;  %vm1431_vm0 = vcmp.le.f32.partialorder %v7302_v33, %v7301_v52 }
 0x334   :  { %v1779_v36 = vcvt.f32.s32 %v1778_v49  ;;  %v1801_v49 = vcvt.s32.f32 %v1799_v3  ;;  %v1559_v7 = vsel %vm1431_vm0, %v4693_v61, 64 }
 0x335   :  { %2208 = vmin.xlane.f32.xlu1 %v5766_v39 }
 0x336   :  { %v1782_v21 = vadd.s32 %v1781_v35, %v1779_v36  ;;  %1762 = vmin.xlane.f32.xlu2 %v1761_v41  ;;  %v1806_v56 = vsel %vm1805_vm10, %v1801_v49, inf  ;;  %v2185_v35 = vcvt.f32.s32 %v5707_v24  ;;  %v1547_v49 = vsel %vm1419_vm11, %v4693_v61, 64 }
 0x337   :  { %v5832_v48 = vsel %vm1007_vm1, %v1547_v49, 2147483647 }
 0x338   :  { %3577 = vst.msk [vmem:[%s6960_s3 + $0x40] sm:$0xff] %vm3568_vm15, %v1782_v21  ;;  %v2186_v41 = vshll.u32 %v2185_v35, 16  ;;  %v2206_v35 = vcvt.s32.f32 %v2204_v60  ;;  %v2055_v63 = vshra.s32 %v5832_v48, 16 }
 0x33d   :  { %2073 = vmin.xlane.f32.xlu1 %v5784_v18 }
 0x33e   :  { %2193 = vmin.xlane.f32.xlu2 %v5786_v43 }
 0x345   :  { %1867 = vmin.xlane.f32.xlu1 %v1866_v38 }
 0x346   :  { %2013 = vmin.xlane.f32.xlu2 %v5797_v44 }
 0x34e   :  { %1807 = vmin.xlane.f32.xlu2 %v1806_v56 }
 0x390   :  { %v2183_v36 = vpop.xlane.xlu1 %2182 }
 0x391   :  { %v2184_v21 = vcvt.f32.s32 %v2183_v36 }
 0x393   :  { %v2187_v53 = vadd.s32 %v2186_v41, %v2184_v21  ;;  %v1766_v41 = vshll.u32 %v1765_v27, 16 }
 0x395   :  { %3604 = vst.msk [vmem:[%s6960_s3 + $0x118] sm:$0xff] %vm3568_vm15, %v2187_v53 }
 0x398   :  { %v5809_v55 = vpop.xlane.xlu1 %2028 }
 0x399   :  { %v2168_v6 = vpop.xlane.xlu2 %2167 }
 0x39a   :  { %v2169_v15 = vcvt.f32.s32 %v2168_v6 }
 0x39c   :  { %v2172_v26 = vadd.s32 %v2171_v20, %v2169_v15  ;;  %v5847_v15 = vcvt.s32.f32 %v2055_v63  ;;  %v7306_v63 = vld [vmem:[#allocation63_spill] sm:$0xff] }
 0x39e   :  { %3603 = vst.msk [vmem:[%s6960_s3 + $0x110] sm:$0xff] %vm3568_vm15, %v2172_v26  ;;  %v2191_v26 = vcvt.s32.f32 %v2189_v16  ;;  %v7307_v16 = vld [vmem:[#allocation16_spill] sm:$0xff] }
 0x39f   :  { %vm1430_vm4 = vcmp.le.f32.partialorder %v7307_v16, %v7306_v63 }
 0x3a0   :  { %v1823_v24 = vpop.xlane.xlu1 %1822  ;;  %v1558_v33 = vsel %vm1430_vm4, %v4693_v61, 64 }
 0x3a1   :  { %v1824_v38 = vcvt.f32.s32 %v1823_v24  ;;  %v5816_v9 = vpop.xlane.xlu2 %1968  ;;  %v7303_v24 = vld [vmem:[#allocation148_spill] sm:$0xff] }
 0x3a3   :  { %v1827_v3 = vadd.s32 %v1826_v13, %v1824_v38  ;;  %v1844_v13 = vand.u32 65535, %v7303_v24  ;;  %v1870_v38 = vcvt.f32.s32 %v5533_v30  ;;  %v7305_v30 = vld [vmem:[#allocation159_spill] sm:$0xff] }
 0x3a4   :  { %vm1422_vm3 = vcmp.le.f32.partialorder %v7305_v30, %v5545_v32 }
 0x3a5   :  { %3580 = vst.msk [vmem:[%s6960_s3 + $0x58] sm:$0xff] %vm3568_vm15, %v1827_v3  ;;  %v1846_v27 = vcvt.s32.f32 %v1844_v13  ;;  %v1871_v49 = vshll.u32 %v1870_v38, 16  ;;  %v1550_v52 = vsel %vm1422_vm3, %v4693_v61, 64 }
 0x3a8   :  { %v5827_v56 = vpop.xlane.xlu1 %2208 }
 0x3a9   :  { %v1763_v36 = vpop.xlane.xlu2 %1762  ;;  %vm2210_vm12 = vcmp.eq.f32.partialorder %v5766_v39, %v5827_v56  ;;  %v1549_v39 = vsel %vm1421_vm13, %v4693_v61, 64  ;;  %v2215_v30 = vcvt.f32.s32 %v5827_v56 }
 0x3aa   :  { %v1764_v54 = vcvt.f32.s32 %v1763_v36  ;;  %v2211_v21 = vsel %vm2210_vm12, %v2206_v35, inf  ;;  %v5852_v12 = vsel %vm1007_vm1, %v1549_v39, 2147483647  ;;  %v1874_v39 = vand.u32 65535, %v5357_v1 }
 0x3ab   :  { %2212 = vmin.xlane.f32.xlu2 %v2211_v21  ;;  %v2085_v3 = vshra.s32 %v5852_v12, 16  ;;  %v5884_v1 = vsel %vm1007_vm1, %v1550_v52, 2147483647  ;;  %v2216_v16 = vshll.u32 %v2215_v30, 16 }
 0x3ac   :  { %v1767_v53 = vadd.s32 %v1766_v41, %v1764_v54  ;;  %v2233_v41 = vsel %vm1007_vm1, %v1559_v7, 2147483647  ;;  %v1876_v13 = vcvt.s32.f32 %v1874_v39  ;;  %v2218_v7 = vsel %vm1007_vm1, %v1558_v33, 2147483647 }
 0x3ad   :  { %v5866_v21 = vcvt.s32.f32 %v2085_v3  ;;  %v2220_v31 = vshra.s32 %v2218_v7, 16 }
 0x3ae   :  { %3576 = vst.msk [vmem:[%s6960_s3 + $0x38] sm:$0xff] %vm3568_vm15, %v1767_v53 }
 0x3b0   :  { %v5843_v6 = vpop.xlane.xlu1 %2073 }
 0x3b1   :  { %v5845_v20 = vpop.xlane.xlu2 %2193 }
 0x3b2   :  { %vm2195_vm14 = vcmp.eq.f32.partialorder %v5786_v43, %v5845_v20  ;;  %v7304_v43 = vld [vmem:[#allocation152_spill] sm:$0xff] }
 0x3b3   :  { %2058 = vmin.xlane.f32.xlu2 %v5847_v15  ;;  %v2196_v22 = vsel %vm2195_vm14, %v2191_v26, inf  ;;  %vm1850_vm2 = vcmp.eq.f32.partialorder %v7304_v43, %v5529_v45  ;;  %v2235_v26 = vshra.s32 %v2233_v41, 16  ;;  %v1881_v43 = vsel %vm1880_vm5, %v1876_v13, inf }
 0x3b4   :  { %2197 = vmin.xlane.f32.xlu0 %v2196_v22  ;;  %v1851_v54 = vsel %vm1850_vm2, %v1846_v27, inf  ;;  %v1810_v22 = vcvt.f32.s32 %v5497_v11  ;;  %v1855_v13 = vcvt.f32.s32 %v5529_v45  ;;  %vm1940_vm5 = vcmp.eq.f32.partialorder %v5628_v62, %v5696_v37  ;;  %v7324_v62 = vld [vmem:[#allocation104_spill] sm:$0xff] }
 0x3b5   :  { %v2237_v24 = vcvt.s32.f32 %v2235_v26 }
 0x3b6   :  { %v1811_v38 = vshll.u32 %v1810_v22, 16 }
 0x3b8   :  { %v1868_v60 = vpop.xlane.xlu1 %1867 }
 0x3b9   :  { %v1869_v35 = vcvt.f32.s32 %v1868_v60  ;;  %v5863_v36 = vpop.xlane.xlu2 %2013  ;;  %v2100_v60 = vshra.s32 %v5884_v1, 16 }
 0x3bb   :  { %v1872_v53 = vadd.s32 %v1871_v49, %v1869_v35  ;;  %1852 = vmin.xlane.f32.xlu2 %v1851_v54  ;;  %v5892_v27 = vcvt.s32.f32 %v2100_v60  ;;  %v2222_v49 = vcvt.s32.f32 %v2220_v31  ;;  %v1889_v35 = vand.u32 65535, %v5382_v58 }
 0x3bc   :  { %2088 = vmin.xlane.f32.xlu0 %v5866_v21  ;;  %v2200_v58 = vcvt.f32.s32 %v5845_v20  ;;  %v2234_v20 = vand.u32 65535, %v2233_v41  ;;  %v1885_v60 = vcvt.f32.s32 %v5558_v57  ;;  %v1919_v41 = vand.u32 65535, %v5457_v59 }
 0x3bd   :  { %3583 = vst.msk [vmem:[%s6960_s3 + $0x70] sm:$0xff] %vm3568_vm15, %v1872_v53  ;;  %v1891_v54 = vcvt.s32.f32 %v1889_v35 }
 0x3be   :  { %v2201_v47 = vshll.u32 %v2200_v58, 16  ;;  %v2236_v31 = vcvt.s32.f32 %v2234_v20  ;;  %v7311_v58 = vld [vmem:[#allocation169_spill] sm:$0xff] }
 0x3bf   :  { %v1896_v53 = vsel %vm1895_vm6, %v1891_v54, inf  ;;  %v1886_v54 = vshll.u32 %v1885_v60, 16 }
 0x3c1   :  { %v1808_v32 = vpop.xlane.xlu2 %1807 }
 0x3c2   :  { %v1809_v3 = vcvt.f32.s32 %v1808_v32 }
 0x3c3   :  { %2238 = vmin.xlane.f32.xlu2 %v2237_v24 }
 0x3c4   :  { %v1812_v11 = vadd.s32 %v1811_v38, %v1809_v3  ;;  %1882 = vmin.xlane.f32.xlu0 %v1881_v43  ;;  %v1856_v38 = vshll.u32 %v1855_v13, 16 }
 0x3c6   :  { %3579 = vst.msk [vmem:[%s6960_s3 + $0x50] sm:$0xff] %vm3568_vm15, %v1812_v11 }
 0x3cb   :  { %2103 = vmin.xlane.f32.xlu2 %v5892_v27 }
 0x3cc   :  { %2223 = vmin.xlane.f32.xlu0 %v2222_v49 }
 0x3d3   :  { %1897 = vmin.xlane.f32.xlu2 %v1896_v53 }
 0x41e   :  { %v2213_v63 = vpop.xlane.xlu2 %2212 }
 0x41f   :  { %v2214_v39 = vcvt.f32.s32 %v2213_v63  ;;  %v7308_v63 = vld [vmem:[#allocation80_spill] sm:$0xff] }
 0x421   :  { %v2217_v26 = vadd.s32 %v2216_v16, %v2214_v39  ;;  %v7309_v16 = vld [vmem:[#allocation26_spill] sm:$0xff] }
 0x422   :  { %vm1433_vm8 = vcmp.le.f32.partialorder %v7309_v16, %v7308_v63  ;;  %v7314_v16 = vld [vmem:[#allocation23_spill] sm:$0xff] }
 0x423   :  { %3606 = vst.msk [vmem:[%s6960_s3 + $0x128] sm:$0xff] %vm3568_vm15, %v2217_v26  ;;  %v7310_v26 = vld [vmem:[#allocation204_spill] sm:$0xff]  ;;  %v1561_v57 = vsel %vm1433_vm8, %v4693_v61, 64 }
 0x424   :  { %vm1423_vm9 = vcmp.le.f32.partialorder %v7311_v58, %v7310_v26  ;;  %v7316_v26 = vld [vmem:[#allocation209_spill] sm:$0xff]  ;;  %v7317_v58 = vld [vmem:[#allocation178_spill] sm:$0xff] }
 0x425   :  { %vm1910_vm13 = vcmp.eq.f32.partialorder %v7317_v58, %v7316_v26 }
 0x426   :  { %v5904_v22 = vpop.xlane.xlu2 %2058 }
 0x427   :  { %v2198_v52 = vpop.xlane.xlu0 %2197 }
 0x428   :  { %v2199_v33 = vcvt.f32.s32 %v2198_v52  ;;  %v2219_v52 = vand.u32 65535, %v2218_v7 }
 0x42a   :  { %v2202_v32 = vadd.s32 %v2201_v47, %v2199_v33  ;;  %v1551_v47 = vsel %vm1423_vm9, %v4693_v61, 64  ;;  %v2221_v13 = vcvt.s32.f32 %v2219_v52 }
 0x42c   :  { %3605 = vst.msk [vmem:[%s6960_s3 + $0x120] sm:$0xff] %vm3568_vm15, %v2202_v32  ;;  %v1921_v32 = vcvt.s32.f32 %v1919_v41 }
 0x42e   :  { %v1853_v56 = vpop.xlane.xlu2 %1852 }
 0x42f   :  { %v1854_v3 = vcvt.f32.s32 %v1853_v56  ;;  %v5911_v43 = vpop.xlane.xlu0 %2088  ;;  %v2263_v56 = vsel %vm1007_vm1, %v1561_v57, 2147483647 }
 0x430   :  { %v2265_v20 = vshra.s32 %v2263_v56, 16 }
 0x431   :  { %v1857_v11 = vadd.s32 %v1856_v38, %v1854_v3  ;;  %v5935_v38 = vsel %vm1007_vm1, %v1551_v47, 2147483647 }
 0x432   :  { %v2115_v60 = vshra.s32 %v5935_v38, 16 }
 0x433   :  { %3582 = vst.msk [vmem:[%s6960_s3 + $0x68] sm:$0xff] %vm3568_vm15, %v1857_v11  ;;  %v1900_v11 = vcvt.f32.s32 %v5563_v50  ;;  %v7315_v50 = vld [vmem:[#allocation173_spill] sm:$0xff] }
 0x436   :  { %v2239_v45 = vpop.xlane.xlu2 %2238 }
 0x437   :  { %v1883_v35 = vpop.xlane.xlu0 %1882  ;;  %vm2240_vm7 = vcmp.eq.f32.partialorder %v2237_v24, %v2239_v45  ;;  %v7312_v24 = vld [vmem:[#allocation184_spill] sm:$0xff] }
 0x438   :  { %v1884_v53 = vcvt.f32.s32 %v1883_v35  ;;  %v2241_v30 = vsel %vm2240_vm7, %v2236_v31, inf  ;;  %vm1925_vm10 = vcmp.eq.f32.partialorder %v7312_v24, %v5603_v28  ;;  %v1901_v35 = vshll.u32 %v1900_v11, 16 }
 0x439   :  { %2242 = vmin.xlane.f32.xlu0 %v2241_v30  ;;  %v1926_v7 = vsel %vm1925_vm10, %v1921_v32, inf  ;;  %v5939_v30 = vcvt.s32.f32 %v2115_v60  ;;  %v1930_v60 = vcvt.f32.s32 %v5603_v28  ;;  %vm1985_vm10 = vcmp.eq.f32.partialorder %v5677_v4, %v5743_v5 }
 0x43a   :  { %v1887_v39 = vadd.s32 %v1886_v54, %v1884_v53  ;;  %v2267_v53 = vcvt.s32.f32 %v2265_v20 }
 0x43c   :  { %3584 = vst.msk [vmem:[%s6960_s3 + $0x78] sm:$0xff] %vm3568_vm15, %v1887_v39  ;;  %v1904_v39 = vand.u32 65535, %v7315_v50 }
 0x43e   :  { %v5931_v33 = vpop.xlane.xlu2 %2103  ;;  %v1906_v52 = vcvt.s32.f32 %v1904_v39 }
 0x43f   :  { %v2224_v59 = vpop.xlane.xlu0 %2223 }
 0x440   :  { %vm2225_vm11 = vcmp.eq.f32.partialorder %v2222_v49, %v2224_v59  ;;  %v7313_v49 = vld [vmem:[#allocation77_spill] sm:$0xff]  ;;  %v1911_v24 = vsel %vm1910_vm13, %v1906_v52, inf }
 0x441   :  { %1927 = vmin.xlane.f32.xlu0 %v1926_v7  ;;  %v2226_v3 = vsel %vm2225_vm11, %v2221_v13, inf  ;;  %vm1432_vm12 = vcmp.le.f32.partialorder %v7314_v16, %v7313_v49  ;;  %v2245_v13 = vcvt.f32.s32 %v2239_v45  ;;  %vm1970_vm11 = vcmp.eq.f32.partialorder %v5748_v40, %v5816_v9 }
 0x442   :  { %2227 = vmin.xlane.f32.xlu1 %v2226_v3  ;;  %v1560_v41 = vsel %vm1432_vm12, %v4693_v61, 64 }
 0x443   :  { %v2248_v57 = vsel %vm1007_vm1, %v1560_v41, 2147483647  ;;  %v2246_v3 = vshll.u32 %v2245_v13, 16  ;;  %v2264_v41 = vand.u32 65535, %v2263_v56  ;;  %v7320_v56 = vld [vmem:[#allocation185_spill] sm:$0xff] }
 0x444   :  { %v2250_v47 = vshra.s32 %v2248_v57, 16  ;;  %v1949_v13 = vand.u32 65535, %v7320_v56 }
 0x446   :  { %v1898_v31 = vpop.xlane.xlu2 %1897  ;;  %v2252_v32 = vcvt.s32.f32 %v2250_v47  ;;  %v7319_v47 = vld [vmem:[#allocation32_spill] sm:$0xff] }
 0x447   :  { %v1899_v54 = vcvt.f32.s32 %v1898_v31  ;;  %v2230_v31 = vcvt.f32.s32 %v2224_v59  ;;  %v2266_v59 = vcvt.s32.f32 %v2264_v41 }
 0x449   :  { %v1902_v63 = vadd.s32 %v1901_v35, %v1899_v54  ;;  %2268 = vmin.xlane.f32.xlu0 %v2267_v53  ;;  %v1931_v54 = vshll.u32 %v1930_v60, 16  ;;  %v2231_v16 = vshll.u32 %v2230_v31, 16 }
 0x44a   :  { %2118 = vmin.xlane.f32.xlu1 %v5939_v30 }
 0x44b   :  { %3585 = vst.msk [vmem:[%s6960_s3 + $0x80] sm:$0xff] %vm3568_vm15, %v1902_v63 }
 0x452   :  { %1912 = vmin.xlane.f32.xlu1 %v1911_v24  ;;  %v7318_v24 = vld [vmem:[#allocation95_spill] sm:$0xff] }
 0x453   :  { %vm1435_vm0 = vcmp.le.f32.partialorder %v7319_v47, %v7318_v24 }
 0x45a   :  { %2253 = vmin.xlane.f32.xlu1 %v2252_v32 }
 0x4ac   :  { %v2243_v7 = vpop.xlane.xlu0 %2242 }
 0x4ad   :  { %v2244_v11 = vcvt.f32.s32 %v2243_v7  ;;  %v1915_v7 = vcvt.f32.s32 %v7316_v26 }
 0x4af   :  { %v2247_v20 = vadd.s32 %v2246_v3, %v2244_v11  ;;  %v1563_v3 = vsel %vm1435_vm0, %v4693_v61, 64  ;;  %v7321_v11 = vld [vmem:[#allocation187_spill] sm:$0xff] }
 0x4b0   :  { %vm1955_vm2 = vcmp.eq.f32.partialorder %v7321_v11, %v5623_v14  ;;  %v2293_v31 = vsel %vm1007_vm1, %v1563_v3, 2147483647 }
 0x4b1   :  { %3608 = vst.msk [vmem:[%s6960_s3 + $0x138] sm:$0xff] %vm3568_vm15, %v2247_v20  ;;  %v1951_v20 = vcvt.s32.f32 %v1949_v13 }
 0x4b4   :  { %v1928_v35 = vpop.xlane.xlu0 %1927 }
 0x4b5   :  { %v1929_v63 = vcvt.f32.s32 %v1928_v35  ;;  %v2228_v49 = vpop.xlane.xlu1 %2227  ;;  %v1916_v35 = vshll.u32 %v1915_v7, 16 }
 0x4b6   :  { %v2229_v50 = vcvt.f32.s32 %v2228_v49  ;;  %v7322_v49 = vld [vmem:[#allocation86_spill] sm:$0xff] }
 0x4b7   :  { %v1932_v39 = vadd.s32 %v1931_v54, %v1929_v63  ;;  %v1956_v54 = vsel %vm1955_vm2, %v1951_v20, inf }
 0x4b8   :  { %v2232_v45 = vadd.s32 %v2231_v16, %v2229_v50  ;;  %v7323_v16 = vld [vmem:[#allocation29_spill] sm:$0xff]  ;;  %v2295_v50 = vshra.s32 %v2293_v31, 16 }
 0x4b9   :  { %3587 = vst.msk [vmem:[%s6960_s3 + $0x90] sm:$0xff] %vm3568_vm15, %v1932_v39  ;;  %vm1434_vm3 = vcmp.le.f32.partialorder %v7323_v16, %v7322_v49  ;;  %v2249_v39 = vand.u32 65535, %v2248_v57  ;;  %v1934_v57 = vand.u32 65535, %v5612_v46  ;;  %v7325_v49 = vld [vmem:[#allocation43_spill] sm:$0xff]  ;;  %v2294_v16 = vand.u32 65535, %v2293_v31 }
 0x4ba   :  { %3607 = vst.msk [vmem:[%s6960_s3 + $0x130] sm:$0xff] %vm3568_vm15, %v2232_v45  ;;  %v1562_v26 = vsel %vm1434_vm3, %v4693_v61, 64  ;;  %v2297_v41 = vcvt.s32.f32 %v2295_v50  ;;  %vm1437_vm6 = vcmp.le.f32.partialorder %v7325_v49, %v7324_v62  ;;  %vm2000_vm3 = vcmp.eq.f32.partialorder %v5607_v8, %v5689_v23 }
 0x4bb   :  { %v1936_v13 = vcvt.s32.f32 %v1934_v57 }
 0x4bc   :  { %v2269_v28 = vpop.xlane.xlu0 %2268 }
 0x4bd   :  { %v5966_v58 = vpop.xlane.xlu1 %2118  ;;  %vm2270_vm14 = vcmp.eq.f32.partialorder %v2267_v53, %v2269_v28  ;;  %v1941_v7 = vsel %vm1940_vm5, %v1936_v13, inf  ;;  %v2275_v3 = vcvt.f32.s32 %v2269_v28 }
 0x4be   :  { %v2271_v52 = vsel %vm2270_vm14, %v2266_v59, inf  ;;  %v2251_v59 = vcvt.s32.f32 %v2249_v39  ;;  %v2296_v39 = vcvt.s32.f32 %v2294_v16  ;;  %vm2015_vm14 = vcmp.eq.f32.partialorder %v5797_v44, %v5863_v36 }
 0x4bf   :  { %2272 = vmin.xlane.f32.xlu1 %v2271_v52  ;;  %v2278_v52 = vsel %vm1007_vm1, %v1562_v26, 2147483647  ;;  %v2276_v20 = vshll.u32 %v2275_v3, 16 }
 0x4c0   :  { %v2280_v47 = vshra.s32 %v2278_v52, 16 }
 0x4c2   :  { %v2282_v56 = vcvt.s32.f32 %v2280_v47 }
 0x4c5   :  { %v1913_v60 = vpop.xlane.xlu1 %1912 }
 0x4c6   :  { %v1914_v53 = vcvt.f32.s32 %v1913_v60 }
 0x4c7   :  { %1957 = vmin.xlane.f32.xlu1 %v1956_v54 }
 0x4c8   :  { %v1917_v63 = vadd.s32 %v1916_v35, %v1914_v53  ;;  %v1960_v35 = vcvt.f32.s32 %v5623_v14  ;;  %v1565_v14 = vsel %vm1437_vm6, %v4693_v61, 64  ;;  %vm2045_vm6 = vcmp.eq.f32.partialorder %v5664_v51, %v5723_v29 }
 0x4ca   :  { %3586 = vst.msk [vmem:[%s6960_s3 + $0x88] sm:$0xff] %vm3568_vm15, %v1917_v63  ;;  %v1961_v46 = vshll.u32 %v1960_v35, 16  ;;  %v1964_v35 = vand.u32 65535, %v5732_v25 }
 0x4cd   :  { %v2254_v45 = vpop.xlane.xlu1 %2253 }
 0x4ce   :  { %vm2255_vm4 = vcmp.eq.f32.partialorder %v2252_v32, %v2254_v45  ;;  %v2260_v28 = vcvt.f32.s32 %v2254_v45 }
 0x4cf   :  { %2298 = vmin.xlane.f32.xlu1 %v2297_v41  ;;  %v2256_v24 = vsel %vm2255_vm4, %v2251_v59, inf  ;;  %v2323_v59 = vsel %vm1007_vm1, %v1565_v14, 2147483647 }
 0x4d0   :  { %2257 = vmin.xlane.f32.xlu2 %v2256_v24  ;;  %v2261_v24 = vshll.u32 %v2260_v28, 16  ;;  %v2325_v31 = vshra.s32 %v2323_v59, 16 }
 0x4d2   :  { %v2327_v3 = vcvt.s32.f32 %v2325_v31 }
 0x4d8   :  { %2283 = vmin.xlane.f32.xlu2 %v2282_v56 }
 0x4e0   :  { %1942 = vmin.xlane.f32.xlu2 %v1941_v7  ;;  %v2279_v7 = vand.u32 65535, %v2278_v52  ;;  %v1945_v52 = vcvt.f32.s32 %v5696_v37 }
 0x532   :  { %v2273_v11 = vpop.xlane.xlu1 %2272 }
 0x533   :  { %v2274_v32 = vcvt.f32.s32 %v2273_v11  ;;  %v2281_v11 = vcvt.s32.f32 %v2279_v7 }
 0x535   :  { %v2277_v60 = vadd.s32 %v2276_v20, %v2274_v32  ;;  %v1979_v20 = vand.u32 65535, %v5669_v17  ;;  %v7326_v32 = vld [vmem:[#allocation98_spill] sm:$0xff] }
 0x537   :  { %3610 = vst.msk [vmem:[%s6960_s3 + $0x148] sm:$0xff] %vm3568_vm15, %v2277_v60  ;;  %v7327_v60 = vld [vmem:[#allocation36_spill] sm:$0xff] }
 0x538   :  { %vm1436_vm9 = vcmp.le.f32.partialorder %v7327_v60, %v7326_v32  ;;  %v1990_v60 = vcvt.f32.s32 %v5743_v5 }
 0x53a   :  { %v1958_v53 = vpop.xlane.xlu1 %1957 }
 0x53b   :  { %v1959_v54 = vcvt.f32.s32 %v1958_v53  ;;  %v1564_v53 = vsel %vm1436_vm9, %v4693_v61, 64  ;;  %vm2030_vm9 = vcmp.eq.f32.partialorder %v5727_v0, %v5809_v55  ;;  %v7336_v0 = vld [vmem:[#allocation147_spill] sm:$0xff] }
 0x53c   :  { %v2308_v49 = vsel %vm1007_vm1, %v1564_v53, 2147483647  ;;  %v1991_v53 = vshll.u32 %v1990_v60, 16 }
 0x53d   :  { %v1962_v63 = vadd.s32 %v1961_v46, %v1959_v54  ;;  %v1981_v46 = vcvt.s32.f32 %v1979_v20  ;;  %v1966_v54 = vcvt.s32.f32 %v1964_v35  ;;  %v2310_v4 = vshra.s32 %v2308_v49, 16  ;;  %v7329_v20 = vld [vmem:[#allocation51_spill] sm:$0xff] }
 0x53e   :  { %v1975_v35 = vcvt.f32.s32 %v5816_v9  ;;  %v2309_v44 = vand.u32 65535, %v2308_v49 }
 0x53f   :  { %3589 = vst.msk [vmem:[%s6960_s3 + $0xa0] sm:$0xff] %vm3568_vm15, %v1962_v63  ;;  %v1946_v63 = vshll.u32 %v1945_v52, 16  ;;  %v1986_v62 = vsel %vm1985_vm10, %v1981_v46, inf  ;;  %v1971_v25 = vsel %vm1970_vm11, %v1966_v54, inf  ;;  %v2312_v37 = vcvt.s32.f32 %v2310_v4 }
 0x540   :  { %v1976_v5 = vshll.u32 %v1975_v35, 16  ;;  %v2311_v4 = vcvt.s32.f32 %v2309_v44 }
 0x542   :  { %v2299_v50 = vpop.xlane.xlu1 %2298 }
 0x543   :  { %v2258_v26 = vpop.xlane.xlu2 %2257  ;;  %vm2300_vm7 = vcmp.eq.f32.partialorder %v2297_v41, %v2299_v50  ;;  %v2305_v40 = vcvt.f32.s32 %v2299_v50  ;;  %v7328_v50 = vld [vmem:[#allocation118_spill] sm:$0xff] }
 0x544   :  { %v2259_v47 = vcvt.f32.s32 %v2258_v26  ;;  %v2301_v57 = vsel %vm2300_vm7, %v2296_v39, inf  ;;  %vm1439_vm13 = vcmp.le.f32.partialorder %v7329_v20, %v7328_v50 }
 0x545   :  { %2302 = vmin.xlane.f32.xlu2 %v2301_v57  ;;  %v2306_v14 = vshll.u32 %v2305_v40, 16 }
 0x546   :  { %v2262_v13 = vadd.s32 %v2261_v24, %v2259_v47  ;;  %v2324_v24 = vand.u32 65535, %v2323_v59  ;;  %v2009_v59 = vand.u32 65535, %v5789_v10 }
 0x548   :  { %3609 = vst.msk [vmem:[%s6960_s3 + $0x140] sm:$0xff] %vm3568_vm15, %v2262_v13  ;;  %v2326_v13 = vcvt.s32.f32 %v2324_v24  ;;  %v2011_v52 = vcvt.s32.f32 %v2009_v59 }
 0x54a   :  { %v2016_v9 = vsel %vm2015_vm14, %v2011_v52, inf  ;;  %vm2075_vm14 = vcmp.eq.f32.partialorder %v5784_v18, %v5843_v6 }
 0x54b   :  { %v2284_v45 = vpop.xlane.xlu2 %2283 }
 0x54c   :  { %vm2285_vm8 = vcmp.eq.f32.partialorder %v2282_v56, %v2284_v45  ;;  %v2290_v47 = vcvt.f32.s32 %v2284_v45  ;;  %v1567_v45 = vsel %vm1439_vm13, %v4693_v61, 64 }
 0x54d   :  { %2328 = vmin.xlane.f32.xlu2 %v2327_v3  ;;  %v2286_v41 = vsel %vm2285_vm8, %v2281_v11, inf  ;;  %v2353_v10 = vsel %vm1007_vm1, %v1567_v45, 2147483647 }
 0x54e   :  { %2287 = vmin.xlane.f32.xlu0 %v2286_v41  ;;  %v2291_v7 = vshll.u32 %v2290_v47, 16  ;;  %v2354_v60 = vand.u32 65535, %v2353_v10 }
 0x550   :  { %v2356_v45 = vcvt.s32.f32 %v2354_v60 }
 0x553   :  { %v1943_v56 = vpop.xlane.xlu2 %1942 }
 0x554   :  { %v1944_v17 = vcvt.f32.s32 %v1943_v56 }
 0x555   :  { %1987 = vmin.xlane.f32.xlu2 %v1986_v62  ;;  %v2355_v62 = vshra.s32 %v2353_v10, 16  ;;  %v2039_v10 = vand.u32 65535, %v5649_v42 }
 0x556   :  { %v1947_v16 = vadd.s32 %v1946_v63, %v1944_v17  ;;  %1972 = vmin.xlane.f32.xlu0 %v1971_v25 }
 0x558   :  { %3588 = vst.msk [vmem:[%s6960_s3 + $0x98] sm:$0xff] %vm3568_vm15, %v1947_v16  ;;  %v2357_v16 = vcvt.s32.f32 %v2355_v62 }
 0x55e   :  { %2313 = vmin.xlane.f32.xlu0 %v2312_v37 }
 0x5b8   :  { %v2303_v28 = vpop.xlane.xlu2 %2302 }
 0x5b9   :  { %v2304_v39 = vcvt.f32.s32 %v2303_v28  ;;  %v7330_v28 = vld [vmem:[#allocation114_spill] sm:$0xff] }
 0x5bb   :  { %v2307_v26 = vadd.s32 %v2306_v14, %v2304_v39  ;;  %v7331_v14 = vld [vmem:[#allocation47_spill] sm:$0xff]  ;;  %v1994_v39 = vand.u32 65535, %v5588_v34  ;;  %v2020_v34 = vcvt.f32.s32 %v5863_v36 }
 0x5bc   :  { %vm1438_vm2 = vcmp.le.f32.partialorder %v7331_v14, %v7330_v28 }
 0x5bd   :  { %3612 = vst.msk [vmem:[%s6960_s3 + $0x158] sm:$0xff] %vm3568_vm15, %v2307_v26  ;;  %v1566_v26 = vsel %vm1438_vm2, %v4693_v61, 64  ;;  %v1996_v49 = vcvt.s32.f32 %v1994_v39  ;;  %v2021_v20 = vshll.u32 %v2020_v34, 16 }
 0x5be   :  { %v2338_v24 = vsel %vm1007_vm1, %v1566_v26, 2147483647 }
 0x5bf   :  { %v2001_v47 = vsel %vm2000_vm3, %v1996_v49, inf  ;;  %v2339_v28 = vand.u32 65535, %v2338_v24 }
 0x5c0   :  { %v2329_v57 = vpop.xlane.xlu2 %2328 }
 0x5c1   :  { %v2288_v31 = vpop.xlane.xlu0 %2287  ;;  %vm2330_vm12 = vcmp.eq.f32.partialorder %v2327_v3, %v2329_v57  ;;  %v2341_v26 = vcvt.s32.f32 %v2339_v28 }
 0x5c2   :  { %v2289_v11 = vcvt.f32.s32 %v2288_v31  ;;  %v2331_v41 = vsel %vm2330_vm12, %v2326_v13, inf  ;;  %v2340_v13 = vshra.s32 %v2338_v24, 16  ;;  %v2335_v31 = vcvt.f32.s32 %v2329_v57 }
 0x5c3   :  { %2332 = vmin.xlane.f32.xlu0 %v2331_v41  ;;  %v2024_v24 = vand.u32 65535, %v5712_v19 }
 0x5c4   :  { %v2292_v32 = vadd.s32 %v2291_v7, %v2289_v11  ;;  %v2336_v11 = vshll.u32 %v2335_v31, 16 }
 0x5c6   :  { %3611 = vst.msk [vmem:[%s6960_s3 + $0x150] sm:$0xff] %vm3568_vm15, %v2292_v32 }
 0x5c8   :  { %v1988_v3 = vpop.xlane.xlu2 %1987 }
 0x5c9   :  { %v1989_v46 = vcvt.f32.s32 %v1988_v3  ;;  %v1973_v56 = vpop.xlane.xlu0 %1972 }
 0x5ca   :  { %v1974_v54 = vcvt.f32.s32 %v1973_v56  ;;  %v7333_v56 = vld [vmem:[#allocation67_spill] sm:$0xff] }
 0x5cb   :  { %v1992_v63 = vadd.s32 %v1991_v53, %v1989_v46  ;;  %2017 = vmin.xlane.f32.xlu0 %v2016_v9  ;;  %v7332_v46 = vld [vmem:[#allocation137_spill] sm:$0xff] }
 0x5cc   :  { %v1977_v17 = vadd.s32 %v1976_v5, %v1974_v54  ;;  %vm1441_vm5 = vcmp.le.f32.partialorder %v7333_v56, %v7332_v46  ;;  %v2005_v54 = vcvt.f32.s32 %v5689_v23  ;;  %v7334_v23 = vld [vmem:[#allocation123_spill] sm:$0xff] }
 0x5cd   :  { %3591 = vst.msk [vmem:[%s6960_s3 + $0xb0] sm:$0xff] %vm3568_vm15, %v1992_v63  ;;  %v1569_v9 = vsel %vm1441_vm5, %v4693_v61, 64  ;;  %v2041_v63 = vcvt.s32.f32 %v2039_v10 }
 0x5ce   :  { %3590 = vst.msk [vmem:[%s6960_s3 + $0xa8] sm:$0xff] %vm3568_vm15, %v1977_v17  ;;  %v2383_v62 = vsel %vm1007_vm1, %v1569_v9, 2147483647  ;;  %v2006_v44 = vshll.u32 %v2005_v54, 16 }
 0x5d1   :  { %v2314_v25 = vpop.xlane.xlu0 %2313 }
 0x5d2   :  { %vm2315_vm0 = vcmp.eq.f32.partialorder %v2312_v37, %v2314_v25  ;;  %v2342_v37 = vcvt.s32.f32 %v2340_v13  ;;  %v2320_v57 = vcvt.f32.s32 %v2314_v25 }
 0x5d3   :  { %2358 = vmin.xlane.f32.xlu0 %v2357_v16  ;;  %v2316_v40 = vsel %vm2315_vm0, %v2311_v4, inf  ;;  %v7335_v4 = vld [vmem:[#allocation56_spill] sm:$0xff]  ;;  %vm2060_vm0 = vcmp.eq.f32.partialorder %v5847_v15, %v5904_v22 }
 0x5d4   :  { %2317 = vmin.xlane.f32.xlu1 %v2316_v40  ;;  %v2321_v36 = vshll.u32 %v2320_v57, 16  ;;  %vm1440_vm7 = vcmp.le.f32.partialorder %v7335_v4, %v7334_v23  ;;  %v2385_v40 = vshra.s32 %v2383_v62, 16  ;;  %v7337_v57 = vld [vmem:[#allocation78_spill] sm:$0xff]  ;;  %v2054_v23 = vand.u32 65535, %v5832_v48 }
 0x5d5   :  { %v1568_v51 = vsel %vm1440_vm7, %v4693_v61, 64  ;;  %vm1443_vm10 = vcmp.le.f32.partialorder %v7337_v57, %v7336_v0  ;;  %v2035_v4 = vcvt.f32.s32 %v5809_v55  ;;  %v2099_v0 = vand.u32 65535, %v5884_v1 }
 0x5d6   :  { %v2387_v39 = vcvt.s32.f32 %v2385_v40  ;;  %v2368_v49 = vsel %vm1007_vm1, %v1568_v51, 2147483647  ;;  %v2080_v57 = vcvt.f32.s32 %v5843_v6  ;;  %vm2090_vm7 = vcmp.eq.f32.partialorder %v5866_v21, %v5911_v43 }
 0x5d7   :  { %v2370_v13 = vshra.s32 %v2368_v49, 16  ;;  %v2369_v9 = vand.u32 65535, %v2368_v49 }
 0x5d9   :  { %v2372_v31 = vcvt.s32.f32 %v2370_v13 }
 0x5dc   :  { %2002 = vmin.xlane.f32.xlu1 %v2001_v47 }
 0x5e4   :  { %2343 = vmin.xlane.f32.xlu1 %v2342_v37 }
 0x636   :  { %v2333_v7 = vpop.xlane.xlu0 %2332 }
 0x637   :  { %v2334_v41 = vcvt.f32.s32 %v2333_v7  ;;  %v2026_v7 = vcvt.s32.f32 %v2024_v24 }
 0x639   :  { %v2337_v50 = vadd.s32 %v2336_v11, %v2334_v41  ;;  %v2031_v11 = vsel %vm2030_vm9, %v2026_v7, inf }
 0x63b   :  { %3614 = vst.msk [vmem:[%s6960_s3 + $0x168] sm:$0xff] %vm3568_vm15, %v2337_v50 }
 0x63e   :  { %v2018_v8 = vpop.xlane.xlu0 %2017 }
 0x63f   :  { %v2019_v32 = vcvt.f32.s32 %v2018_v8 }
 0x641   :  { %v2022_v59 = vadd.s32 %v2021_v20, %v2019_v32  ;;  %v2050_v20 = vcvt.f32.s32 %v5723_v29  ;;  %v1571_v29 = vsel %vm1443_vm10, %v4693_v61, 64 }
 0x643   :  { %3593 = vst.msk [vmem:[%s6960_s3 + $0xc0] sm:$0xff] %vm3568_vm15, %v2022_v59  ;;  %v2051_v19 = vshll.u32 %v2050_v20, 16 }
 0x646   :  { %v2359_v35 = vpop.xlane.xlu0 %2358 }
 0x647   :  { %v2318_v3 = vpop.xlane.xlu1 %2317  ;;  %vm2360_vm4 = vcmp.eq.f32.partialorder %v2357_v16, %v2359_v35  ;;  %v2046_v16 = vsel %vm2045_vm6, %v2041_v63, inf  ;;  %v2365_v41 = vcvt.f32.s32 %v2359_v35 }
 0x648   :  { %v2319_v52 = vcvt.f32.s32 %v2318_v3  ;;  %v2361_v53 = vsel %vm2360_vm4, %v2356_v45, inf  ;;  %v2384_v45 = vand.u32 65535, %v2383_v62  ;;  %v2371_v62 = vcvt.s32.f32 %v2369_v9 }
 0x649   :  { %2362 = vmin.xlane.f32.xlu1 %v2361_v53  ;;  %v2366_v34 = vshll.u32 %v2365_v41, 16  ;;  %v2413_v53 = vsel %vm1007_vm1, %v1571_v29, 2147483647  ;;  %vm2105_vm4 = vcmp.eq.f32.partialorder %v5892_v27, %v5931_v33 }
 0x64a   :  { %v2322_v5 = vadd.s32 %v2321_v36, %v2319_v52  ;;  %v2386_v36 = vcvt.s32.f32 %v2384_v45  ;;  %v2415_v54 = vshra.s32 %v2413_v53, 16  ;;  %v2065_v45 = vcvt.f32.s32 %v5904_v22 }
 0x64c   :  { %3613 = vst.msk [vmem:[%s6960_s3 + $0x160] sm:$0xff] %vm3568_vm15, %v2322_v5  ;;  %v2066_v6 = vshll.u32 %v2065_v45, 16  ;;  %v7347_v45 = vld [vmem:[#allocation97_spill] sm:$0xff] }
 0x64f   :  { %v2003_v17 = vpop.xlane.xlu1 %2002 }
 0x650   :  { %v2004_v25 = vcvt.f32.s32 %v2003_v17  ;;  %v2417_v17 = vcvt.s32.f32 %v2415_v54 }
 0x651   :  { %2047 = vmin.xlane.f32.xlu1 %v2046_v16  ;;  %v7338_v16 = vld [vmem:[#allocation141_spill] sm:$0xff] }
 0x652   :  { %v2007_v42 = vadd.s32 %v2006_v44, %v2004_v25  ;;  %v2069_v25 = vand.u32 65535, %v5769_v2 }
 0x654   :  { %3592 = vst.msk [vmem:[%s6960_s3 + $0xb8] sm:$0xff] %vm3568_vm15, %v2007_v42  ;;  %v7339_v42 = vld [vmem:[#allocation71_spill] sm:$0xff]  ;;  %v2071_v28 = vcvt.s32.f32 %v2069_v25  ;;  %v2084_v25 = vand.u32 65535, %v5852_v12  ;;  %v2110_v12 = vcvt.f32.s32 %v5931_v33 }
 0x655   :  { %vm1442_vm13 = vcmp.le.f32.partialorder %v7339_v42, %v7338_v16 }
 0x656   :  { %v1570_v40 = vsel %vm1442_vm13, %v4693_v61, 64  ;;  %v2086_v42 = vcvt.s32.f32 %v2084_v25 }
 0x657   :  { %v2344_v14 = vpop.xlane.xlu1 %2343  ;;  %v2398_v49 = vsel %vm1007_vm1, %v1570_v40, 2147483647 }
 0x658   :  { %vm2345_vm8 = vcmp.eq.f32.partialorder %v2342_v37, %v2344_v14  ;;  %v2350_v35 = vcvt.f32.s32 %v2344_v14  ;;  %v2056_v14 = vcvt.s32.f32 %v2054_v23  ;;  %v2400_v18 = vshra.s32 %v2398_v49, 16 }
 0x659   :  { %2388 = vmin.xlane.f32.xlu1 %v2387_v39  ;;  %v2346_v47 = vsel %vm2345_vm8, %v2341_v26, inf  ;;  %v2076_v26 = vsel %vm2075_vm14, %v2071_v28, inf  ;;  %v2399_v27 = vand.u32 65535, %v2398_v49  ;;  %v2111_v49 = vshll.u32 %v2110_v12, 16 }
 0x65a   :  { %2347 = vmin.xlane.f32.xlu2 %v2346_v47  ;;  %v2351_v46 = vshll.u32 %v2350_v35, 16  ;;  %v2061_v48 = vsel %vm2060_vm0, %v2056_v14, inf  ;;  %v2402_v55 = vcvt.s32.f32 %v2400_v18  ;;  %v7344_v18 = vld [vmem:[#allocation179_spill] sm:$0xff] }
 0x662   :  { %2373 = vmin.xlane.f32.xlu2 %v2372_v31 }
 0x66a   :  { %2032 = vmin.xlane.f32.xlu2 %v2031_v11  ;;  %v2414_v11 = vand.u32 65535, %v2413_v53 }
 0x6bc   :  { %v2363_v50 = vpop.xlane.xlu1 %2362 }
 0x6bd   :  { %v2364_v37 = vcvt.f32.s32 %v2363_v50 }
 0x6bf   :  { %v2367_v8 = vadd.s32 %v2366_v34, %v2364_v37  ;;  %v2416_v34 = vcvt.s32.f32 %v2414_v11 }
 0x6c1   :  { %3616 = vst.msk [vmem:[%s6960_s3 + $0x178] sm:$0xff] %vm3568_vm15, %v2367_v8 }
 0x6c4   :  { %v2048_v32 = vpop.xlane.xlu1 %2047 }
 0x6c5   :  { %v2049_v59 = vcvt.f32.s32 %v2048_v32 }
 0x6c7   :  { %v2052_v60 = vadd.s32 %v2051_v19, %v2049_v59  ;;  %v7340_v19 = vld [vmem:[#allocation165_spill] sm:$0xff] }
 0x6c8   :  { %v7341_v59 = vld [vmem:[#allocation93_spill] sm:$0xff] }
 0x6c9   :  { %3595 = vst.msk [vmem:[%s6960_s3 + $0xd0] sm:$0xff] %vm3568_vm15, %v2052_v60  ;;  %vm1445_vm3 = vcmp.le.f32.partialorder %v7341_v59, %v7340_v19 }
 0x6ca   :  { %v1573_v35 = vsel %vm1445_vm3, %v4693_v61, 64 }
 0x6cb   :  { %v2443_v1 = vsel %vm1007_vm1, %v1573_v35, 2147483647 }
 0x6cc   :  { %v2389_v3 = vpop.xlane.xlu1 %2388 }
 0x6cd   :  { %v2348_v52 = vpop.xlane.xlu2 %2347  ;;  %vm2390_vm11 = vcmp.eq.f32.partialorder %v2387_v39, %v2389_v3  ;;  %v2036_v39 = vshll.u32 %v2035_v4, 16  ;;  %v2395_v15 = vcvt.f32.s32 %v2389_v3  ;;  %v2101_v3 = vcvt.s32.f32 %v2099_v0 }
 0x6ce   :  { %v2349_v56 = vcvt.f32.s32 %v2348_v52  ;;  %v2391_v5 = vsel %vm2390_vm11, %v2386_v36, inf  ;;  %v2081_v36 = vshll.u32 %v2080_v57, 16  ;;  %v2091_v4 = vsel %vm2090_vm7, %v2086_v42, inf  ;;  %v7346_v57 = vld [vmem:[#allocation170_spill] sm:$0xff] }
 0x6cf   :  { %2392 = vmin.xlane.f32.xlu2 %v2391_v5  ;;  %v2106_v22 = vsel %vm2105_vm4, %v2101_v3, inf  ;;  %vm1446_vm10 = vcmp.le.f32.partialorder %v7347_v45, %v7346_v57 }
 0x6d0   :  { %v2352_v10 = vadd.s32 %v2351_v46, %v2349_v56 }
 0x6d2   :  { %3615 = vst.msk [vmem:[%s6960_s3 + $0x170] sm:$0xff] %vm3568_vm15, %v2352_v10  ;;  %v2445_v10 = vshra.s32 %v2443_v1, 16 }
 0x6d4   :  { %v2447_v9 = vcvt.s32.f32 %v2445_v10 }
 0x6d5   :  { %v2374_v63 = vpop.xlane.xlu2 %2373 }
 0x6d6   :  { %vm2375_vm12 = vcmp.eq.f32.partialorder %v2372_v31, %v2374_v63  ;;  %v2396_v31 = vshll.u32 %v2395_v15, 16  ;;  %v2380_v41 = vcvt.f32.s32 %v2374_v63  ;;  %v2401_v63 = vcvt.s32.f32 %v2399_v27 }
 0x6d7   :  { %2418 = vmin.xlane.f32.xlu2 %v2417_v17  ;;  %v2376_v44 = vsel %vm2375_vm12, %v2371_v62, inf  ;;  %v7342_v62 = vld [vmem:[#allocation162_spill] sm:$0xff]  ;;  %v2444_v15 = vand.u32 65535, %v2443_v1  ;;  %vm2120_vm12 = vcmp.eq.f32.partialorder %v5939_v30, %v5966_v58 }
 0x6d8   :  { %2377 = vmin.xlane.f32.xlu0 %v2376_v44  ;;  %v2381_v8 = vshll.u32 %v2380_v41, 16  ;;  %v7343_v44 = vld [vmem:[#allocation87_spill] sm:$0xff] }
 0x6d9   :  { %vm1444_vm6 = vcmp.le.f32.partialorder %v7343_v44, %v7342_v62 }
 0x6da   :  { %v1572_v16 = vsel %vm1444_vm6, %v4693_v61, 64 }
 0x6db   :  { %v2428_v23 = vsel %vm1007_vm1, %v1572_v16, 2147483647 }
 0x6dc   :  { %v2430_v40 = vshra.s32 %v2428_v23, 16  ;;  %v2429_v35 = vand.u32 65535, %v2428_v23 }
 0x6dd   :  { %v2033_v51 = vpop.xlane.xlu2 %2032 }
 0x6de   :  { %v2034_v2 = vcvt.f32.s32 %v2033_v51  ;;  %v2432_v28 = vcvt.s32.f32 %v2430_v40  ;;  %v2431_v3 = vcvt.s32.f32 %v2429_v35 }
 0x6df   :  { %2077 = vmin.xlane.f32.xlu2 %v2076_v26 }
 0x6e0   :  { %v2037_v47 = vadd.s32 %v2036_v39, %v2034_v2  ;;  %2062 = vmin.xlane.f32.xlu0 %v2061_v48 }
 0x6e2   :  { %3594 = vst.msk [vmem:[%s6960_s3 + $0xc8] sm:$0xff] %vm3568_vm15, %v2037_v47 }
 0x6e8   :  { %2403 = vmin.xlane.f32.xlu0 %v2402_v55 }
 0x742   :  { %v2393_v13 = vpop.xlane.xlu2 %2392 }
 0x743   :  { %v2394_v24 = vcvt.f32.s32 %v2393_v13 }
 0x745   :  { %v2397_v7 = vadd.s32 %v2396_v31, %v2394_v24  ;;  %v2446_v24 = vcvt.s32.f32 %v2444_v15 }
 0x747   :  { %3618 = vst.msk [vmem:[%s6960_s3 + $0x188] sm:$0xff] %vm3568_vm15, %v2397_v7 }
 0x74a   :  { %v2419_v50 = vpop.xlane.xlu2 %2418 }
 0x74b   :  { %v2378_v37 = vpop.xlane.xlu0 %2377  ;;  %vm2420_vm2 = vcmp.eq.f32.partialorder %v2417_v17, %v2419_v50  ;;  %v2425_v51 = vcvt.f32.s32 %v2419_v50 }
 0x74c   :  { %v2379_v20 = vcvt.f32.s32 %v2378_v37  ;;  %v2421_v32 = vsel %vm2420_vm2, %v2416_v34, inf }
 0x74d   :  { %2422 = vmin.xlane.f32.xlu0 %v2421_v32  ;;  %v2426_v39 = vshll.u32 %v2425_v51, 16 }
 0x74e   :  { %v2382_v60 = vadd.s32 %v2381_v8, %v2379_v20  ;;  %v2095_v20 = vcvt.f32.s32 %v5911_v43  ;;  %v1574_v43 = vsel %vm1446_vm10, %v4693_v61, 64 }
 0x750   :  { %3617 = vst.msk [vmem:[%s6960_s3 + $0x180] sm:$0xff] %vm3568_vm15, %v2382_v60  ;;  %v2096_v59 = vshll.u32 %v2095_v20, 16 }
 0x752   :  { %v2078_v29 = vpop.xlane.xlu2 %2077 }
 0x753   :  { %v2079_v52 = vcvt.f32.s32 %v2078_v29  ;;  %v2063_v53 = vpop.xlane.xlu0 %2062 }
 0x754   :  { %v2064_v46 = vcvt.f32.s32 %v2063_v53 }
 0x755   :  { %v2082_v56 = vadd.s32 %v2081_v36, %v2079_v52  ;;  %2107 = vmin.xlane.f32.xlu0 %v2106_v22  ;;  %v2458_v36 = vsel %vm1007_vm1, %v1574_v43, 2147483647 }
 0x756   :  { %v2067_v5 = vadd.s32 %v2066_v6, %v2064_v46  ;;  %v2460_v53 = vshra.s32 %v2458_v36, 16  ;;  %v2114_v6 = vand.u32 65535, %v5935_v38 }
 0x757   :  { %3597 = vst.msk [vmem:[%s6960_s3 + $0xe0] sm:$0xff] %vm3568_vm15, %v2082_v56 }
 0x758   :  { %3596 = vst.msk [vmem:[%s6960_s3 + $0xd8] sm:$0xff] %vm3568_vm15, %v2067_v5  ;;  %v2462_v1 = vcvt.s32.f32 %v2460_v53  ;;  %v2116_v46 = vcvt.s32.f32 %v2114_v6 }
 0x75a   :  { %v2121_v22 = vsel %vm2120_vm12, %v2116_v46, inf }
 0x75b   :  { %v2404_v54 = vpop.xlane.xlu0 %2403 }
 0x75c   :  { %vm2405_vm5 = vcmp.eq.f32.partialorder %v2402_v55, %v2404_v54  ;;  %v7345_v55 = vld [vmem:[#allocation111_spill] sm:$0xff]  ;;  %v2410_v13 = vcvt.f32.s32 %v2404_v54 }
 0x75d   :  { %2448 = vmin.xlane.f32.xlu0 %v2447_v9  ;;  %v2406_v17 = vsel %vm2405_vm5, %v2401_v63, inf  ;;  %vm1447_vm8 = vcmp.le.f32.partialorder %v7345_v55, %v7344_v18  ;;  %v7349_v63 = vld [vmem:[#allocation122_spill] sm:$0xff] }
 0x75e   :  { %2407 = vmin.xlane.f32.xlu1 %v2406_v17  ;;  %v1575_v33 = vsel %vm1447_vm8, %v4693_v61, 64  ;;  %v2411_v41 = vshll.u32 %v2410_v13, 16 }
 0x75f   :  { %v2473_v11 = vsel %vm1007_vm1, %v1575_v33, 2147483647 }
 0x760   :  { %v2475_v8 = vshra.s32 %v2473_v11, 16  ;;  %v2474_v17 = vand.u32 65535, %v2473_v11 }
 0x762   :  { %v2477_v19 = vcvt.s32.f32 %v2475_v8  ;;  %v2476_v62 = vcvt.s32.f32 %v2474_v17  ;;  %v7356_v17 = vld [vmem:[#allocation200_spill] sm:$0xff] }
 0x766   :  { %2092 = vmin.xlane.f32.xlu1 %v2091_v4 }
 0x76e   :  { %2433 = vmin.xlane.f32.xlu1 %v2432_v28 }
 0x7c0   :  { %v2423_v14 = vpop.xlane.xlu0 %2422 }
 0x7c1   :  { %v2424_v2 = vcvt.f32.s32 %v2423_v14  ;;  %v7350_v14 = vld [vmem:[#allocation182_spill] sm:$0xff] }
 0x7c3   :  { %v2427_v26 = vadd.s32 %v2426_v39, %v2424_v2  ;;  %v7351_v39 = vld [vmem:[#allocation115_spill] sm:$0xff]  ;;  %v2459_v2 = vand.u32 65535, %v2458_v36  ;;  %v7355_v36 = vld [vmem:[#allocation134_spill] sm:$0xff] }
 0x7c4   :  { %vm1448_vm0 = vcmp.le.f32.partialorder %v7351_v39, %v7350_v14 }
 0x7c5   :  { %3620 = vst.msk [vmem:[%s6960_s3 + $0x198] sm:$0xff] %vm3568_vm15, %v2427_v26  ;;  %v1576_v26 = vsel %vm1448_vm0, %v4693_v61, 64 }
 0x7c8   :  { %v2108_v21 = vpop.xlane.xlu0 %2107 }
 0x7c9   :  { %v2109_v48 = vcvt.f32.s32 %v2108_v21  ;;  %v2461_v21 = vcvt.s32.f32 %v2459_v2  ;;  %v7358_v2 = vld [vmem:[#allocation196_spill] sm:$0xff] }
 0x7cb   :  { %v2112_v47 = vadd.s32 %v2111_v49, %v2109_v48  ;;  %v2488_v49 = vsel %vm1007_vm1, %v1576_v26, 2147483647  ;;  %v7359_v26 = vld [vmem:[#allocation146_spill] sm:$0xff] }
 0x7cc   :  { %v2490_v18 = vshra.s32 %v2488_v49, 16 }
 0x7cd   :  { %3599 = vst.msk [vmem:[%s6960_s3 + $0xf0] sm:$0xff] %vm3568_vm15, %v2112_v47  ;;  %v2125_v47 = vcvt.f32.s32 %v5966_v58 }
 0x7ce   :  { %v2492_v33 = vcvt.s32.f32 %v2490_v18 }
 0x7cf   :  { %v2126_v15 = vshll.u32 %v2125_v47, 16 }
 0x7d0   :  { %v2449_v31 = vpop.xlane.xlu0 %2448 }
 0x7d1   :  { %v2408_v7 = vpop.xlane.xlu1 %2407  ;;  %vm2450_vm9 = vcmp.eq.f32.partialorder %v2447_v9, %v2449_v31  ;;  %v2455_v56 = vcvt.f32.s32 %v2449_v31  ;;  %v7348_v9 = vld [vmem:[#allocation186_spill] sm:$0xff] }
 0x7d2   :  { %v2409_v50 = vcvt.f32.s32 %v2408_v7  ;;  %v2451_v34 = vsel %vm2450_vm9, %v2446_v24, inf  ;;  %vm1449_vm13 = vcmp.le.f32.partialorder %v7349_v63, %v7348_v9  ;;  %vm1452_vm9 = vcmp.le.f32.partialorder %v7359_v26, %v7358_v2 }
 0x7d3   :  { %2452 = vmin.xlane.f32.xlu1 %v2451_v34  ;;  %v2456_v10 = vshll.u32 %v2455_v56, 16  ;;  %v1577_v38 = vsel %vm1449_vm13, %v4693_v61, 64  ;;  %v7352_v34 = vld [vmem:[#allocation194_spill] sm:$0xff] }
 0x7d4   :  { %v2412_v37 = vadd.s32 %v2411_v41, %v2409_v50  ;;  %v2503_v44 = vsel %vm1007_vm1, %v1577_v38, 2147483647  ;;  %v7357_v38 = vld [vmem:[#allocation160_spill] sm:$0xff] }
 0x7d5   :  { %v2505_v16 = vshra.s32 %v2503_v44, 16  ;;  %v2504_v58 = vand.u32 65535, %v2503_v44  ;;  %vm1453_vm7 = vcmp.le.f32.partialorder %v7357_v38, %v7356_v17 }
 0x7d6   :  { %3619 = vst.msk [vmem:[%s6960_s3 + $0x190] sm:$0xff] %vm3568_vm15, %v2412_v37  ;;  %v7353_v37 = vld [vmem:[#allocation140_spill] sm:$0xff] }
 0x7d7   :  { %v2507_v4 = vcvt.s32.f32 %v2505_v16  ;;  %vm1451_vm3 = vcmp.le.f32.partialorder %v7353_v37, %v7352_v34 }
 0x7d8   :  { %v1579_v8 = vsel %vm1451_vm3, %v4693_v61, 64 }
 0x7d9   :  { %v2093_v32 = vpop.xlane.xlu1 %2092 }
 0x7da   :  { %v2094_v60 = vcvt.f32.s32 %v2093_v32  ;;  %v2506_v32 = vcvt.s32.f32 %v2504_v58 }
 0x7db   :  { %2478 = vmin.xlane.f32.xlu1 %v2477_v19 }
 0x7dc   :  { %v2097_v0 = vadd.s32 %v2096_v59, %v2094_v60 }
 0x7de   :  { %3598 = vst.msk [vmem:[%s6960_s3 + $0xe8] sm:$0xff] %vm3568_vm15, %v2097_v0 }
 0x7e1   :  { %v2434_v29 = vpop.xlane.xlu1 %2433 }
 0x7e2   :  { %vm2435_vm11 = vcmp.eq.f32.partialorder %v2432_v28, %v2434_v29  ;;  %v2440_v42 = vcvt.f32.s32 %v2434_v29 }
 0x7e3   :  { %v2436_v52 = vsel %vm2435_vm11, %v2431_v3, inf  ;;  %v7354_v3 = vld [vmem:[#allocation191_spill] sm:$0xff] }
 0x7e4   :  { %2437 = vmin.xlane.f32.xlu2 %v2436_v52  ;;  %v2441_v40 = vshll.u32 %v2440_v42, 16  ;;  %vm1450_vm5 = vcmp.le.f32.partialorder %v7355_v36, %v7354_v3  ;;  %v2489_v52 = vand.u32 65535, %v2488_v49 }
 0x7e5   :  { %v1578_v53 = vsel %vm1450_vm5, %v4693_v61, 64 }
 0x7e6   :  { %v2491_v6 = vcvt.s32.f32 %v2489_v52  ;;  %v2518_v46 = vsel %vm1007_vm1, %v1578_v53, 2147483647 }
 0x7e7   :  { %v2520_v56 = vshra.s32 %v2518_v46, 16 }
 0x7ec   :  { %2463 = vmin.xlane.f32.xlu2 %v2462_v1 }
 0x7f4   :  { %2122 = vmin.xlane.f32.xlu2 %v2121_v22 }
 0x846   :  { %v2453_v5 = vpop.xlane.xlu1 %2452 }
 0x847   :  { %v2454_v27 = vcvt.f32.s32 %v2453_v5  ;;  %v2522_v5 = vcvt.s32.f32 %v2520_v56 }
 0x849   :  { %v2457_v54 = vadd.s32 %v2456_v10, %v2454_v27 }
 0x84b   :  { %3622 = vst.msk [vmem:[%s6960_s3 + $0x1a8] sm:$0xff] %vm3568_vm15, %v2457_v54 }
 0x84e   :  { %v2479_v30 = vpop.xlane.xlu1 %2478 }
 0x84f   :  { %vm2480_vm14 = vcmp.eq.f32.partialorder %v2477_v19, %v2479_v30  ;;  %v2485_v24 = vcvt.f32.s32 %v2479_v30  ;;  %v2533_v19 = vsel %vm1007_vm1, %v1579_v8, 2147483647 }
 0x850   :  { %v2481_v25 = vsel %vm2480_vm14, %v2476_v62, inf  ;;  %v2535_v60 = vshra.s32 %v2533_v19, 16  ;;  %v2534_v30 = vand.u32 65535, %v2533_v19  ;;  %v1581_v62 = vsel %vm1453_vm7, %v4693_v61, 64 }
 0x851   :  { %2482 = vmin.xlane.f32.xlu2 %v2481_v25  ;;  %v2486_v11 = vshll.u32 %v2485_v24, 16  ;;  %v2563_v16 = vsel %vm1007_vm1, %v1581_v62, 2147483647 }
 0x852   :  { %v2537_v45 = vcvt.s32.f32 %v2535_v60  ;;  %v2536_v25 = vcvt.s32.f32 %v2534_v30 }
 0x857   :  { %v2438_v23 = vpop.xlane.xlu2 %2437 }
 0x858   :  { %v2439_v28 = vcvt.f32.s32 %v2438_v23  ;;  %v2565_v23 = vshra.s32 %v2563_v16, 16 }
 0x859   :  { %2508 = vmin.xlane.f32.xlu2 %v2507_v4 }
 0x85a   :  { %v2442_v51 = vadd.s32 %v2441_v40, %v2439_v28  ;;  %v2567_v28 = vcvt.s32.f32 %v2565_v23 }
 0x85c   :  { %3621 = vst.msk [vmem:[%s6960_s3 + $0x1a0] sm:$0xff] %vm3568_vm15, %v2442_v51 }
 0x85f   :  { %v2464_v12 = vpop.xlane.xlu2 %2463 }
 0x860   :  { %vm2465_vm2 = vcmp.eq.f32.partialorder %v2462_v1, %v2464_v12  ;;  %v2470_v0 = vcvt.f32.s32 %v2464_v12  ;;  %v2519_v12 = vand.u32 65535, %v2518_v46 }
 0x861   :  { %v2466_v48 = vsel %vm2465_vm2, %v2461_v21, inf  ;;  %v1580_v21 = vsel %vm1452_vm9, %v4693_v61, 64 }
 0x862   :  { %2467 = vmin.xlane.f32.xlu0 %v2466_v48  ;;  %v2471_v35 = vshll.u32 %v2470_v0, 16  ;;  %v2521_v48 = vcvt.s32.f32 %v2519_v12  ;;  %v2548_v47 = vsel %vm1007_vm1, %v1580_v21, 2147483647 }
 0x867   :  { %v2123_v55 = vpop.xlane.xlu2 %2122 }
 0x868   :  { %v2124_v13 = vcvt.f32.s32 %v2123_v55  ;;  %v2550_v55 = vshra.s32 %v2548_v47, 16 }
 0x86a   :  { %v2127_v31 = vadd.s32 %v2126_v15, %v2124_v13  ;;  %2493 = vmin.xlane.f32.xlu0 %v2492_v33  ;;  %v2552_v15 = vcvt.s32.f32 %v2550_v55 }
 0x86c   :  { %3600 = vst.msk [vmem:[%s6960_s3 + $0xf8] sm:$0xff] %vm3568_vm15, %v2127_v31 }
 0x8c4   :  { %v2483_v7 = vpop.xlane.xlu2 %2482 }
 0x8c5   :  { %v2484_v41 = vcvt.f32.s32 %v2483_v7 }
 0x8c7   :  { %v2487_v50 = vadd.s32 %v2486_v11, %v2484_v41  ;;  %v7360_v11 = vld [vmem:[#allocation206_spill] sm:$0xff]  ;;  %v7361_v41 = vld [vmem:[#allocation172_spill] sm:$0xff] }
 0x8c8   :  { %vm1455_vm11 = vcmp.le.f32.partialorder %v7361_v41, %v7360_v11 }
 0x8c9   :  { %3624 = vst.msk [vmem:[%s6960_s3 + $0x1b8] sm:$0xff] %vm3568_vm15, %v2487_v50  ;;  %v2564_v50 = vand.u32 65535, %v2563_v16  ;;  %v1583_v34 = vsel %vm1455_vm11, %v4693_v61, 64 }
 0x8ca   :  { %v2593_v8 = vsel %vm1007_vm1, %v1583_v34, 2147483647 }
 0x8cb   :  { %v2566_v58 = vcvt.s32.f32 %v2564_v50 }
 0x8cc   :  { %v2509_v20 = vpop.xlane.xlu2 %2508 }
 0x8cd   :  { %vm2510_vm4 = vcmp.eq.f32.partialorder %v2507_v4, %v2509_v20  ;;  %v2515_v10 = vcvt.f32.s32 %v2509_v20 }
 0x8ce   :  { %v2511_v59 = vsel %vm2510_vm4, %v2506_v32, inf  ;;  %v2595_v32 = vshra.s32 %v2593_v8, 16 }
 0x8cf   :  { %2512 = vmin.xlane.f32.xlu0 %v2511_v59  ;;  %v2516_v54 = vshll.u32 %v2515_v10, 16 }
 0x8d0   :  { %v2597_v60 = vcvt.s32.f32 %v2595_v32 }
 0x8d5   :  { %v2468_v57 = vpop.xlane.xlu0 %2467 }
 0x8d6   :  { %v2469_v43 = vcvt.f32.s32 %v2468_v57 }
 0x8d7   :  { %2538 = vmin.xlane.f32.xlu0 %v2537_v45 }
 0x8d8   :  { %v2472_v29 = vadd.s32 %v2471_v35, %v2469_v43  ;;  %v7362_v35 = vld [vmem:[#allocation203_spill] sm:$0xff] }
 0x8d9   :  { %v7363_v43 = vld [vmem:[#allocation163_spill] sm:$0xff] }
 0x8da   :  { %3623 = vst.msk [vmem:[%s6960_s3 + $0x1b0] sm:$0xff] %vm3568_vm15, %v2472_v29  ;;  %vm1454_vm13 = vcmp.le.f32.partialorder %v7363_v43, %v7362_v35  ;;  %v2549_v29 = vand.u32 65535, %v2548_v47 }
 0x8db   :  { %v1582_v3 = vsel %vm1454_vm13, %v4693_v61, 64 }
 0x8dc   :  { %v2551_v52 = vcvt.s32.f32 %v2549_v29  ;;  %v2578_v53 = vsel %vm1007_vm1, %v1582_v3, 2147483647 }
 0x8dd   :  { %v2494_v1 = vpop.xlane.xlu0 %2493 }
 0x8de   :  { %vm2495_vm6 = vcmp.eq.f32.partialorder %v2492_v33, %v2494_v1  ;;  %v2500_v4 = vcvt.f32.s32 %v2494_v1 }
 0x8df   :  { %v2496_v22 = vsel %vm2495_vm6, %v2491_v6, inf  ;;  %v2580_v6 = vshra.s32 %v2578_v53, 16 }
 0x8e0   :  { %2497 = vmin.xlane.f32.xlu1 %v2496_v22  ;;  %v2501_v51 = vshll.u32 %v2500_v4, 16 }
 0x8e1   :  { %v2582_v46 = vcvt.s32.f32 %v2580_v6 }
 0x8e8   :  { %2523 = vmin.xlane.f32.xlu1 %v2522_v5 }
 0x942   :  { %v2513_v27 = vpop.xlane.xlu0 %2512 }
 0x943   :  { %v2514_v9 = vcvt.f32.s32 %v2513_v27 }
 0x945   :  { %v2517_v63 = vadd.s32 %v2516_v54, %v2514_v9  ;;  %v7364_v54 = vld [vmem:[#allocation40_spill] sm:$0xff] }
 0x946   :  { %v7365_v9 = vld [vmem:[#allocation4_spill] sm:$0xff] }
 0x947   :  { %3626 = vst.msk [vmem:[%s6960_s3 + $0x1c8] sm:$0xff] %vm3568_vm15, %v2517_v63  ;;  %vm1457_vm0 = vcmp.le.f32.partialorder %v7365_v9, %v7364_v54  ;;  %v2594_v63 = vand.u32 65535, %v2593_v8 }
 0x948   :  { %v1585_v17 = vsel %vm1457_vm0, %v4693_v61, 64 }
 0x949   :  { %v2596_v30 = vcvt.s32.f32 %v2594_v63  ;;  %v2623_v62 = vsel %vm1007_vm1, %v1585_v17, 2147483647 }
 0x94a   :  { %v2539_v44 = vpop.xlane.xlu0 %2538 }
 0x94b   :  { %vm2540_vm8 = vcmp.eq.f32.partialorder %v2537_v45, %v2539_v44  ;;  %v2545_v13 = vcvt.f32.s32 %v2539_v44 }
 0x94c   :  { %v2541_v42 = vsel %vm2540_vm8, %v2536_v25, inf  ;;  %v2625_v25 = vshra.s32 %v2623_v62, 16 }
 0x94d   :  { %2542 = vmin.xlane.f32.xlu1 %v2541_v42  ;;  %v2546_v31 = vshll.u32 %v2545_v13, 16 }
 0x94e   :  { %v2627_v23 = vcvt.s32.f32 %v2625_v25 }
 0x953   :  { %v2498_v40 = vpop.xlane.xlu1 %2497 }
 0x954   :  { %v2499_v14 = vcvt.f32.s32 %v2498_v40 }
 0x955   :  { %2568 = vmin.xlane.f32.xlu1 %v2567_v28 }
 0x956   :  { %v2502_v39 = vadd.s32 %v2501_v51, %v2499_v14  ;;  %v7366_v51 = vld [vmem:[#allocation34_spill] sm:$0xff] }
 0x957   :  { %v7367_v14 = vld [vmem:[#allocation2_spill] sm:$0xff] }
 0x958   :  { %3625 = vst.msk [vmem:[%s6960_s3 + $0x1c0] sm:$0xff] %vm3568_vm15, %v2502_v39  ;;  %vm1456_vm3 = vcmp.le.f32.partialorder %v7367_v14, %v7366_v51  ;;  %v2579_v39 = vand.u32 65535, %v2578_v53 }
 0x959   :  { %v1584_v2 = vsel %vm1456_vm3, %v4693_v61, 64 }
 0x95a   :  { %v2581_v12 = vcvt.s32.f32 %v2579_v39  ;;  %v2608_v21 = vsel %vm1007_vm1, %v1584_v2, 2147483647 }
 0x95b   :  { %v2524_v49 = vpop.xlane.xlu1 %2523 }
 0x95c   :  { %vm2525_vm10 = vcmp.eq.f32.partialorder %v2522_v5, %v2524_v49  ;;  %v2530_v19 = vcvt.f32.s32 %v2524_v49 }
 0x95d   :  { %v2526_v18 = vsel %vm2525_vm10, %v2521_v48, inf  ;;  %v2610_v48 = vshra.s32 %v2608_v21, 16 }
 0x95e   :  { %2527 = vmin.xlane.f32.xlu2 %v2526_v18  ;;  %v2531_v0 = vshll.u32 %v2530_v19, 16 }
 0x95f   :  { %v2612_v47 = vcvt.s32.f32 %v2610_v48 }
 0x966   :  { %2553 = vmin.xlane.f32.xlu2 %v2552_v15 }
 0x9c0   :  { %v2543_v33 = vpop.xlane.xlu1 %2542 }
 0x9c1   :  { %v2544_v24 = vcvt.f32.s32 %v2543_v33 }
 0x9c3   :  { %v2547_v7 = vadd.s32 %v2546_v31, %v2544_v24  ;;  %v7368_v31 = vld [vmem:[#allocation53_spill] sm:$0xff]  ;;  %v7369_v24 = vld [vmem:[#allocation11_spill] sm:$0xff] }
 0x9c4   :  { %vm1459_vm5 = vcmp.le.f32.partialorder %v7369_v24, %v7368_v31 }
 0x9c5   :  { %3628 = vst.msk [vmem:[%s6960_s3 + $0x1d8] sm:$0xff] %vm3568_vm15, %v2547_v7  ;;  %v2624_v7 = vand.u32 65535, %v2623_v62  ;;  %v1587_v11 = vsel %vm1459_vm5, %v4693_v61, 64 }
 0x9c6   :  { %v2653_v34 = vsel %vm1007_vm1, %v1587_v11, 2147483647 }
 0x9c7   :  { %v2626_v50 = vcvt.s32.f32 %v2624_v7 }
 0x9c8   :  { %v2569_v37 = vpop.xlane.xlu1 %2568 }
 0x9c9   :  { %vm2570_vm12 = vcmp.eq.f32.partialorder %v2567_v28, %v2569_v37  ;;  %v2575_v22 = vcvt.f32.s32 %v2569_v37 }
 0x9ca   :  { %v2571_v20 = vsel %vm2570_vm12, %v2566_v58, inf  ;;  %v2655_v58 = vshra.s32 %v2653_v34, 16 }
 0x9cb   :  { %2572 = vmin.xlane.f32.xlu2 %v2571_v20  ;;  %v2576_v5 = vshll.u32 %v2575_v22, 16 }
 0x9cc   :  { %v2657_v32 = vcvt.s32.f32 %v2655_v58 }
 0x9d1   :  { %v2528_v59 = vpop.xlane.xlu2 %2527 }
 0x9d2   :  { %v2529_v57 = vcvt.f32.s32 %v2528_v59 }
 0x9d3   :  { %2598 = vmin.xlane.f32.xlu2 %v2597_v60 }
 0x9d4   :  { %v2532_v45 = vadd.s32 %v2531_v0, %v2529_v57  ;;  %v7370_v0 = vld [vmem:[#allocation46_spill] sm:$0xff]  ;;  %v7371_v57 = vld [vmem:[#allocation7_spill] sm:$0xff] }
 0x9d5   :  { %vm1458_vm7 = vcmp.le.f32.partialorder %v7371_v57, %v7370_v0 }
 0x9d6   :  { %3627 = vst.msk [vmem:[%s6960_s3 + $0x1d0] sm:$0xff] %vm3568_vm15, %v2532_v45  ;;  %v2609_v45 = vand.u32 65535, %v2608_v21  ;;  %v1586_v35 = vsel %vm1458_vm7, %v4693_v61, 64 }
 0x9d7   :  { %v2638_v3 = vsel %vm1007_vm1, %v1586_v35, 2147483647 }
 0x9d8   :  { %v2611_v29 = vcvt.s32.f32 %v2609_v45 }
 0x9d9   :  { %v2554_v36 = vpop.xlane.xlu2 %2553 }
 0x9da   :  { %vm2555_vm14 = vcmp.eq.f32.partialorder %v2552_v15, %v2554_v36  ;;  %v2560_v16 = vcvt.f32.s32 %v2554_v36 }
 0x9db   :  { %v2556_v1 = vsel %vm2555_vm14, %v2551_v52, inf  ;;  %v2640_v52 = vshra.s32 %v2638_v3, 16 }
 0x9dc   :  { %2557 = vmin.xlane.f32.xlu0 %v2556_v1  ;;  %v2561_v4 = vshll.u32 %v2560_v16, 16 }
 0x9dd   :  { %v2642_v53 = vcvt.s32.f32 %v2640_v52 }
 0x9e4   :  { %2583 = vmin.xlane.f32.xlu0 %v2582_v46 }
 0xa3e   :  { %v2573_v56 = vpop.xlane.xlu2 %2572 }
 0xa3f   :  { %v2574_v10 = vcvt.f32.s32 %v2573_v56 }
 0xa41   :  { %v2577_v27 = vadd.s32 %v2576_v5, %v2574_v10  ;;  %v7372_v5 = vld [vmem:[#allocation58_spill] sm:$0xff]  ;;  %v7373_v10 = vld [vmem:[#allocation13_spill] sm:$0xff] }
 0xa42   :  { %vm1461_vm9 = vcmp.le.f32.partialorder %v7373_v10, %v7372_v5 }
 0xa43   :  { %3630 = vst.msk [vmem:[%s6960_s3 + $0x1e8] sm:$0xff] %vm3568_vm15, %v2577_v27  ;;  %v2654_v27 = vand.u32 65535, %v2653_v34  ;;  %v1589_v54 = vsel %vm1461_vm9, %v4693_v61, 64 }
 0xa44   :  { %v2683_v17 = vsel %vm1007_vm1, %v1589_v54, 2147483647 }
 0xa45   :  { %v2656_v63 = vcvt.s32.f32 %v2654_v27 }
 0xa46   :  { %v2599_v38 = vpop.xlane.xlu2 %2598 }
 0xa47   :  { %vm2600_vm2 = vcmp.eq.f32.partialorder %v2597_v60, %v2599_v38  ;;  %v2605_v18 = vcvt.f32.s32 %v2599_v38 }
 0xa48   :  { %v2601_v44 = vsel %vm2600_vm2, %v2596_v30, inf  ;;  %v2685_v30 = vshra.s32 %v2683_v17, 16 }
 0xa49   :  { %2602 = vmin.xlane.f32.xlu0 %v2601_v44  ;;  %v2606_v15 = vshll.u32 %v2605_v18, 16 }
 0xa4a   :  { %v2687_v25 = vcvt.s32.f32 %v2685_v30 }
 0xa4f   :  { %v2558_v42 = vpop.xlane.xlu0 %2557 }
 0xa50   :  { %v2559_v40 = vcvt.f32.s32 %v2558_v42 }
 0xa51   :  { %2628 = vmin.xlane.f32.xlu0 %v2627_v23 }
 0xa52   :  { %v2562_v28 = vadd.s32 %v2561_v4, %v2559_v40  ;;  %v7374_v4 = vld [vmem:[#allocation52_spill] sm:$0xff]  ;;  %v7375_v40 = vld [vmem:[#allocation9_spill] sm:$0xff] }
 0xa53   :  { %vm1460_vm11 = vcmp.le.f32.partialorder %v7375_v40, %v7374_v4 }
 0xa54   :  { %3629 = vst.msk [vmem:[%s6960_s3 + $0x1e0] sm:$0xff] %vm3568_vm15, %v2562_v28  ;;  %v2639_v28 = vand.u32 65535, %v2638_v3  ;;  %v1588_v51 = vsel %vm1460_vm11, %v4693_v61, 64 }
 0xa55   :  { %v2668_v2 = vsel %vm1007_vm1, %v1588_v51, 2147483647 }
 0xa56   :  { %v2641_v39 = vcvt.s32.f32 %v2639_v28 }
 0xa57   :  { %v2584_v26 = vpop.xlane.xlu0 %2583 }
 0xa58   :  { %vm2585_vm4 = vcmp.eq.f32.partialorder %v2582_v46, %v2584_v26  ;;  %v2590_v8 = vcvt.f32.s32 %v2584_v26 }
 0xa59   :  { %v2586_v49 = vsel %vm2585_vm4, %v2581_v12, inf  ;;  %v2670_v12 = vshra.s32 %v2668_v2, 16 }
 0xa5a   :  { %2587 = vmin.xlane.f32.xlu1 %v2586_v49  ;;  %v2591_v19 = vshll.u32 %v2590_v8, 16 }
 0xa5b   :  { %v2672_v21 = vcvt.s32.f32 %v2670_v12 }
 0xa62   :  { %2613 = vmin.xlane.f32.xlu1 %v2612_v47 }
 0xabc   :  { %v2603_v55 = vpop.xlane.xlu0 %2602 }
 0xabd   :  { %v2604_v13 = vcvt.f32.s32 %v2603_v55 }
 0xabf   :  { %v2607_v33 = vadd.s32 %v2606_v15, %v2604_v13  ;;  %v7376_v15 = vld [vmem:[#allocation69_spill] sm:$0xff]  ;;  %v7377_v13 = vld [vmem:[#allocation19_spill] sm:$0xff] }
 0xac0   :  { %vm1463_vm13 = vcmp.le.f32.partialorder %v7377_v13, %v7376_v15 }
 0xac1   :  { %3632 = vst.msk [vmem:[%s6960_s3 + $0x1f8] sm:$0xff] %vm3568_vm15, %v2607_v33  ;;  %v2684_v33 = vand.u32 65535, %v2683_v17  ;;  %v1591_v31 = vsel %vm1463_vm13, %v4693_v61, 64 }
 0xac2   :  { %v2713_v11 = vsel %vm1007_vm1, %v1591_v31, 2147483647 }
 0xac3   :  { %v2686_v7 = vcvt.s32.f32 %v2684_v33 }
 0xac4   :  { %v2629_v41 = vpop.xlane.xlu0 %2628 }
 0xac5   :  { %vm2630_vm6 = vcmp.eq.f32.partialorder %v2627_v23, %v2629_v41  ;;  %v2635_v1 = vcvt.f32.s32 %v2629_v41 }
 0xac6   :  { %v2631_v37 = vsel %vm2630_vm6, %v2626_v50, inf  ;;  %v2715_v50 = vshra.s32 %v2713_v11, 16 }
 0xac7   :  { %2632 = vmin.xlane.f32.xlu1 %v2631_v37  ;;  %v2636_v46 = vshll.u32 %v2635_v1, 16 }
 0xac8   :  { %v2717_v58 = vcvt.s32.f32 %v2715_v50 }
 0xacd   :  { %v2588_v20 = vpop.xlane.xlu1 %2587 }
 0xace   :  { %v2589_v59 = vcvt.f32.s32 %v2588_v20 }
 0xacf   :  { %2658 = vmin.xlane.f32.xlu1 %v2657_v32 }
 0xad0   :  { %v2592_v60 = vadd.s32 %v2591_v19, %v2589_v59  ;;  %v7378_v19 = vld [vmem:[#allocation64_spill] sm:$0xff]  ;;  %v7379_v59 = vld [vmem:[#allocation17_spill] sm:$0xff] }
 0xad1   :  { %vm1462_vm0 = vcmp.le.f32.partialorder %v7379_v59, %v7378_v19 }
 0xad2   :  { %3631 = vst.msk [vmem:[%s6960_s3 + $0x1f0] sm:$0xff] %vm3568_vm15, %v2592_v60  ;;  %v2669_v60 = vand.u32 65535, %v2668_v2  ;;  %v1590_v0 = vsel %vm1462_vm0, %v4693_v61, 64 }
 0xad3   :  { %v2698_v35 = vsel %vm1007_vm1, %v1590_v0, 2147483647 }
 0xad4   :  { %v2671_v45 = vcvt.s32.f32 %v2669_v60 }
 0xad5   :  { %v2614_v43 = vpop.xlane.xlu1 %2613 }
 0xad6   :  { %vm2615_vm8 = vcmp.eq.f32.partialorder %v2612_v47, %v2614_v43  ;;  %v2620_v62 = vcvt.f32.s32 %v2614_v43 }
 0xad7   :  { %v2616_v36 = vsel %vm2615_vm8, %v2611_v29, inf  ;;  %v2700_v29 = vshra.s32 %v2698_v35, 16 }
 0xad8   :  { %2617 = vmin.xlane.f32.xlu2 %v2616_v36  ;;  %v2621_v16 = vshll.u32 %v2620_v62, 16 }
 0xad9   :  { %v2702_v3 = vcvt.s32.f32 %v2700_v29 }
 0xae0   :  { %2643 = vmin.xlane.f32.xlu2 %v2642_v53 }
 0xb3a   :  { %v2633_v6 = vpop.xlane.xlu1 %2632 }
 0xb3b   :  { %v2634_v22 = vcvt.f32.s32 %v2633_v6 }
 0xb3d   :  { %v2637_v56 = vadd.s32 %v2636_v46, %v2634_v22  ;;  %v7380_v46 = vld [vmem:[#allocation81_spill] sm:$0xff] }
 0xb3e   :  { %v7381_v22 = vld [vmem:[#allocation25_spill] sm:$0xff] }
 0xb3f   :  { %3634 = vst.msk [vmem:[%s6960_s3 + $0x208] sm:$0xff] %vm3568_vm15, %v2637_v56  ;;  %vm1465_vm3 = vcmp.le.f32.partialorder %v7381_v22, %v7380_v46  ;;  %v2714_v56 = vand.u32 65535, %v2713_v11 }
 0xb40   :  { %v1593_v5 = vsel %vm1465_vm3, %v4693_v61, 64 }
 0xb41   :  { %v2716_v27 = vcvt.s32.f32 %v2714_v56  ;;  %v2743_v54 = vsel %vm1007_vm1, %v1593_v5, 2147483647 }
 0xb42   :  { %v2659_v9 = vpop.xlane.xlu1 %2658 }
 0xb43   :  { %vm2660_vm10 = vcmp.eq.f32.partialorder %v2657_v32, %v2659_v9  ;;  %v2665_v49 = vcvt.f32.s32 %v2659_v9 }
 0xb44   :  { %v2661_v38 = vsel %vm2660_vm10, %v2656_v63, inf  ;;  %v2745_v63 = vshra.s32 %v2743_v54, 16 }
 0xb45   :  { %2662 = vmin.xlane.f32.xlu2 %v2661_v38  ;;  %v2666_v47 = vshll.u32 %v2665_v49, 16 }
 0xb46   :  { %v2747_v30 = vcvt.s32.f32 %v2745_v63 }
 0xb4b   :  { %v2618_v44 = vpop.xlane.xlu2 %2617 }
 0xb4c   :  { %v2619_v42 = vcvt.f32.s32 %v2618_v44 }
 0xb4d   :  { %2688 = vmin.xlane.f32.xlu2 %v2687_v25 }
 0xb4e   :  { %v2622_v23 = vadd.s32 %v2621_v16, %v2619_v42  ;;  %v7382_v16 = vld [vmem:[#allocation75_spill] sm:$0xff]  ;;  %v7383_v42 = vld [vmem:[#allocation21_spill] sm:$0xff] }
 0xb4f   :  { %vm1464_vm5 = vcmp.le.f32.partialorder %v7383_v42, %v7382_v16 }
 0xb50   :  { %3633 = vst.msk [vmem:[%s6960_s3 + $0x200] sm:$0xff] %vm3568_vm15, %v2622_v23  ;;  %v2699_v23 = vand.u32 65535, %v2698_v35  ;;  %v1592_v4 = vsel %vm1464_vm5, %v4693_v61, 64 }
 0xb51   :  { %v2728_v51 = vsel %vm1007_vm1, %v1592_v4, 2147483647 }
 0xb52   :  { %v2701_v28 = vcvt.s32.f32 %v2699_v23 }
 0xb53   :  { %v2644_v14 = vpop.xlane.xlu2 %2643 }
 0xb54   :  { %vm2645_vm12 = vcmp.eq.f32.partialorder %v2642_v53, %v2644_v14  ;;  %v2650_v34 = vcvt.f32.s32 %v2644_v14 }
 0xb55   :  { %v2646_v26 = vsel %vm2645_vm12, %v2641_v39, inf  ;;  %v2730_v39 = vshra.s32 %v2728_v51, 16 }
 0xb56   :  { %2647 = vmin.xlane.f32.xlu0 %v2646_v26  ;;  %v2651_v8 = vshll.u32 %v2650_v34, 16 }
 0xb57   :  { %v2732_v2 = vcvt.s32.f32 %v2730_v39 }
 0xb5e   :  { %2673 = vmin.xlane.f32.xlu0 %v2672_v21 }
 0xbb8   :  { %v2663_v48 = vpop.xlane.xlu2 %2662 }
 0xbb9   :  { %v2664_v18 = vcvt.f32.s32 %v2663_v48 }
 0xbbb   :  { %v2667_v55 = vadd.s32 %v2666_v47, %v2664_v18  ;;  %v7384_v47 = vld [vmem:[#allocation91_spill] sm:$0xff] }
 0xbbc   :  { %v7385_v18 = vld [vmem:[#allocation31_spill] sm:$0xff] }
 0xbbd   :  { %3636 = vst.msk [vmem:[%s6960_s3 + $0x218] sm:$0xff] %vm3568_vm15, %v2667_v55  ;;  %vm1467_vm7 = vcmp.le.f32.partialorder %v7385_v18, %v7384_v47  ;;  %v2744_v55 = vand.u32 65535, %v2743_v54 }
 0xbbe   :  { %v1595_v15 = vsel %vm1467_vm7, %v4693_v61, 64 }
 0xbbf   :  { %v2746_v33 = vcvt.s32.f32 %v2744_v55  ;;  %v2773_v31 = vsel %vm1007_vm1, %v1595_v15, 2147483647 }
 0xbc0   :  { %v2689_v24 = vpop.xlane.xlu2 %2688 }
 0xbc1   :  { %vm2690_vm14 = vcmp.eq.f32.partialorder %v2687_v25, %v2689_v24  ;;  %v2695_v36 = vcvt.f32.s32 %v2689_v24 }
 0xbc2   :  { %v2691_v41 = vsel %vm2690_vm14, %v2686_v7, inf  ;;  %v2775_v7 = vshra.s32 %v2773_v31, 16 }
 0xbc3   :  { %2692 = vmin.xlane.f32.xlu0 %v2691_v41  ;;  %v2696_v53 = vshll.u32 %v2695_v36, 16 }
 0xbc4   :  { %v2777_v50 = vcvt.s32.f32 %v2775_v7 }
 0xbc9   :  { %v2648_v37 = vpop.xlane.xlu0 %2647 }
 0xbca   :  { %v2649_v20 = vcvt.f32.s32 %v2648_v37 }
 0xbcb   :  { %2718 = vmin.xlane.f32.xlu0 %v2717_v58 }
 0xbcc   :  { %v2652_v32 = vadd.s32 %v2651_v8, %v2649_v20  ;;  %v7386_v8 = vld [vmem:[#allocation85_spill] sm:$0xff]  ;;  %v7387_v20 = vld [vmem:[#allocation28_spill] sm:$0xff] }
 0xbcd   :  { %vm1466_vm9 = vcmp.le.f32.partialorder %v7387_v20, %v7386_v8 }
 0xbce   :  { %3635 = vst.msk [vmem:[%s6960_s3 + $0x210] sm:$0xff] %vm3568_vm15, %v2652_v32  ;;  %v2729_v32 = vand.u32 65535, %v2728_v51  ;;  %v1594_v19 = vsel %vm1466_vm9, %v4693_v61, 64 }
 0xbcf   :  { %v2758_v0 = vsel %vm1007_vm1, %v1594_v19, 2147483647 }
 0xbd0   :  { %v2731_v60 = vcvt.s32.f32 %v2729_v32 }
 0xbd1   :  { %v2674_v57 = vpop.xlane.xlu0 %2673 }
 0xbd2   :  { %vm2675_vm2 = vcmp.eq.f32.partialorder %v2672_v21, %v2674_v57  ;;  %v2680_v17 = vcvt.f32.s32 %v2674_v57 }
 0xbd3   :  { %v2676_v43 = vsel %vm2675_vm2, %v2671_v45, inf  ;;  %v2760_v45 = vshra.s32 %v2758_v0, 16 }
 0xbd4   :  { %2677 = vmin.xlane.f32.xlu1 %v2676_v43  ;;  %v2681_v62 = vshll.u32 %v2680_v17, 16 }
 0xbd5   :  { %v2762_v35 = vcvt.s32.f32 %v2760_v45 }
 0xbdc   :  { %2703 = vmin.xlane.f32.xlu1 %v2702_v3 }
 0xc36   :  { %v2693_v52 = vpop.xlane.xlu0 %2692 }
 0xc37   :  { %v2694_v1 = vcvt.f32.s32 %v2693_v52 }
 0xc39   :  { %v2697_v6 = vadd.s32 %v2696_v53, %v2694_v1  ;;  %v7388_v53 = vld [vmem:[#allocation103_spill] sm:$0xff]  ;;  %v7389_v1 = vld [vmem:[#allocation41_spill] sm:$0xff] }
 0xc3a   :  { %vm1469_vm11 = vcmp.le.f32.partialorder %v7389_v1, %v7388_v53 }
 0xc3b   :  { %3638 = vst.msk [vmem:[%s6960_s3 + $0x228] sm:$0xff] %vm3568_vm15, %v2697_v6  ;;  %v2774_v6 = vand.u32 65535, %v2773_v31  ;;  %v1597_v46 = vsel %vm1469_vm11, %v4693_v61, 64 }
 0xc3c   :  { %v2803_v5 = vsel %vm1007_vm1, %v1597_v46, 2147483647 }
 0xc3d   :  { %v2776_v56 = vcvt.s32.f32 %v2774_v6 }
 0xc3e   :  { %v2719_v10 = vpop.xlane.xlu0 %2718 }
 0xc3f   :  { %vm2720_vm4 = vcmp.eq.f32.partialorder %v2717_v58, %v2719_v10  ;;  %v2725_v26 = vcvt.f32.s32 %v2719_v10 }
 0xc40   :  { %v2721_v9 = vsel %vm2720_vm4, %v2716_v27, inf  ;;  %v2805_v27 = vshra.s32 %v2803_v5, 16 }
 0xc41   :  { %2722 = vmin.xlane.f32.xlu1 %v2721_v9  ;;  %v2726_v21 = vshll.u32 %v2725_v26, 16 }
 0xc42   :  { %v2807_v63 = vcvt.s32.f32 %v2805_v27 }
 0xc47   :  { %v2678_v38 = vpop.xlane.xlu1 %2677 }
 0xc48   :  { %v2679_v44 = vcvt.f32.s32 %v2678_v38 }
 0xc49   :  { %2748 = vmin.xlane.f32.xlu1 %v2747_v30 }
 0xc4a   :  { %v2682_v25 = vadd.s32 %v2681_v62, %v2679_v44  ;;  %v7390_v62 = vld [vmem:[#allocation99_spill] sm:$0xff]  ;;  %v7391_v44 = vld [vmem:[#allocation37_spill] sm:$0xff] }
 0xc4b   :  { %vm1468_vm13 = vcmp.le.f32.partialorder %v7391_v44, %v7390_v62 }
 0xc4c   :  { %3637 = vst.msk [vmem:[%s6960_s3 + $0x220] sm:$0xff] %vm3568_vm15, %v2682_v25  ;;  %v2759_v25 = vand.u32 65535, %v2758_v0  ;;  %v1596_v16 = vsel %vm1468_vm13, %v4693_v61, 64 }
 0xc4d   :  { %v2788_v4 = vsel %vm1007_vm1, %v1596_v16, 2147483647 }
 0xc4e   :  { %v2761_v23 = vcvt.s32.f32 %v2759_v25 }
 0xc4f   :  { %v2704_v40 = vpop.xlane.xlu1 %2703 }
 0xc50   :  { %vm2705_vm6 = vcmp.eq.f32.partialorder %v2702_v3, %v2704_v40  ;;  %v2710_v11 = vcvt.f32.s32 %v2704_v40 }
 0xc51   :  { %v2706_v14 = vsel %vm2705_vm6, %v2701_v28, inf  ;;  %v2790_v28 = vshra.s32 %v2788_v4, 16 }
 0xc52   :  { %2707 = vmin.xlane.f32.xlu2 %v2706_v14  ;;  %v2711_v34 = vshll.u32 %v2710_v11, 16 }
 0xc53   :  { %v2792_v51 = vcvt.s32.f32 %v2790_v28 }
 0xc5a   :  { %2733 = vmin.xlane.f32.xlu2 %v2732_v2 }
 0xcb4   :  { %v2723_v12 = vpop.xlane.xlu1 %2722 }
 0xcb5   :  { %v2724_v49 = vcvt.f32.s32 %v2723_v12 }
 0xcb7   :  { %v2727_v48 = vadd.s32 %v2726_v21, %v2724_v49  ;;  %v7392_v21 = vld [vmem:[#allocation119_spill] sm:$0xff]  ;;  %v7393_v49 = vld [vmem:[#allocation50_spill] sm:$0xff] }
 0xcb8   :  { %vm1471_vm0 = vcmp.le.f32.partialorder %v7393_v49, %v7392_v21 }
 0xcb9   :  { %3640 = vst.msk [vmem:[%s6960_s3 + $0x238] sm:$0xff] %vm3568_vm15, %v2727_v48  ;;  %v2804_v48 = vand.u32 65535, %v2803_v5  ;;  %v1599_v47 = vsel %vm1471_vm0, %v4693_v61, 64 }
 0xcba   :  { %v2833_v15 = vsel %vm1007_vm1, %v1599_v47, 2147483647 }
 0xcbb   :  { %v2806_v55 = vcvt.s32.f32 %v2804_v48 }
 0xcbc   :  { %v2749_v13 = vpop.xlane.xlu1 %2748 }
 0xcbd   :  { %vm2750_vm8 = vcmp.eq.f32.partialorder %v2747_v30, %v2749_v13  ;;  %v2755_v43 = vcvt.f32.s32 %v2749_v13 }
 0xcbe   :  { %v2751_v24 = vsel %vm2750_vm8, %v2746_v33, inf  ;;  %v2835_v33 = vshra.s32 %v2833_v15, 16 }
 0xcbf   :  { %2752 = vmin.xlane.f32.xlu2 %v2751_v24  ;;  %v2756_v3 = vshll.u32 %v2755_v43, 16 }
 0xcc0   :  { %v2837_v7 = vcvt.s32.f32 %v2835_v33 }
 0xcc5   :  { %v2708_v41 = vpop.xlane.xlu2 %2707 }
 0xcc6   :  { %v2709_v37 = vcvt.f32.s32 %v2708_v41 }
 0xcc7   :  { %2778 = vmin.xlane.f32.xlu2 %v2777_v50 }
 0xcc8   :  { %v2712_v58 = vadd.s32 %v2711_v34, %v2709_v37  ;;  %v7394_v34 = vld [vmem:[#allocation109_spill] sm:$0xff]  ;;  %v7395_v37 = vld [vmem:[#allocation44_spill] sm:$0xff] }
 0xcc9   :  { %vm1470_vm3 = vcmp.le.f32.partialorder %v7395_v37, %v7394_v34 }
 0xcca   :  { %3639 = vst.msk [vmem:[%s6960_s3 + $0x230] sm:$0xff] %vm3568_vm15, %v2712_v58  ;;  %v2789_v58 = vand.u32 65535, %v2788_v4  ;;  %v1598_v8 = vsel %vm1470_vm3, %v4693_v61, 64 }
 0xccb   :  { %v2818_v19 = vsel %vm1007_vm1, %v1598_v8, 2147483647 }
 0xccc   :  { %v2791_v32 = vcvt.s32.f32 %v2789_v58 }
 0xccd   :  { %v2734_v59 = vpop.xlane.xlu2 %2733 }
 0xcce   :  { %vm2735_vm10 = vcmp.eq.f32.partialorder %v2732_v2, %v2734_v59  ;;  %v2740_v54 = vcvt.f32.s32 %v2734_v59 }
 0xccf   :  { %v2736_v57 = vsel %vm2735_vm10, %v2731_v60, inf  ;;  %v2820_v60 = vshra.s32 %v2818_v19, 16 }
 0xcd0   :  { %2737 = vmin.xlane.f32.xlu0 %v2736_v57  ;;  %v2741_v17 = vshll.u32 %v2740_v54, 16 }
 0xcd1   :  { %v2822_v0 = vcvt.s32.f32 %v2820_v60 }
 0xcd8   :  { %2763 = vmin.xlane.f32.xlu0 %v2762_v35 }
 0xd32   :  { %v2753_v29 = vpop.xlane.xlu2 %2752 }
 0xd33   :  { %v2754_v36 = vcvt.f32.s32 %v2753_v29 }
 0xd35   :  { %v2757_v52 = vadd.s32 %v2756_v3, %v2754_v36  ;;  %v7396_v3 = vld [vmem:[#allocation133_spill] sm:$0xff] }
 0xd36   :  { %v7397_v36 = vld [vmem:[#allocation65_spill] sm:$0xff] }
 0xd37   :  { %3642 = vst.msk [vmem:[%s6960_s3 + $0x248] sm:$0xff] %vm3568_vm15, %v2757_v52  ;;  %vm1473_vm5 = vcmp.le.f32.partialorder %v7397_v36, %v7396_v3  ;;  %v2834_v52 = vand.u32 65535, %v2833_v15 }
 0xd38   :  { %v1601_v53 = vsel %vm1473_vm5, %v4693_v61, 64 }
 0xd39   :  { %v2836_v6 = vcvt.s32.f32 %v2834_v52  ;;  %v2863_v46 = vsel %vm1007_vm1, %v1601_v53, 2147483647 }
 0xd3a   :  { %v2779_v22 = vpop.xlane.xlu2 %2778 }
 0xd3b   :  { %vm2780_vm12 = vcmp.eq.f32.partialorder %v2777_v50, %v2779_v22  ;;  %v2785_v14 = vcvt.f32.s32 %v2779_v22 }
 0xd3c   :  { %v2781_v10 = vsel %vm2780_vm12, %v2776_v56, inf  ;;  %v2865_v56 = vshra.s32 %v2863_v46, 16 }
 0xd3d   :  { %2782 = vmin.xlane.f32.xlu0 %v2781_v10  ;;  %v2786_v2 = vshll.u32 %v2785_v14, 16 }
 0xd3e   :  { %v2867_v27 = vcvt.s32.f32 %v2865_v56 }
 0xd43   :  { %v2738_v9 = vpop.xlane.xlu0 %2737 }
 0xd44   :  { %v2739_v38 = vcvt.f32.s32 %v2738_v9 }
 0xd45   :  { %2808 = vmin.xlane.f32.xlu0 %v2807_v63 }
 0xd46   :  { %v2742_v30 = vadd.s32 %v2741_v17, %v2739_v38  ;;  %v7398_v17 = vld [vmem:[#allocation127_spill] sm:$0xff] }
 0xd47   :  { %v7399_v38 = vld [vmem:[#allocation59_spill] sm:$0xff] }
 0xd48   :  { %3641 = vst.msk [vmem:[%s6960_s3 + $0x240] sm:$0xff] %vm3568_vm15, %v2742_v30  ;;  %vm1472_vm7 = vcmp.le.f32.partialorder %v7399_v38, %v7398_v17  ;;  %v2819_v30 = vand.u32 65535, %v2818_v19 }
 0xd49   :  { %v1600_v62 = vsel %vm1472_vm7, %v4693_v61, 64 }
 0xd4a   :  { %v2821_v25 = vcvt.s32.f32 %v2819_v30  ;;  %v2848_v16 = vsel %vm1007_vm1, %v1600_v62, 2147483647 }
 0xd4b   :  { %v2764_v42 = vpop.xlane.xlu0 %2763 }
 0xd4c   :  { %vm2765_vm14 = vcmp.eq.f32.partialorder %v2762_v35, %v2764_v42  ;;  %v2770_v31 = vcvt.f32.s32 %v2764_v42 }
 0xd4d   :  { %v2766_v40 = vsel %vm2765_vm14, %v2761_v23, inf  ;;  %v2850_v23 = vshra.s32 %v2848_v16, 16 }
 0xd4e   :  { %2767 = vmin.xlane.f32.xlu1 %v2766_v40  ;;  %v2771_v11 = vshll.u32 %v2770_v31, 16 }
 0xd4f   :  { %v2852_v4 = vcvt.s32.f32 %v2850_v23 }
 0xd56   :  { %2793 = vmin.xlane.f32.xlu1 %v2792_v51 }
 0xdb0   :  { %v2783_v39 = vpop.xlane.xlu0 %2782 }
 0xdb1   :  { %v2784_v26 = vcvt.f32.s32 %v2783_v39 }
 0xdb3   :  { %v2787_v12 = vadd.s32 %v2786_v2, %v2784_v26  ;;  %v7400_v2 = vld [vmem:[#allocation151_spill] sm:$0xff] }
 0xdb4   :  { %v7401_v26 = vld [vmem:[#allocation79_spill] sm:$0xff] }
 0xdb5   :  { %3644 = vst.msk [vmem:[%s6960_s3 + $0x258] sm:$0xff] %vm3568_vm15, %v2787_v12  ;;  %vm1475_vm9 = vcmp.le.f32.partialorder %v7401_v26, %v7400_v2  ;;  %v2864_v12 = vand.u32 65535, %v2863_v46 }
 0xdb6   :  { %v1603_v21 = vsel %vm1475_vm9, %v4693_v61, 64 }
 0xdb7   :  { %v2866_v48 = vcvt.s32.f32 %v2864_v12  ;;  %v2893_v47 = vsel %vm1007_vm1, %v1603_v21, 2147483647 }
 0xdb8   :  { %v2809_v18 = vpop.xlane.xlu0 %2808 }
 0xdb9   :  { %vm2810_vm2 = vcmp.eq.f32.partialorder %v2807_v63, %v2809_v18  ;;  %v2815_v57 = vcvt.f32.s32 %v2809_v18 }
 0xdba   :  { %v2811_v13 = vsel %vm2810_vm2, %v2806_v55, inf  ;;  %v2895_v55 = vshra.s32 %v2893_v47, 16 }
 0xdbb   :  { %2812 = vmin.xlane.f32.xlu1 %v2811_v13  ;;  %v2816_v35 = vshll.u32 %v2815_v57, 16 }
 0xdbc   :  { %v2897_v33 = vcvt.s32.f32 %v2895_v55 }
 0xdc1   :  { %v2768_v24 = vpop.xlane.xlu1 %2767 }
 0xdc2   :  { %v2769_v41 = vcvt.f32.s32 %v2768_v24 }
 0xdc3   :  { %2838 = vmin.xlane.f32.xlu1 %v2837_v7 }
 0xdc4   :  { %v2772_v50 = vadd.s32 %v2771_v11, %v2769_v41  ;;  %v7402_v11 = vld [vmem:[#allocation142_spill] sm:$0xff]  ;;  %v7403_v41 = vld [vmem:[#allocation72_spill] sm:$0xff] }
 0xdc5   :  { %vm1474_vm11 = vcmp.le.f32.partialorder %v7403_v41, %v7402_v11 }
 0xdc6   :  { %3643 = vst.msk [vmem:[%s6960_s3 + $0x250] sm:$0xff] %vm3568_vm15, %v2772_v50  ;;  %v2849_v50 = vand.u32 65535, %v2848_v16  ;;  %v1602_v34 = vsel %vm1474_vm11, %v4693_v61, 64 }
 0xdc7   :  { %v2878_v8 = vsel %vm1007_vm1, %v1602_v34, 2147483647 }
 0xdc8   :  { %v2851_v58 = vcvt.s32.f32 %v2849_v50 }
 0xdc9   :  { %v2794_v20 = vpop.xlane.xlu1 %2793 }
 0xdca   :  { %vm2795_vm4 = vcmp.eq.f32.partialorder %v2792_v51, %v2794_v20  ;;  %v2800_v5 = vcvt.f32.s32 %v2794_v20 }
 0xdcb   :  { %v2796_v59 = vsel %vm2795_vm4, %v2791_v32, inf  ;;  %v2880_v32 = vshra.s32 %v2878_v8, 16 }
 0xdcc   :  { %2797 = vmin.xlane.f32.xlu2 %v2796_v59  ;;  %v2801_v54 = vshll.u32 %v2800_v5, 16 }
 0xdcd   :  { %v2882_v19 = vcvt.s32.f32 %v2880_v32 }
 0xdd4   :  { %2823 = vmin.xlane.f32.xlu2 %v2822_v0 }
 0xe2e   :  { %v2813_v45 = vpop.xlane.xlu1 %2812 }
 0xe2f   :  { %v2814_v43 = vcvt.f32.s32 %v2813_v45 }
 0xe31   :  { %v2817_v29 = vadd.s32 %v2816_v35, %v2814_v43  ;;  %v7404_v35 = vld [vmem:[#allocation166_spill] sm:$0xff]  ;;  %v7405_v43 = vld [vmem:[#allocation92_spill] sm:$0xff] }
 0xe32   :  { %vm1477_vm13 = vcmp.le.f32.partialorder %v7405_v43, %v7404_v35 }
 0xe33   :  { %3646 = vst.msk [vmem:[%s6960_s3 + $0x268] sm:$0xff] %vm3568_vm15, %v2817_v29  ;;  %v2894_v29 = vand.u32 65535, %v2893_v47  ;;  %v1605_v3 = vsel %vm1477_vm13, %v4693_v61, 64 }
 0xe34   :  { %v2923_v53 = vsel %vm1007_vm1, %v1605_v3, 2147483647 }
 0xe35   :  { %v2896_v52 = vcvt.s32.f32 %v2894_v29 }
 0xe36   :  { %v2839_v1 = vpop.xlane.xlu1 %2838 }
 0xe37   :  { %vm2840_vm6 = vcmp.eq.f32.partialorder %v2837_v7, %v2839_v1  ;;  %v2845_v40 = vcvt.f32.s32 %v2839_v1 }
 0xe38   :  { %v2841_v22 = vsel %vm2840_vm6, %v2836_v6, inf  ;;  %v2925_v6 = vshra.s32 %v2923_v53, 16 }
 0xe39   :  { %2842 = vmin.xlane.f32.xlu2 %v2841_v22  ;;  %v2846_v51 = vshll.u32 %v2845_v40, 16 }
 0xe3a   :  { %v2927_v56 = vcvt.s32.f32 %v2925_v6 }
 0xe3f   :  { %v2798_v10 = vpop.xlane.xlu2 %2797 }
 0xe40   :  { %v2799_v9 = vcvt.f32.s32 %v2798_v10 }
 0xe41   :  { %2868 = vmin.xlane.f32.xlu2 %v2867_v27 }
 0xe42   :  { %v2802_v63 = vadd.s32 %v2801_v54, %v2799_v9  ;;  %v7406_v54 = vld [vmem:[#allocation157_spill] sm:$0xff]  ;;  %v7407_v9 = vld [vmem:[#allocation83_spill] sm:$0xff] }
 0xe43   :  { %vm1476_vm0 = vcmp.le.f32.partialorder %v7407_v9, %v7406_v54 }
 0xe44   :  { %3645 = vst.msk [vmem:[%s6960_s3 + $0x260] sm:$0xff] %vm3568_vm15, %v2802_v63  ;;  %v2879_v63 = vand.u32 65535, %v2878_v8  ;;  %v1604_v17 = vsel %vm1476_vm0, %v4693_v61, 64 }
 0xe45   :  { %v2908_v62 = vsel %vm1007_vm1, %v1604_v17, 2147483647 }
 0xe46   :  { %v2881_v30 = vcvt.s32.f32 %v2879_v63 }
 0xe47   :  { %v2824_v44 = vpop.xlane.xlu2 %2823 }
 0xe48   :  { %vm2825_vm8 = vcmp.eq.f32.partialorder %v2822_v0, %v2824_v44  ;;  %v2830_v15 = vcvt.f32.s32 %v2824_v44 }
 0xe49   :  { %v2826_v42 = vsel %vm2825_vm8, %v2821_v25, inf  ;;  %v2910_v25 = vshra.s32 %v2908_v62, 16 }
 0xe4a   :  { %2827 = vmin.xlane.f32.xlu0 %v2826_v42  ;;  %v2831_v31 = vshll.u32 %v2830_v15, 16 }
 0xe4b   :  { %v2912_v16 = vcvt.s32.f32 %v2910_v25 }
 0xe52   :  { %2853 = vmin.xlane.f32.xlu0 %v2852_v4 }
 0xeac   :  { %v2843_v28 = vpop.xlane.xlu2 %2842 }
 0xead   :  { %v2844_v14 = vcvt.f32.s32 %v2843_v28 }
 0xeaf   :  { %v2847_v39 = vadd.s32 %v2846_v51, %v2844_v14  ;;  %v7408_v51 = vld [vmem:[#allocation177_spill] sm:$0xff]  ;;  %v7409_v14 = vld [vmem:[#allocation108_spill] sm:$0xff] }
 0xeb0   :  { %vm1479_vm3 = vcmp.le.f32.partialorder %v7409_v14, %v7408_v51 }
 0xeb1   :  { %3648 = vst.msk [vmem:[%s6960_s3 + $0x278] sm:$0xff] %vm3568_vm15, %v2847_v39  ;;  %v2924_v39 = vand.u32 65535, %v2923_v53  ;;  %v1607_v2 = vsel %vm1479_vm3, %v4693_v61, 64 }
 0xeb2   :  { %v2953_v21 = vsel %vm1007_vm1, %v1607_v2, 2147483647 }
 0xeb3   :  { %v2926_v12 = vcvt.s32.f32 %v2924_v39 }
 0xeb4   :  { %v2869_v49 = vpop.xlane.xlu2 %2868 }
 0xeb5   :  { %vm2870_vm10 = vcmp.eq.f32.partialorder %v2867_v27, %v2869_v49  ;;  %v2875_v59 = vcvt.f32.s32 %v2869_v49 }
 0xeb6   :  { %v2871_v18 = vsel %vm2870_vm10, %v2866_v48, inf  ;;  %v2955_v48 = vshra.s32 %v2953_v21, 16 }
 0xeb7   :  { %2872 = vmin.xlane.f32.xlu0 %v2871_v18  ;;  %v2876_v0 = vshll.u32 %v2875_v59, 16 }
 0xeb8   :  { %v2957_v55 = vcvt.s32.f32 %v2955_v48 }
 0xebd   :  { %v2828_v13 = vpop.xlane.xlu0 %2827 }
 0xebe   :  { %v2829_v24 = vcvt.f32.s32 %v2828_v13 }
 0xebf   :  { %2898 = vmin.xlane.f32.xlu0 %v2897_v33 }
 0xec0   :  { %v2832_v7 = vadd.s32 %v2831_v31, %v2829_v24  ;;  %v7410_v31 = vld [vmem:[#allocation171_spill] sm:$0xff]  ;;  %v7411_v24 = vld [vmem:[#allocation102_spill] sm:$0xff] }
 0xec1   :  { %vm1478_vm5 = vcmp.le.f32.partialorder %v7411_v24, %v7410_v31 }
 0xec2   :  { %3647 = vst.msk [vmem:[%s6960_s3 + $0x270] sm:$0xff] %vm3568_vm15, %v2832_v7  ;;  %v2909_v7 = vand.u32 65535, %v2908_v62  ;;  %v1606_v11 = vsel %vm1478_vm5, %v4693_v61, 64 }
 0xec3   :  { %v2938_v34 = vsel %vm1007_vm1, %v1606_v11, 2147483647 }
 0xec4   :  { %v2911_v50 = vcvt.s32.f32 %v2909_v7 }
 0xec5   :  { %v2854_v37 = vpop.xlane.xlu0 %2853 }
 0xec6   :  { %vm2855_vm12 = vcmp.eq.f32.partialorder %v2852_v4, %v2854_v37  ;;  %v2860_v46 = vcvt.f32.s32 %v2854_v37 }
 0xec7   :  { %v2856_v20 = vsel %vm2855_vm12, %v2851_v58, inf  ;;  %v2940_v58 = vshra.s32 %v2938_v34, 16 }
 0xec8   :  { %2857 = vmin.xlane.f32.xlu1 %v2856_v20  ;;  %v2861_v5 = vshll.u32 %v2860_v46, 16 }
 0xec9   :  { %v2942_v8 = vcvt.s32.f32 %v2940_v58 }
 0xed0   :  { %2883 = vmin.xlane.f32.xlu1 %v2882_v19 }
 0xf2a   :  { %v2873_v60 = vpop.xlane.xlu0 %2872 }
 0xf2b   :  { %v2874_v57 = vcvt.f32.s32 %v2873_v60 }
 0xf2d   :  { %v2877_v45 = vadd.s32 %v2876_v0, %v2874_v57  ;;  %v7412_v0 = vld [vmem:[#allocation188_spill] sm:$0xff]  ;;  %v7413_v57 = vld [vmem:[#allocation126_spill] sm:$0xff] }
 0xf2e   :  { %vm1481_vm7 = vcmp.le.f32.partialorder %v7413_v57, %v7412_v0 }
 0xf2f   :  { %3650 = vst.msk [vmem:[%s6960_s3 + $0x288] sm:$0xff] %vm3568_vm15, %v2877_v45  ;;  %v2954_v45 = vand.u32 65535, %v2953_v21  ;;  %v1609_v35 = vsel %vm1481_vm7, %v4693_v61, 64 }
 0xf30   :  { %v2983_v3 = vsel %vm1007_vm1, %v1609_v35, 2147483647 }
 0xf31   :  { %v2956_v29 = vcvt.s32.f32 %v2954_v45 }
 0xf32   :  { %v2899_v36 = vpop.xlane.xlu0 %2898 }
 0xf33   :  { %vm2900_vm14 = vcmp.eq.f32.partialorder %v2897_v33, %v2899_v36  ;;  %v2905_v42 = vcvt.f32.s32 %v2899_v36 }
 0xf34   :  { %v2901_v1 = vsel %vm2900_vm14, %v2896_v52, inf  ;;  %v2985_v52 = vshra.s32 %v2983_v3, 16 }
 0xf35   :  { %2902 = vmin.xlane.f32.xlu1 %v2901_v1  ;;  %v2906_v4 = vshll.u32 %v2905_v42, 16 }
 0xf36   :  { %v2987_v6 = vcvt.s32.f32 %v2985_v52 }
 0xf3b   :  { %v2858_v22 = vpop.xlane.xlu1 %2857 }
 0xf3c   :  { %v2859_v10 = vcvt.f32.s32 %v2858_v22 }
 0xf3d   :  { %2928 = vmin.xlane.f32.xlu1 %v2927_v56 }
 0xf3e   :  { %v2862_v27 = vadd.s32 %v2861_v5, %v2859_v10  ;;  %v7414_v5 = vld [vmem:[#allocation181_spill] sm:$0xff]  ;;  %v7415_v10 = vld [vmem:[#allocation116_spill] sm:$0xff] }
 0xf3f   :  { %vm1480_vm9 = vcmp.le.f32.partialorder %v7415_v10, %v7414_v5 }
 0xf40   :  { %3649 = vst.msk [vmem:[%s6960_s3 + $0x280] sm:$0xff] %vm3568_vm15, %v2862_v27  ;;  %v2939_v27 = vand.u32 65535, %v2938_v34  ;;  %v1608_v54 = vsel %vm1480_vm9, %v4693_v61, 64 }
 0xf41   :  { %v2968_v17 = vsel %vm1007_vm1, %v1608_v54, 2147483647 }
 0xf42   :  { %v2941_v63 = vcvt.s32.f32 %v2939_v27 }
 0xf43   :  { %v2884_v38 = vpop.xlane.xlu1 %2883 }
 0xf44   :  { %vm2885_vm2 = vcmp.eq.f32.partialorder %v2882_v19, %v2884_v38  ;;  %v2890_v47 = vcvt.f32.s32 %v2884_v38 }
 0xf45   :  { %v2886_v44 = vsel %vm2885_vm2, %v2881_v30, inf  ;;  %v2970_v30 = vshra.s32 %v2968_v17, 16 }
 0xf46   :  { %2887 = vmin.xlane.f32.xlu2 %v2886_v44  ;;  %v2891_v15 = vshll.u32 %v2890_v47, 16 }
 0xf47   :  { %v2972_v62 = vcvt.s32.f32 %v2970_v30 }
 0xf4e   :  { %2913 = vmin.xlane.f32.xlu2 %v2912_v16 }
 0xfa8   :  { %v2903_v23 = vpop.xlane.xlu1 %2902 }
 0xfa9   :  { %v2904_v40 = vcvt.f32.s32 %v2903_v23 }
 0xfab   :  { %v2907_v28 = vadd.s32 %v2906_v4, %v2904_v40  ;;  %v7416_v4 = vld [vmem:[#allocation193_spill] sm:$0xff]  ;;  %v7417_v40 = vld [vmem:[#allocation139_spill] sm:$0xff] }
 0xfac   :  { %vm1483_vm11 = vcmp.le.f32.partialorder %v7417_v40, %v7416_v4 }
 0xfad   :  { %3652 = vst.msk [vmem:[%s6960_s3 + $0x298] sm:$0xff] %vm3568_vm15, %v2907_v28  ;;  %v2984_v28 = vand.u32 65535, %v2983_v3  ;;  %v1611_v51 = vsel %vm1483_vm11, %v4693_v61, 64 }
 0xfae   :  { %v3013_v2 = vsel %vm1007_vm1, %v1611_v51, 2147483647 }
 0xfaf   :  { %v2986_v39 = vcvt.s32.f32 %v2984_v28 }
 0xfb0   :  { %v2929_v26 = vpop.xlane.xlu1 %2928 }
 0xfb1   :  { %vm2930_vm4 = vcmp.eq.f32.partialorder %v2927_v56, %v2929_v26  ;;  %v2935_v20 = vcvt.f32.s32 %v2929_v26 }
 0xfb2   :  { %v2931_v49 = vsel %vm2930_vm4, %v2926_v12, inf  ;;  %v3015_v12 = vshra.s32 %v3013_v2, 16 }
 0xfb3   :  { %2932 = vmin.xlane.f32.xlu2 %v2931_v49  ;;  %v2936_v19 = vshll.u32 %v2935_v20, 16 }
 0xfb4   :  { %v3017_v48 = vcvt.s32.f32 %v3015_v12 }
 0xfb9   :  { %v2888_v18 = vpop.xlane.xlu2 %2887 }
 0xfba   :  { %v2889_v13 = vcvt.f32.s32 %v2888_v18 }
 0xfbb   :  { %2958 = vmin.xlane.f32.xlu2 %v2957_v55 }
 0xfbc   :  { %v2892_v33 = vadd.s32 %v2891_v15, %v2889_v13  ;;  %v7418_v15 = vld [vmem:[#allocation190_spill] sm:$0xff] }
 0xfbd   :  { %v7419_v13 = vld [vmem:[#allocation130_spill] sm:$0xff] }
 0xfbe   :  { %3651 = vst.msk [vmem:[%s6960_s3 + $0x290] sm:$0xff] %vm3568_vm15, %v2892_v33  ;;  %vm1482_vm13 = vcmp.le.f32.partialorder %v7419_v13, %v7418_v15  ;;  %v2969_v33 = vand.u32 65535, %v2968_v17 }
 0xfbf   :  { %v1610_v31 = vsel %vm1482_vm13, %v4693_v61, 64 }
 0xfc0   :  { %v2971_v7 = vcvt.s32.f32 %v2969_v33  ;;  %v2998_v11 = vsel %vm1007_vm1, %v1610_v31, 2147483647 }
 0xfc1   :  { %v2914_v41 = vpop.xlane.xlu2 %2913 }
 0xfc2   :  { %vm2915_vm6 = vcmp.eq.f32.partialorder %v2912_v16, %v2914_v41  ;;  %v2920_v53 = vcvt.f32.s32 %v2914_v41 }
 0xfc3   :  { %v2916_v37 = vsel %vm2915_vm6, %v2911_v50, inf  ;;  %v3000_v50 = vshra.s32 %v2998_v11, 16 }
 0xfc4   :  { %2917 = vmin.xlane.f32.xlu0 %v2916_v37  ;;  %v2921_v46 = vshll.u32 %v2920_v53, 16 }
 0xfc5   :  { %v3002_v34 = vcvt.s32.f32 %v3000_v50 }
 0xfcc   :  { %2943 = vmin.xlane.f32.xlu0 %v2942_v8 }
0x1026   :  { %v2933_v32 = vpop.xlane.xlu2 %2932 }
0x1027   :  { %v2934_v59 = vcvt.f32.s32 %v2933_v32 }
0x1029   :  { %v2937_v60 = vadd.s32 %v2936_v19, %v2934_v59  ;;  %v7420_v19 = vld [vmem:[#allocation199_spill] sm:$0xff]  ;;  %v7421_v59 = vld [vmem:[#allocation156_spill] sm:$0xff] }
0x102a   :  { %vm1485_vm0 = vcmp.le.f32.partialorder %v7421_v59, %v7420_v19 }
0x102b   :  { %3654 = vst.msk [vmem:[%s6960_s3 + $0x2a8] sm:$0xff] %vm3568_vm15, %v2937_v60  ;;  %v3014_v60 = vand.u32 65535, %v3013_v2  ;;  %v1613_v0 = vsel %vm1485_vm0, %v4693_v61, 64 }
0x102c   :  { %v3043_v35 = vsel %vm1007_vm1, %v1613_v0, 2147483647 }
0x102d   :  { %v3016_v45 = vcvt.s32.f32 %v3014_v60 }
0x102e   :  { %v2959_v43 = vpop.xlane.xlu2 %2958 }
0x102f   :  { %vm2960_vm8 = vcmp.eq.f32.partialorder %v2957_v55, %v2959_v43  ;;  %v2965_v44 = vcvt.f32.s32 %v2959_v43 }
0x1030   :  { %v2961_v36 = vsel %vm2960_vm8, %v2956_v29, inf  ;;  %v3045_v29 = vshra.s32 %v3043_v35, 16 }
0x1031   :  { %2962 = vmin.xlane.f32.xlu0 %v2961_v36  ;;  %v2966_v16 = vshll.u32 %v2965_v44, 16 }
0x1032   :  { %v3047_v52 = vcvt.s32.f32 %v3045_v29 }
0x1037   :  { %v2918_v1 = vpop.xlane.xlu0 %2917 }
0x1038   :  { %v2919_v22 = vcvt.f32.s32 %v2918_v1 }
0x1039   :  { %2988 = vmin.xlane.f32.xlu0 %v2987_v6 }
0x103a   :  { %v2922_v56 = vadd.s32 %v2921_v46, %v2919_v22  ;;  %v7422_v46 = vld [vmem:[#allocation197_spill] sm:$0xff]  ;;  %v7423_v22 = vld [vmem:[#allocation150_spill] sm:$0xff] }
0x103b   :  { %vm1484_vm3 = vcmp.le.f32.partialorder %v7423_v22, %v7422_v46 }
0x103c   :  { %3653 = vst.msk [vmem:[%s6960_s3 + $0x2a0] sm:$0xff] %vm3568_vm15, %v2922_v56  ;;  %v2999_v56 = vand.u32 65535, %v2998_v11  ;;  %v1612_v5 = vsel %vm1484_vm3, %v4693_v61, 64 }
0x103d   :  { %v3028_v54 = vsel %vm1007_vm1, %v1612_v5, 2147483647 }
0x103e   :  { %v3001_v27 = vcvt.s32.f32 %v2999_v56 }
0x103f   :  { %v2944_v9 = vpop.xlane.xlu0 %2943 }
0x1040   :  { %vm2945_vm10 = vcmp.eq.f32.partialorder %v2942_v8, %v2944_v9  ;;  %v2950_v21 = vcvt.f32.s32 %v2944_v9 }
0x1041   :  { %v2946_v38 = vsel %vm2945_vm10, %v2941_v63, inf  ;;  %v3030_v63 = vshra.s32 %v3028_v54, 16 }
0x1042   :  { %2947 = vmin.xlane.f32.xlu1 %v2946_v38  ;;  %v2951_v47 = vshll.u32 %v2950_v21, 16 }
0x1043   :  { %v3032_v17 = vcvt.s32.f32 %v3030_v63 }
0x104a   :  { %2973 = vmin.xlane.f32.xlu1 %v2972_v62 }
0x10a4   :  { %v2963_v25 = vpop.xlane.xlu0 %2962 }
0x10a5   :  { %v2964_v42 = vcvt.f32.s32 %v2963_v25 }
0x10a7   :  { %v2967_v23 = vadd.s32 %v2966_v16, %v2964_v42  ;;  %v7424_v16 = vld [vmem:[#allocation208_spill] sm:$0xff]  ;;  %v7425_v42 = vld [vmem:[#allocation174_spill] sm:$0xff] }
0x10a8   :  { %vm1487_vm5 = vcmp.le.f32.partialorder %v7425_v42, %v7424_v16 }
0x10a9   :  { %3656 = vst.msk [vmem:[%s6960_s3 + $0x2b8] sm:$0xff] %vm3568_vm15, %v2967_v23  ;;  %v3044_v23 = vand.u32 65535, %v3043_v35  ;;  %v1615_v4 = vsel %vm1487_vm5, %v4693_v61, 64 }
0x10aa   :  { %v3073_v51 = vsel %vm1007_vm1, %v1615_v4, 2147483647 }
0x10ab   :  { %v3046_v28 = vcvt.s32.f32 %v3044_v23 }
0x10ac   :  { %v2989_v14 = vpop.xlane.xlu0 %2988 }
0x10ad   :  { %vm2990_vm12 = vcmp.eq.f32.partialorder %v2987_v6, %v2989_v14  ;;  %v2995_v37 = vcvt.f32.s32 %v2989_v14 }
0x10ae   :  { %v2991_v26 = vsel %vm2990_vm12, %v2986_v39, inf  ;;  %v3075_v39 = vshra.s32 %v3073_v51, 16 }
0x10af   :  { %2992 = vmin.xlane.f32.xlu1 %v2991_v26  ;;  %v2996_v8 = vshll.u32 %v2995_v37, 16 }
0x10b0   :  { %v3077_v12 = vcvt.s32.f32 %v3075_v39 }
0x10b5   :  { %v2948_v49 = vpop.xlane.xlu1 %2947 }
0x10b6   :  { %v2949_v18 = vcvt.f32.s32 %v2948_v49 }
0x10b7   :  { %3018 = vmin.xlane.f32.xlu1 %v3017_v48 }
0x10b8   :  { %v2952_v55 = vadd.s32 %v2951_v47, %v2949_v18  ;;  %v7426_v47 = vld [vmem:[#allocation202_spill] sm:$0xff]  ;;  %v7427_v18 = vld [vmem:[#allocation164_spill] sm:$0xff] }
0x10b9   :  { %vm1486_vm7 = vcmp.le.f32.partialorder %v7427_v18, %v7426_v47 }
0x10ba   :  { %3655 = vst.msk [vmem:[%s6960_s3 + $0x2b0] sm:$0xff] %vm3568_vm15, %v2952_v55  ;;  %v3029_v55 = vand.u32 65535, %v3028_v54  ;;  %v1614_v15 = vsel %vm1486_vm7, %v4693_v61, 64 }
0x10bb   :  { %v3058_v31 = vsel %vm1007_vm1, %v1614_v15, 2147483647 }
0x10bc   :  { %v3031_v33 = vcvt.s32.f32 %v3029_v55 }
0x10bd   :  { %v2974_v24 = vpop.xlane.xlu1 %2973 }
0x10be   :  { %vm2975_vm14 = vcmp.eq.f32.partialorder %v2972_v62, %v2974_v24  ;;  %v2980_v3 = vcvt.f32.s32 %v2974_v24 }
0x10bf   :  { %v2976_v41 = vsel %vm2975_vm14, %v2971_v7, inf  ;;  %v3060_v7 = vshra.s32 %v3058_v31, 16 }
0x10c0   :  { %2977 = vmin.xlane.f32.xlu2 %v2976_v41  ;;  %v2981_v53 = vshll.u32 %v2980_v3, 16 }
0x10c1   :  { %v3062_v11 = vcvt.s32.f32 %v3060_v7 }
0x10c8   :  { %3003 = vmin.xlane.f32.xlu2 %v3002_v34 }
0x1122   :  { %v2993_v58 = vpop.xlane.xlu1 %2992 }
0x1123   :  { %v2994_v20 = vcvt.f32.s32 %v2993_v58 }
0x1125   :  { %v2997_v32 = vadd.s32 %v2996_v8, %v2994_v20  ;;  %v7428_v8 = vld [vmem:[#allocation39_spill] sm:$0xff]  ;;  %v7429_v20 = vld [vmem:[#allocation5_spill] sm:$0xff] }
0x1126   :  { %vm1489_vm9 = vcmp.le.f32.partialorder %v7429_v20, %v7428_v8 }
0x1127   :  { %3658 = vst.msk [vmem:[%s6960_s3 + $0x2c8] sm:$0xff] %vm3568_vm15, %v2997_v32  ;;  %v3074_v32 = vand.u32 65535, %v3073_v51  ;;  %v1617_v19 = vsel %vm1489_vm9, %v4693_v61, 64 }
0x1128   :  { %v3103_v0 = vsel %vm1007_vm1, %v1617_v19, 2147483647 }
0x1129   :  { %v3076_v60 = vcvt.s32.f32 %v3074_v32 }
0x112a   :  { %v3019_v57 = vpop.xlane.xlu1 %3018 }
0x112b   :  { %vm3020_vm2 = vcmp.eq.f32.partialorder %v3017_v48, %v3019_v57  ;;  %v3025_v38 = vcvt.f32.s32 %v3019_v57 }
0x112c   :  { %v3021_v43 = vsel %vm3020_vm2, %v3016_v45, inf  ;;  %v3105_v45 = vshra.s32 %v3103_v0, 16 }
0x112d   :  { %3022 = vmin.xlane.f32.xlu2 %v3021_v43  ;;  %v3026_v62 = vshll.u32 %v3025_v38, 16 }
0x112e   :  { %v3107_v29 = vcvt.s32.f32 %v3105_v45 }
0x1133   :  { %v2978_v36 = vpop.xlane.xlu2 %2977 }
0x1134   :  { %v2979_v1 = vcvt.f32.s32 %v2978_v36 }
0x1135   :  { %3048 = vmin.xlane.f32.xlu2 %v3047_v52 }
0x1136   :  { %v2982_v6 = vadd.s32 %v2981_v53, %v2979_v1  ;;  %v7430_v53 = vld [vmem:[#allocation35_spill] sm:$0xff] }
0x1137   :  { %v7431_v1 = vld [vmem:[#allocation3_spill] sm:$0xff] }
0x1138   :  { %3657 = vst.msk [vmem:[%s6960_s3 + $0x2c0] sm:$0xff] %vm3568_vm15, %v2982_v6  ;;  %vm1488_vm11 = vcmp.le.f32.partialorder %v7431_v1, %v7430_v53  ;;  %v3059_v6 = vand.u32 65535, %v3058_v31 }
0x1139   :  { %v1616_v46 = vsel %vm1488_vm11, %v4693_v61, 64 }
0x113a   :  { %v3061_v56 = vcvt.s32.f32 %v3059_v6  ;;  %v3088_v5 = vsel %vm1007_vm1, %v1616_v46, 2147483647 }
0x113b   :  { %v3004_v10 = vpop.xlane.xlu2 %3003 }
0x113c   :  { %vm3005_vm4 = vcmp.eq.f32.partialorder %v3002_v34, %v3004_v10  ;;  %v3010_v2 = vcvt.f32.s32 %v3004_v10 }
0x113d   :  { %v3006_v9 = vsel %vm3005_vm4, %v3001_v27, inf  ;;  %v3090_v27 = vshra.s32 %v3088_v5, 16 }
0x113e   :  { %3007 = vmin.xlane.f32.xlu0 %v3006_v9  ;;  %v3011_v21 = vshll.u32 %v3010_v2, 16 }
0x113f   :  { %v3092_v54 = vcvt.s32.f32 %v3090_v27 }
0x1146   :  { %3033 = vmin.xlane.f32.xlu0 %v3032_v17 }
0x11a0   :  { %v3023_v30 = vpop.xlane.xlu2 %3022 }
0x11a1   :  { %v3024_v44 = vcvt.f32.s32 %v3023_v30 }
0x11a3   :  { %v3027_v25 = vadd.s32 %v3026_v62, %v3024_v44  ;;  %v7432_v62 = vld [vmem:[#allocation49_spill] sm:$0xff]  ;;  %v7433_v44 = vld [vmem:[#allocation8_spill] sm:$0xff] }
0x11a4   :  { %vm1491_vm13 = vcmp.le.f32.partialorder %v7433_v44, %v7432_v62 }
0x11a5   :  { %3660 = vst.msk [vmem:[%s6960_s3 + $0x2d8] sm:$0xff] %vm3568_vm15, %v3027_v25  ;;  %v3104_v25 = vand.u32 65535, %v3103_v0  ;;  %v1619_v16 = vsel %vm1491_vm13, %v4693_v61, 64 }
0x11a6   :  { %v3133_v4 = vsel %vm1007_vm1, %v1619_v16, 2147483647 }
0x11a7   :  { %v3106_v23 = vcvt.s32.f32 %v3104_v25 }
0x11a8   :  { %v3049_v40 = vpop.xlane.xlu2 %3048 }
0x11a9   :  { %vm3050_vm6 = vcmp.eq.f32.partialorder %v3047_v52, %v3049_v40  ;;  %v3055_v41 = vcvt.f32.s32 %v3049_v40 }
0x11aa   :  { %v3051_v14 = vsel %vm3050_vm6, %v3046_v28, inf  ;;  %v3135_v28 = vshra.s32 %v3133_v4, 16 }
0x11ab   :  { %3052 = vmin.xlane.f32.xlu0 %v3051_v14  ;;  %v3056_v34 = vshll.u32 %v3055_v41, 16 }
0x11ac   :  { %v3137_v39 = vcvt.s32.f32 %v3135_v28 }
0x11b1   :  { %v3008_v26 = vpop.xlane.xlu0 %3007 }
0x11b2   :  { %v3009_v49 = vcvt.f32.s32 %v3008_v26 }
0x11b3   :  { %3078 = vmin.xlane.f32.xlu0 %v3077_v12 }
0x11b4   :  { %v3012_v48 = vadd.s32 %v3011_v21, %v3009_v49  ;;  %v7434_v21 = vld [vmem:[#allocation42_spill] sm:$0xff] }
0x11b5   :  { %v7435_v49 = vld [vmem:[#allocation6_spill] sm:$0xff] }
0x11b6   :  { %3659 = vst.msk [vmem:[%s6960_s3 + $0x2d0] sm:$0xff] %vm3568_vm15, %v3012_v48  ;;  %vm1490_vm0 = vcmp.le.f32.partialorder %v7435_v49, %v7434_v21  ;;  %v3089_v48 = vand.u32 65535, %v3088_v5 }
0x11b7   :  { %v1618_v47 = vsel %vm1490_vm0, %v4693_v61, 64 }
0x11b8   :  { %v3091_v55 = vcvt.s32.f32 %v3089_v48  ;;  %v3118_v15 = vsel %vm1007_vm1, %v1618_v47, 2147483647 }
0x11b9   :  { %v3034_v13 = vpop.xlane.xlu0 %3033 }
0x11ba   :  { %vm3035_vm8 = vcmp.eq.f32.partialorder %v3032_v17, %v3034_v13  ;;  %v3040_v35 = vcvt.f32.s32 %v3034_v13 }
0x11bb   :  { %v3036_v24 = vsel %vm3035_vm8, %v3031_v33, inf  ;;  %v3120_v33 = vshra.s32 %v3118_v15, 16 }
0x11bc   :  { %3037 = vmin.xlane.f32.xlu1 %v3036_v24  ;;  %v3041_v3 = vshll.u32 %v3040_v35, 16 }
0x11bd   :  { %v3122_v31 = vcvt.s32.f32 %v3120_v33 }
0x11c4   :  { %3063 = vmin.xlane.f32.xlu1 %v3062_v11 }
0x121e   :  { %v3053_v50 = vpop.xlane.xlu0 %3052 }
0x121f   :  { %v3054_v37 = vcvt.f32.s32 %v3053_v50 }
0x1221   :  { %v3057_v58 = vadd.s32 %v3056_v34, %v3054_v37  ;;  %v7436_v34 = vld [vmem:[#allocation60_spill] sm:$0xff]  ;;  %v7437_v37 = vld [vmem:[#allocation15_spill] sm:$0xff] }
0x1222   :  { %vm1493_vm3 = vcmp.le.f32.partialorder %v7437_v37, %v7436_v34 }
0x1223   :  { %3662 = vst.msk [vmem:[%s6960_s3 + $0x2e8] sm:$0xff] %vm3568_vm15, %v3057_v58  ;;  %v3134_v58 = vand.u32 65535, %v3133_v4  ;;  %v1621_v8 = vsel %vm1493_vm3, %v4693_v61, 64 }
0x1224   :  { %v3163_v19 = vsel %vm1007_vm1, %v1621_v8, 2147483647 }
0x1225   :  { %v3136_v32 = vcvt.s32.f32 %v3134_v58 }
0x1226   :  { %v3079_v59 = vpop.xlane.xlu0 %3078 }
0x1227   :  { %vm3080_vm10 = vcmp.eq.f32.partialorder %v3077_v12, %v3079_v59  ;;  %v3085_v9 = vcvt.f32.s32 %v3079_v59 }
0x1228   :  { %v3081_v57 = vsel %vm3080_vm10, %v3076_v60, inf  ;;  %v3165_v60 = vshra.s32 %v3163_v19, 16 }
0x1229   :  { %3082 = vmin.xlane.f32.xlu1 %v3081_v57  ;;  %v3086_v17 = vshll.u32 %v3085_v9, 16 }
0x122a   :  { %v3167_v45 = vcvt.s32.f32 %v3165_v60 }
0x122f   :  { %v3038_v43 = vpop.xlane.xlu1 %3037 }
0x1230   :  { %v3039_v36 = vcvt.f32.s32 %v3038_v43 }
0x1231   :  { %3108 = vmin.xlane.f32.xlu1 %v3107_v29 }
0x1232   :  { %v3042_v52 = vadd.s32 %v3041_v3, %v3039_v36  ;;  %v7438_v3 = vld [vmem:[#allocation57_spill] sm:$0xff]  ;;  %v7439_v36 = vld [vmem:[#allocation12_spill] sm:$0xff] }
0x1233   :  { %vm1492_vm5 = vcmp.le.f32.partialorder %v7439_v36, %v7438_v3 }
0x1234   :  { %3661 = vst.msk [vmem:[%s6960_s3 + $0x2e0] sm:$0xff] %vm3568_vm15, %v3042_v52  ;;  %v3119_v52 = vand.u32 65535, %v3118_v15  ;;  %v1620_v53 = vsel %vm1492_vm5, %v4693_v61, 64 }
0x1235   :  { %v3148_v46 = vsel %vm1007_vm1, %v1620_v53, 2147483647 }
0x1236   :  { %v3121_v6 = vcvt.s32.f32 %v3119_v52 }
0x1237   :  { %v3064_v22 = vpop.xlane.xlu1 %3063 }
0x1238   :  { %vm3065_vm12 = vcmp.eq.f32.partialorder %v3062_v11, %v3064_v22  ;;  %v3070_v51 = vcvt.f32.s32 %v3064_v22 }
0x1239   :  { %v3066_v10 = vsel %vm3065_vm12, %v3061_v56, inf  ;;  %v3150_v56 = vshra.s32 %v3148_v46, 16 }
0x123a   :  { %3067 = vmin.xlane.f32.xlu2 %v3066_v10  ;;  %v3071_v2 = vshll.u32 %v3070_v51, 16 }
0x123b   :  { %v3152_v5 = vcvt.s32.f32 %v3150_v56 }
0x1242   :  { %3093 = vmin.xlane.f32.xlu2 %v3092_v54 }
0x129c   :  { %v3083_v63 = vpop.xlane.xlu1 %3082 }
0x129d   :  { %v3084_v38 = vcvt.f32.s32 %v3083_v63 }
0x129f   :  { %v3087_v30 = vadd.s32 %v3086_v17, %v3084_v38  ;;  %v7440_v17 = vld [vmem:[#allocation74_spill] sm:$0xff] }
0x12a0   :  { %v7441_v38 = vld [vmem:[#allocation22_spill] sm:$0xff] }
0x12a1   :  { %3664 = vst.msk [vmem:[%s6960_s3 + $0x2f8] sm:$0xff] %vm3568_vm15, %v3087_v30  ;;  %vm1495_vm7 = vcmp.le.f32.partialorder %v7441_v38, %v7440_v17  ;;  %v3164_v30 = vand.u32 65535, %v3163_v19 }
0x12a2   :  { %v1623_v62 = vsel %vm1495_vm7, %v4693_v61, 64 }
0x12a3   :  { %v3166_v25 = vcvt.s32.f32 %v3164_v30  ;;  %v3193_v16 = vsel %vm1007_vm1, %v1623_v62, 2147483647 }
0x12a4   :  { %v3109_v42 = vpop.xlane.xlu1 %3108 }
0x12a5   :  { %vm3110_vm14 = vcmp.eq.f32.partialorder %v3107_v29, %v3109_v42  ;;  %v3115_v24 = vcvt.f32.s32 %v3109_v42 }
0x12a6   :  { %v3111_v40 = vsel %vm3110_vm14, %v3106_v23, inf  ;;  %v3195_v23 = vshra.s32 %v3193_v16, 16 }
0x12a7   :  { %3112 = vmin.xlane.f32.xlu2 %v3111_v40  ;;  %v3116_v11 = vshll.u32 %v3115_v24, 16 }
0x12a8   :  { %v3197_v28 = vcvt.s32.f32 %v3195_v23 }
0x12ad   :  { %v3068_v14 = vpop.xlane.xlu2 %3067 }
0x12ae   :  { %v3069_v26 = vcvt.f32.s32 %v3068_v14 }
0x12af   :  { %3138 = vmin.xlane.f32.xlu2 %v3137_v39 }
0x12b0   :  { %v3072_v12 = vadd.s32 %v3071_v2, %v3069_v26  ;;  %v7442_v2 = vld [vmem:[#allocation66_spill] sm:$0xff] }
0x12b1   :  { %v7443_v26 = vld [vmem:[#allocation18_spill] sm:$0xff] }
0x12b2   :  { %3663 = vst.msk [vmem:[%s6960_s3 + $0x2f0] sm:$0xff] %vm3568_vm15, %v3072_v12  ;;  %vm1494_vm9 = vcmp.le.f32.partialorder %v7443_v26, %v7442_v2  ;;  %v3149_v12 = vand.u32 65535, %v3148_v46 }
0x12b3   :  { %v1622_v21 = vsel %vm1494_vm9, %v4693_v61, 64 }
0x12b4   :  { %v3151_v48 = vcvt.s32.f32 %v3149_v12  ;;  %v3178_v47 = vsel %vm1007_vm1, %v1622_v21, 2147483647 }
0x12b5   :  { %v3094_v18 = vpop.xlane.xlu2 %3093 }
0x12b6   :  { %vm3095_vm2 = vcmp.eq.f32.partialorder %v3092_v54, %v3094_v18  ;;  %v3100_v0 = vcvt.f32.s32 %v3094_v18 }
0x12b7   :  { %v3096_v13 = vsel %vm3095_vm2, %v3091_v55, inf  ;;  %v3180_v55 = vshra.s32 %v3178_v47, 16 }
0x12b8   :  { %3097 = vmin.xlane.f32.xlu0 %v3096_v13  ;;  %v3101_v35 = vshll.u32 %v3100_v0, 16 }
0x12b9   :  { %v3182_v15 = vcvt.s32.f32 %v3180_v55 }
0x12c0   :  { %3123 = vmin.xlane.f32.xlu0 %v3122_v31 }
0x131a   :  { %v3113_v7 = vpop.xlane.xlu2 %3112 }
0x131b   :  { %v3114_v41 = vcvt.f32.s32 %v3113_v7 }
0x131d   :  { %v3117_v50 = vadd.s32 %v3116_v11, %v3114_v41  ;;  %v7444_v11 = vld [vmem:[#allocation82_spill] sm:$0xff]  ;;  %v7445_v41 = vld [vmem:[#allocation27_spill] sm:$0xff] }
0x131e   :  { %vm1497_vm11 = vcmp.le.f32.partialorder %v7445_v41, %v7444_v11 }
0x131f   :  { %3666 = vst.msk [vmem:[%s6960_s3 + $0x308] sm:$0xff] %vm3568_vm15, %v3117_v50  ;;  %v3194_v50 = vand.u32 65535, %v3193_v16  ;;  %v1625_v34 = vsel %vm1497_vm11, %v4693_v61, 64 }
0x1320   :  { %v3223_v8 = vsel %vm1007_vm1, %v1625_v34, 2147483647 }
0x1321   :  { %v3196_v58 = vcvt.s32.f32 %v3194_v50 }
0x1322   :  { %v3139_v20 = vpop.xlane.xlu2 %3138 }
0x1323   :  { %vm3140_vm4 = vcmp.eq.f32.partialorder %v3137_v39, %v3139_v20  ;;  %v3145_v10 = vcvt.f32.s32 %v3139_v20 }
0x1324   :  { %v3141_v59 = vsel %vm3140_vm4, %v3136_v32, inf  ;;  %v3225_v32 = vshra.s32 %v3223_v8, 16 }
0x1325   :  { %3142 = vmin.xlane.f32.xlu0 %v3141_v59  ;;  %v3146_v54 = vshll.u32 %v3145_v10, 16 }
0x1326   :  { %v3227_v60 = vcvt.s32.f32 %v3225_v32 }
0x132b   :  { %v3098_v57 = vpop.xlane.xlu0 %3097 }
0x132c   :  { %v3099_v43 = vcvt.f32.s32 %v3098_v57 }
0x132d   :  { %3168 = vmin.xlane.f32.xlu0 %v3167_v45 }
0x132e   :  { %v3102_v29 = vadd.s32 %v3101_v35, %v3099_v43  ;;  %v7446_v35 = vld [vmem:[#allocation76_spill] sm:$0xff] }
0x132f   :  { %v7447_v43 = vld [vmem:[#allocation24_spill] sm:$0xff] }
0x1330   :  { %3665 = vst.msk [vmem:[%s6960_s3 + $0x300] sm:$0xff] %vm3568_vm15, %v3102_v29  ;;  %vm1496_vm13 = vcmp.le.f32.partialorder %v7447_v43, %v7446_v35  ;;  %v3179_v29 = vand.u32 65535, %v3178_v47 }
0x1331   :  { %v1624_v3 = vsel %vm1496_vm13, %v4693_v61, 64 }
0x1332   :  { %v3181_v52 = vcvt.s32.f32 %v3179_v29  ;;  %v3208_v53 = vsel %vm1007_vm1, %v1624_v3, 2147483647 }
0x1333   :  { %v3124_v1 = vpop.xlane.xlu0 %3123 }
0x1334   :  { %vm3125_vm6 = vcmp.eq.f32.partialorder %v3122_v31, %v3124_v1  ;;  %v3130_v4 = vcvt.f32.s32 %v3124_v1 }
0x1335   :  { %v3126_v22 = vsel %vm3125_vm6, %v3121_v6, inf  ;;  %v3210_v6 = vshra.s32 %v3208_v53, 16 }
0x1336   :  { %3127 = vmin.xlane.f32.xlu1 %v3126_v22  ;;  %v3131_v51 = vshll.u32 %v3130_v4, 16 }
0x1337   :  { %v3212_v46 = vcvt.s32.f32 %v3210_v6 }
0x133e   :  { %3153 = vmin.xlane.f32.xlu1 %v3152_v5 }
0x1398   :  { %v3143_v27 = vpop.xlane.xlu0 %3142 }
0x1399   :  { %v3144_v9 = vcvt.f32.s32 %v3143_v27 }
0x139b   :  { %v3147_v63 = vadd.s32 %v3146_v54, %v3144_v9  ;;  %v7448_v54 = vld [vmem:[#allocation94_spill] sm:$0xff]  ;;  %v7449_v9 = vld [vmem:[#allocation33_spill] sm:$0xff] }
0x139c   :  { %vm1499_vm0 = vcmp.le.f32.partialorder %v7449_v9, %v7448_v54 }
0x139d   :  { %3668 = vst.msk [vmem:[%s6960_s3 + $0x318] sm:$0xff] %vm3568_vm15, %v3147_v63  ;;  %v3224_v63 = vand.u32 65535, %v3223_v8  ;;  %v1627_v17 = vsel %vm1499_vm0, %v4693_v61, 64 }
0x139e   :  { %v3253_v62 = vsel %vm1007_vm1, %v1627_v17, 2147483647 }
0x139f   :  { %v3226_v30 = vcvt.s32.f32 %v3224_v63 }
0x13a0   :  { %v3169_v44 = vpop.xlane.xlu0 %3168 }
0x13a1   :  { %vm3170_vm8 = vcmp.eq.f32.partialorder %v3167_v45, %v3169_v44  ;;  %v3175_v13 = vcvt.f32.s32 %v3169_v44 }
0x13a2   :  { %v3171_v42 = vsel %vm3170_vm8, %v3166_v25, inf  ;;  %v3255_v25 = vshra.s32 %v3253_v62, 16 }
0x13a3   :  { %3172 = vmin.xlane.f32.xlu1 %v3171_v42  ;;  %v3176_v31 = vshll.u32 %v3175_v13, 16 }
0x13a4   :  { %v3257_v23 = vcvt.s32.f32 %v3255_v25 }
0x13a9   :  { %v3128_v40 = vpop.xlane.xlu1 %3127 }
0x13aa   :  { %v3129_v14 = vcvt.f32.s32 %v3128_v40 }
0x13ab   :  { %3198 = vmin.xlane.f32.xlu1 %v3197_v28 }
0x13ac   :  { %v3132_v39 = vadd.s32 %v3131_v51, %v3129_v14  ;;  %v7450_v51 = vld [vmem:[#allocation89_spill] sm:$0xff]  ;;  %v7451_v14 = vld [vmem:[#allocation30_spill] sm:$0xff] }
0x13ad   :  { %vm1498_vm3 = vcmp.le.f32.partialorder %v7451_v14, %v7450_v51 }
0x13ae   :  { %3667 = vst.msk [vmem:[%s6960_s3 + $0x310] sm:$0xff] %vm3568_vm15, %v3132_v39  ;;  %v3209_v39 = vand.u32 65535, %v3208_v53  ;;  %v1626_v2 = vsel %vm1498_vm3, %v4693_v61, 64 }
0x13af   :  { %v3238_v21 = vsel %vm1007_vm1, %v1626_v2, 2147483647 }
0x13b0   :  { %v3211_v12 = vcvt.s32.f32 %v3209_v39 }
0x13b1   :  { %v3154_v49 = vpop.xlane.xlu1 %3153 }
0x13b2   :  { %vm3155_vm10 = vcmp.eq.f32.partialorder %v3152_v5, %v3154_v49  ;;  %v3160_v19 = vcvt.f32.s32 %v3154_v49 }
0x13b3   :  { %v3156_v18 = vsel %vm3155_vm10, %v3151_v48, inf  ;;  %v3240_v48 = vshra.s32 %v3238_v21, 16 }
0x13b4   :  { %3157 = vmin.xlane.f32.xlu2 %v3156_v18  ;;  %v3161_v0 = vshll.u32 %v3160_v19, 16 }
0x13b5   :  { %v3242_v47 = vcvt.s32.f32 %v3240_v48 }
0x13bc   :  { %3183 = vmin.xlane.f32.xlu2 %v3182_v15 }
0x1416   :  { %v3173_v33 = vpop.xlane.xlu1 %3172 }
0x1417   :  { %v3174_v24 = vcvt.f32.s32 %v3173_v33 }
0x1419   :  { %v3177_v7 = vadd.s32 %v3176_v31, %v3174_v24  ;;  %v7452_v31 = vld [vmem:[#allocation107_spill] sm:$0xff]  ;;  %v7453_v24 = vld [vmem:[#allocation45_spill] sm:$0xff] }
0x141a   :  { %vm1501_vm5 = vcmp.le.f32.partialorder %v7453_v24, %v7452_v31 }
0x141b   :  { %3670 = vst.msk [vmem:[%s6960_s3 + $0x328] sm:$0xff] %vm3568_vm15, %v3177_v7  ;;  %v3254_v7 = vand.u32 65535, %v3253_v62  ;;  %v1629_v11 = vsel %vm1501_vm5, %v4693_v61, 64 }
0x141c   :  { %v3283_v34 = vsel %vm1007_vm1, %v1629_v11, 2147483647 }
0x141d   :  { %v3256_v50 = vcvt.s32.f32 %v3254_v7 }
0x141e   :  { %v3199_v37 = vpop.xlane.xlu1 %3198 }
0x141f   :  { %vm3200_vm12 = vcmp.eq.f32.partialorder %v3197_v28, %v3199_v37  ;;  %v3205_v22 = vcvt.f32.s32 %v3199_v37 }
0x1420   :  { %v3201_v20 = vsel %vm3200_vm12, %v3196_v58, inf  ;;  %v3285_v58 = vshra.s32 %v3283_v34, 16 }
0x1421   :  { %3202 = vmin.xlane.f32.xlu2 %v3201_v20  ;;  %v3206_v5 = vshll.u32 %v3205_v22, 16 }
0x1422   :  { %v3287_v32 = vcvt.s32.f32 %v3285_v58 }
0x1427   :  { %v3158_v59 = vpop.xlane.xlu2 %3157 }
0x1428   :  { %v3159_v57 = vcvt.f32.s32 %v3158_v59 }
0x1429   :  { %3228 = vmin.xlane.f32.xlu2 %v3227_v60 }
0x142a   :  { %v3162_v45 = vadd.s32 %v3161_v0, %v3159_v57  ;;  %v7454_v0 = vld [vmem:[#allocation100_spill] sm:$0xff]  ;;  %v7455_v57 = vld [vmem:[#allocation38_spill] sm:$0xff] }
0x142b   :  { %vm1500_vm7 = vcmp.le.f32.partialorder %v7455_v57, %v7454_v0  ;;  %v7464_v0 = vld [vmem:[#allocation176_spill] sm:$0xff]  ;;  %v7465_v57 = vld [vmem:[#allocation106_spill] sm:$0xff] }
0x142c   :  { %3669 = vst.msk [vmem:[%s6960_s3 + $0x320] sm:$0xff] %vm3568_vm15, %v3162_v45  ;;  %v3239_v45 = vand.u32 65535, %v3238_v21  ;;  %v1628_v35 = vsel %vm1500_vm7, %v4693_v61, 64 }
0x142d   :  { %v3268_v3 = vsel %vm1007_vm1, %v1628_v35, 2147483647  ;;  %v7466_v35 = vld [vmem:[#allocation132_spill] sm:$0xff] }
0x142e   :  { %v3241_v29 = vcvt.s32.f32 %v3239_v45 }
0x142f   :  { %v3184_v36 = vpop.xlane.xlu2 %3183 }
0x1430   :  { %vm3185_vm14 = vcmp.eq.f32.partialorder %v3182_v15, %v3184_v36  ;;  %v3190_v16 = vcvt.f32.s32 %v3184_v36 }
0x1431   :  { %v3186_v1 = vsel %vm3185_vm14, %v3181_v52, inf  ;;  %v3270_v52 = vshra.s32 %v3268_v3, 16 }
0x1432   :  { %3187 = vmin.xlane.f32.xlu0 %v3186_v1  ;;  %v3191_v4 = vshll.u32 %v3190_v16, 16 }
0x1433   :  { %v3272_v53 = vcvt.s32.f32 %v3270_v52 }
0x143a   :  { %3213 = vmin.xlane.f32.xlu0 %v3212_v46 }
0x1494   :  { %v3203_v56 = vpop.xlane.xlu2 %3202 }
0x1495   :  { %v3204_v10 = vcvt.f32.s32 %v3203_v56 }
0x1497   :  { %v3207_v27 = vadd.s32 %v3206_v5, %v3204_v10  ;;  %v7456_v5 = vld [vmem:[#allocation120_spill] sm:$0xff]  ;;  %v7457_v10 = vld [vmem:[#allocation54_spill] sm:$0xff] }
0x1498   :  { %vm1503_vm9 = vcmp.le.f32.partialorder %v7457_v10, %v7456_v5  ;;  %v7468_v5 = vld [vmem:[#allocation189_spill] sm:$0xff]  ;;  %v7469_v10 = vld [vmem:[#allocation131_spill] sm:$0xff] }
0x1499   :  { %3672 = vst.msk [vmem:[%s6960_s3 + $0x338] sm:$0xff] %vm3568_vm15, %v3207_v27  ;;  %v3284_v27 = vand.u32 65535, %v3283_v34  ;;  %v1631_v54 = vsel %vm1503_vm9, %v4693_v61, 64  ;;  %v7463_v34 = vld [vmem:[#allocation84_spill] sm:$0xff]  ;;  %vm1513_vm5 = vcmp.le.f32.partialorder %v7469_v10, %v7468_v5  ;;  %v7482_v5 = vld [vmem:[#allocation201_spill] sm:$0xff]  ;;  %v7483_v10 = vld [vmem:[#allocation158_spill] sm:$0xff] }
0x149a   :  { %v3313_v17 = vsel %vm1007_vm1, %v1631_v54, 2147483647 }
0x149b   :  { %v3286_v63 = vcvt.s32.f32 %v3284_v27 }
0x149c   :  { %v3229_v38 = vpop.xlane.xlu2 %3228 }
0x149d   :  { %vm3230_vm2 = vcmp.eq.f32.partialorder %v3227_v60, %v3229_v38  ;;  %v3235_v18 = vcvt.f32.s32 %v3229_v38 }
0x149e   :  { %v3231_v44 = vsel %vm3230_vm2, %v3226_v30, inf  ;;  %v3315_v30 = vshra.s32 %v3313_v17, 16  ;;  %vm1510_vm2 = vcmp.le.f32.partialorder %v7465_v57, %v7464_v0  ;;  %v7480_v57 = vld [vmem:[#allocation144_spill] sm:$0xff] }
0x149f   :  { %3232 = vmin.xlane.f32.xlu0 %v3231_v44  ;;  %v3236_v15 = vshll.u32 %v3235_v18, 16 }
0x14a0   :  { %v3317_v25 = vcvt.s32.f32 %v3315_v30  ;;  %v7470_v30 = vld [vmem:[#allocation198_spill] sm:$0xff] }
0x14a5   :  { %v3188_v42 = vpop.xlane.xlu0 %3187 }
0x14a6   :  { %v3189_v40 = vcvt.f32.s32 %v3188_v42 }
0x14a7   :  { %3258 = vmin.xlane.f32.xlu0 %v3257_v23 }
0x14a8   :  { %v3192_v28 = vadd.s32 %v3191_v4, %v3189_v40  ;;  %v7458_v4 = vld [vmem:[#allocation113_spill] sm:$0xff]  ;;  %v7459_v40 = vld [vmem:[#allocation48_spill] sm:$0xff] }
0x14a9   :  { %vm1502_vm11 = vcmp.le.f32.partialorder %v7459_v40, %v7458_v4  ;;  %v7473_v4 = vld [vmem:[#allocation175_spill] sm:$0xff] }
0x14aa   :  { %3671 = vst.msk [vmem:[%s6960_s3 + $0x330] sm:$0xff] %vm3568_vm15, %v3192_v28  ;;  %v3269_v28 = vand.u32 65535, %v3268_v3  ;;  %v1630_v51 = vsel %vm1502_vm11, %v4693_v61, 64 }
0x14ab   :  { %v3298_v2 = vsel %vm1007_vm1, %v1630_v51, 2147483647 }
0x14ac   :  { %v3271_v39 = vcvt.s32.f32 %v3269_v28  ;;  %v3299_v3 = vand.u32 65535, %v3298_v2 }
0x14ad   :  { %v3214_v26 = vpop.xlane.xlu0 %3213 }
0x14ae   :  { %vm3215_vm4 = vcmp.eq.f32.partialorder %v3212_v46, %v3214_v26  ;;  %v3220_v8 = vcvt.f32.s32 %v3214_v26 }
0x14af   :  { %v3216_v49 = vsel %vm3215_vm4, %v3211_v12, inf  ;;  %v3300_v12 = vshra.s32 %v3298_v2, 16 }
0x14b0   :  { %3217 = vmin.xlane.f32.xlu1 %v3216_v49  ;;  %v3221_v19 = vshll.u32 %v3220_v8, 16 }
0x14b1   :  { %v3302_v21 = vcvt.s32.f32 %v3300_v12 }
0x14b8   :  { %3243 = vmin.xlane.f32.xlu1 %v3242_v47 }
0x1512   :  { %v3233_v55 = vpop.xlane.xlu0 %3232 }
0x1513   :  { %v3234_v13 = vcvt.f32.s32 %v3233_v55 }
0x1515   :  { %v3237_v33 = vadd.s32 %v3236_v15, %v3234_v13  ;;  %v7460_v15 = vld [vmem:[#allocation136_spill] sm:$0xff] }
0x1516   :  { %v7461_v13 = vld [vmem:[#allocation68_spill] sm:$0xff] }
0x1517   :  { %3674 = vst.msk [vmem:[%s6960_s3 + $0x348] sm:$0xff] %vm3568_vm15, %v3237_v33  ;;  %vm1505_vm13 = vcmp.le.f32.partialorder %v7461_v13, %v7460_v15  ;;  %v3314_v33 = vand.u32 65535, %v3313_v17 }
0x1518   :  { %v1633_v31 = vsel %vm1505_vm13, %v4693_v61, 64 }
0x1519   :  { %v3316_v7 = vcvt.s32.f32 %v3314_v33  ;;  %v6637_v11 = vsel %vm1007_vm1, %v1633_v31, 2147483647 }
0x151a   :  { %v3259_v41 = vpop.xlane.xlu0 %3258 }
0x151b   :  { %vm3260_vm6 = vcmp.eq.f32.partialorder %v3257_v23, %v3259_v41  ;;  %v3265_v1 = vcvt.f32.s32 %v3259_v41 }
0x151c   :  { %v3261_v37 = vsel %vm3260_vm6, %v3256_v50, inf  ;;  %v7462_v50 = vld [vmem:[#allocation155_spill] sm:$0xff] }
0x151d   :  { %3262 = vmin.xlane.f32.xlu1 %v3261_v37  ;;  %v3266_v46 = vshll.u32 %v3265_v1, 16  ;;  %vm1507_vm0 = vcmp.le.f32.partialorder %v7463_v34, %v7462_v50  ;;  %v3345_v37 = vshra.s32 %v6637_v11, 16 }
0x151e   :  { %v1635_v8 = vsel %vm1507_vm0, %v4693_v61, 64 }
0x1523   :  { %v3218_v20 = vpop.xlane.xlu1 %3217 }
0x1524   :  { %v3219_v59 = vcvt.f32.s32 %v3218_v20 }
0x1525   :  { %3288 = vmin.xlane.f32.xlu1 %v3287_v32 }
0x1526   :  { %v3222_v60 = vadd.s32 %v3221_v19, %v3219_v59  ;;  %v6644_v19 = vsel %vm1007_vm1, %v1635_v8, 2147483647 }
0x1528   :  { %3673 = vst.msk [vmem:[%s6960_s3 + $0x340] sm:$0xff] %vm3568_vm15, %v3222_v60 }
0x152b   :  { %v3244_v43 = vpop.xlane.xlu1 %3243 }
0x152c   :  { %vm3245_vm8 = vcmp.eq.f32.partialorder %v3242_v47, %v3244_v43  ;;  %v3250_v62 = vcvt.f32.s32 %v3244_v43  ;;  %v7467_v43 = vld [vmem:[#allocation62_spill] sm:$0xff] }
0x152d   :  { %v3246_v36 = vsel %vm3245_vm8, %v3241_v29, inf  ;;  %vm1504_vm3 = vcmp.le.f32.partialorder %v7467_v43, %v7466_v35  ;;  %v3375_v29 = vshra.s32 %v6644_v19, 16 }
0x152e   :  { %3247 = vmin.xlane.f32.xlu2 %v3246_v36  ;;  %v3251_v16 = vshll.u32 %v3250_v62, 16  ;;  %v1638_v36 = vsel %vm1510_vm2, %v4693_v61, 64  ;;  %v1632_v52 = vsel %vm1504_vm3, %v4693_v61, 64  ;;  %v7471_v62 = vld [vmem:[#allocation154_spill] sm:$0xff] }
0x152f   :  { %v6657_v1 = vcvt.s32.f32 %v3375_v29  ;;  %vm1516_vm6 = vcmp.le.f32.partialorder %v7471_v62, %v7470_v30 }
0x1536   :  { %3273 = vmin.xlane.f32.xlu2 %v3272_v53 }
0x1590   :  { %v3263_v6 = vpop.xlane.xlu1 %3262 }
0x1591   :  { %v3264_v22 = vcvt.f32.s32 %v3263_v6  ;;  %v3301_v6 = vcvt.s32.f32 %v3299_v3 }
0x1593   :  { %v3267_v56 = vadd.s32 %v3266_v46, %v3264_v22  ;;  %v6660_v46 = vsel %vm1007_vm1, %v1638_v36, 2147483647  ;;  %v6663_v22 = vsel %vm1007_vm1, %v1632_v52, 2147483647 }
0x1594   :  { %v3420_v27 = vshra.s32 %v6660_v46, 16  ;;  %v3330_v54 = vshra.s32 %v6663_v22, 16  ;;  %v3329_v43 = vand.u32 65535, %v6663_v22 }
0x1595   :  { %3676 = vst.msk [vmem:[%s6960_s3 + $0x358] sm:$0xff] %vm3568_vm15, %v3267_v56 }
0x1598   :  { %v3289_v9 = vpop.xlane.xlu1 %3288 }
0x1599   :  { %vm3290_vm10 = vcmp.eq.f32.partialorder %v3287_v32, %v3289_v9  ;;  %v3295_v49 = vcvt.f32.s32 %v3289_v9  ;;  %v3347_v32 = vcvt.s32.f32 %v3345_v37  ;;  %v1641_v9 = vsel %vm1513_vm5, %v4693_v61, 64 }
0x159a   :  { %v3291_v38 = vsel %vm3290_vm10, %v3286_v63, inf  ;;  %v6671_v63 = vcvt.s32.f32 %v3420_v27  ;;  %v6674_v17 = vsel %vm1007_vm1, %v1641_v9, 2147483647  ;;  %v7484_v27 = vld [vmem:[#allocation167_spill] sm:$0xff] }
0x159b   :  { %3292 = vmin.xlane.f32.xlu2 %v3291_v38  ;;  %v3296_v47 = vshll.u32 %v3295_v49, 16  ;;  %v3332_v38 = vcvt.s32.f32 %v3330_v54  ;;  %v7485_v54 = vld [vmem:[#allocation96_spill] sm:$0xff] }
0x159c   :  { %vm1509_vm0 = vcmp.le.f32.partialorder %v7485_v54, %v7484_v27 }
0x15a1   :  { %v3248_v44 = vpop.xlane.xlu2 %3247 }
0x15a2   :  { %v3249_v42 = vcvt.f32.s32 %v3248_v44  ;;  %v3465_v44 = vshra.s32 %v6674_v17, 16 }
0x15a3   :  { %3318 = vmin.xlane.f32.xlu2 %v3317_v25 }
0x15a4   :  { %v3252_v23 = vadd.s32 %v3251_v16, %v3249_v42  ;;  %v6681_v16 = vcvt.s32.f32 %v3465_v44 }
0x15a6   :  { %3675 = vst.msk [vmem:[%s6960_s3 + $0x350] sm:$0xff] %vm3568_vm15, %v3252_v23  ;;  %v7472_v23 = vld [vmem:[#allocation207_spill] sm:$0xff] }
0x15a7   :  { %vm1519_vm7 = vcmp.le.f32.partialorder %v7473_v4, %v7472_v23 }
0x15a8   :  { %v1647_v28 = vsel %vm1519_vm7, %v4693_v61, 64 }
0x15a9   :  { %v3274_v14 = vpop.xlane.xlu2 %3273 }
0x15aa   :  { %vm3275_vm12 = vcmp.eq.f32.partialorder %v3272_v53, %v3274_v14  ;;  %v3280_v58 = vcvt.f32.s32 %v3274_v14  ;;  %v6694_v14 = vsel %vm1007_vm1, %v1647_v28, 2147483647  ;;  %v7487_v28 = vld [vmem:[#allocation117_spill] sm:$0xff] }
0x15ab   :  { %v3276_v26 = vsel %vm3275_vm12, %v3271_v39, inf  ;;  %v3555_v39 = vshra.s32 %v6694_v14, 16 }
0x15ac   :  { %3277 = vmin.xlane.f32.xlu0 %v3276_v26  ;;  %v3281_v59 = vshll.u32 %v3280_v58, 16 }
0x15ad   :  { %v6698_v2 = vcvt.s32.f32 %v3555_v39 }
0x15b4   :  { %3303 = vmin.xlane.f32.xlu0 %v3302_v21 }
0x160e   :  { %v3293_v48 = vpop.xlane.xlu2 %3292 }
0x160f   :  { %v3294_v18 = vcvt.f32.s32 %v3293_v48 }
0x1611   :  { %v3297_v55 = vadd.s32 %v3296_v47, %v3294_v18  ;;  %v7474_v47 = vld [vmem:[#allocation161_spill] sm:$0xff]  ;;  %v7475_v18 = vld [vmem:[#allocation88_spill] sm:$0xff] }
0x1612   :  { %vm1508_vm8 = vcmp.le.f32.partialorder %v7475_v18, %v7474_v47  ;;  %v7488_v47 = vld [vmem:[#allocation195_spill] sm:$0xff] }
0x1613   :  { %3678 = vst.msk [vmem:[%s6960_s3 + $0x368] sm:$0xff] %vm3568_vm15, %v3297_v55  ;;  %v3344_v55 = vand.u32 65535, %v6637_v11  ;;  %v1636_v15 = vsel %vm1508_vm8, %v4693_v61, 64  ;;  %v7489_v18 = vld [vmem:[#allocation143_spill] sm:$0xff] }
0x1614   :  { %v6713_v31 = vsel %vm1007_vm1, %v1636_v15, 2147483647  ;;  %vm1515_vm3 = vcmp.le.f32.partialorder %v7489_v18, %v7488_v47 }
0x1615   :  { %v3346_v33 = vcvt.s32.f32 %v3344_v55  ;;  %v3390_v11 = vshra.s32 %v6713_v31, 16  ;;  %v1643_v15 = vsel %vm1515_vm3, %v4693_v61, 64 }
0x1616   :  { %v3319_v24 = vpop.xlane.xlu2 %3318 }
0x1617   :  { %vm3320_vm14 = vcmp.eq.f32.partialorder %v3317_v25, %v3319_v24  ;;  %v1644_v25 = vsel %vm1516_vm6, %v4693_v61, 64  ;;  %v3325_v26 = vcvt.f32.s32 %v3319_v24  ;;  %v6719_v58 = vcvt.s32.f32 %v3390_v11 }
0x1618   :  { %v3321_v41 = vsel %vm3320_vm14, %v3316_v7, inf  ;;  %v6684_v42 = vsel %vm1007_vm1, %v1644_v25, 2147483647  ;;  %v7476_v7 = vld [vmem:[#allocation180_spill] sm:$0xff]  ;;  %vm1517_vm14 = vcmp.le.f32.partialorder %v7483_v10, %v7482_v5 }
0x1619   :  { %3322 = vmin.xlane.f32.xlu0 %v3321_v41  ;;  %v3510_v40 = vshra.s32 %v6684_v42, 16  ;;  %v7477_v41 = vld [vmem:[#allocation112_spill] sm:$0xff]  ;;  %v1645_v62 = vsel %vm1517_vm14, %v4693_v61, 64 }
0x161a   :  { %vm1511_vm10 = vcmp.le.f32.partialorder %v7477_v41, %v7476_v7  ;;  %v6760_v25 = vsel %vm1007_vm1, %v1645_v62, 2147483647  ;;  %v7490_v7 = vld [vmem:[#allocation205_spill] sm:$0xff]  ;;  %v7491_v41 = vld [vmem:[#allocation168_spill] sm:$0xff] }
0x161b   :  { %v6691_v51 = vcvt.s32.f32 %v3510_v40  ;;  %v1639_v34 = vsel %vm1511_vm10, %v4693_v61, 64  ;;  %v7486_v40 = vld [vmem:[#allocation183_spill] sm:$0xff]  ;;  %v3525_v39 = vshra.s32 %v6760_v25, 16 }
0x161c   :  { %v6722_v8 = vsel %vm1007_vm1, %v1639_v34, 2147483647  ;;  %vm1512_vm2 = vcmp.le.f32.partialorder %v7487_v28, %v7486_v40 }
0x161d   :  { %v3435_v35 = vshra.s32 %v6722_v8, 16 }
0x161f   :  { %v3278_v20 = vpop.xlane.xlu0 %3277  ;;  %v6739_v52 = vcvt.s32.f32 %v3435_v35 }
0x1620   :  { %v3279_v60 = vcvt.f32.s32 %v3278_v20 }
0x1621   :  { %3348 = vmin.xlane.f32.xlu0 %v3347_v32 }
0x1622   :  { %v3282_v45 = vadd.s32 %v3281_v59, %v3279_v60  ;;  %v7478_v59 = vld [vmem:[#allocation192_spill] sm:$0xff]  ;;  %v7479_v60 = vld [vmem:[#allocation135_spill] sm:$0xff] }
0x1623   :  { %vm1514_vm11 = vcmp.le.f32.partialorder %v7479_v60, %v7478_v59  ;;  %v3374_v60 = vand.u32 65535, %v6644_v19  ;;  %v3464_v19 = vand.u32 65535, %v6674_v17  ;;  %v3554_v17 = vand.u32 65535, %v6694_v14 }
0x1624   :  { %3677 = vst.msk [vmem:[%s6960_s3 + $0x360] sm:$0xff] %vm3568_vm15, %v3282_v45  ;;  %v7481_v45 = vld [vmem:[#allocation73_spill] sm:$0xff]  ;;  %v1642_v29 = vsel %vm1514_vm11, %v4693_v61, 64 }
0x1625   :  { %vm1506_vm12 = vcmp.le.f32.partialorder %v7481_v45, %v7480_v57  ;;  %v3419_v45 = vand.u32 65535, %v6660_v46  ;;  %v3509_v46 = vand.u32 65535, %v6684_v42 }
0x1626   :  { %v1634_v3 = vsel %vm1506_vm12, %v4693_v61, 64 }
0x1627   :  { %v3304_v53 = vpop.xlane.xlu0 %3303  ;;  %v6746_v22 = vsel %vm1007_vm1, %v1634_v3, 2147483647  ;;  %v3466_v3 = vcvt.s32.f32 %v3464_v19 }
0x1628   :  { %vm3305_vm4 = vcmp.eq.f32.partialorder %v3302_v21, %v3304_v53  ;;  %v3326_v21 = vshll.u32 %v3325_v26, 16  ;;  %v3310_v50 = vcvt.f32.s32 %v3304_v53  ;;  %v3331_v53 = vcvt.s32.f32 %v3329_v43 }
0x1629   :  { %3378 = vmin.xlane.f32.xlu0 %v6657_v1  ;;  %v3306_v56 = vsel %vm3305_vm4, %v3301_v6, inf  ;;  %v6742_v6 = vsel %vm1007_vm1, %v1642_v29, 2147483647  ;;  %v3360_v30 = vshra.s32 %v6746_v22, 16  ;;  %vm1518_vm4 = vcmp.le.f32.partialorder %v7491_v41, %v7490_v7 }
0x162a   :  { %3307 = vmin.xlane.f32.xlu1 %v3306_v56  ;;  %v3311_v20 = vshll.u32 %v3310_v50, 16  ;;  %v3480_v9 = vshra.s32 %v6742_v6, 16  ;;  %v1646_v50 = vsel %vm1518_vm4, %v4693_v61, 64  ;;  %v3421_v43 = vcvt.s32.f32 %v3419_v45 }
0x162b   :  { %v6762_v23 = vcvt.s32.f32 %v3360_v30  ;;  %v3359_v18 = vand.u32 65535, %v6746_v22 }
0x162c   :  { %v6757_v44 = vcvt.s32.f32 %v3480_v9 }
0x1631   :  { %3423 = vmin.xlane.f32.xlu0 %v6671_v63 }
0x1632   :  { %3333 = vmin.xlane.f32.xlu1 %v3332_v38 }
0x1639   :  { %3468 = vmin.xlane.f32.xlu0 %v6681_v16 }
0x1641   :  { %3513 = vmin.xlane.f32.xlu0 %v6691_v51 }
0x1649   :  { %3558 = vmin.xlane.f32.xlu0 %v6698_v2 }
0x168c   :  { %v3323_v12 = vpop.xlane.xlu0 %3322 }
0x168d   :  { %v3324_v49 = vcvt.f32.s32 %v3323_v12  ;;  %v1640_v12 = vsel %vm1512_vm2, %v4693_v61, 64 }
0x168f   :  { %v3327_v48 = vadd.s32 %v3326_v21, %v3324_v49  ;;  %v6774_v21 = vcvt.s32.f32 %v3525_v39 }
0x1691   :  { %3680 = vst.msk [vmem:[%s6960_s3 + $0x378] sm:$0xff] %vm3568_vm15, %v3327_v48  ;;  %v6779_v48 = vsel %vm1007_vm1, %v1640_v12, 2147483647 }
0x1692   :  { %v3450_v55 = vshra.s32 %v6779_v48, 16 }
0x1694   :  { %v6709_v13 = vpop.xlane.xlu0 %3348 }
0x1695   :  { %vm3350_vm9 = vcmp.eq.f32.partialorder %v3347_v32, %v6709_v13  ;;  %v3355_v27 = vcvt.f32.s32 %v6709_v13  ;;  %v3434_v13 = vand.u32 65535, %v6722_v8 }
0x1696   :  { %v3351_v24 = vsel %vm3350_vm9, %v3346_v33, inf  ;;  %v6787_v33 = vcvt.s32.f32 %v3450_v55  ;;  %v3361_v55 = vcvt.s32.f32 %v3359_v18 }
0x1697   :  { %3352 = vmin.xlane.f32.xlu1 %v3351_v24  ;;  %v6790_v24 = vsel %vm1007_vm1, %v1643_v15, 2147483647  ;;  %v3356_v42 = vshll.u32 %v3355_v27, 16  ;;  %v3524_v15 = vand.u32 65535, %v6760_v25  ;;  %v3449_v25 = vand.u32 65535, %v6779_v48 }
0x1698   :  { %v3495_v11 = vshra.s32 %v6790_v24, 16 }
0x169a   :  { %v6797_v34 = vcvt.s32.f32 %v3495_v11  ;;  %v3526_v11 = vcvt.s32.f32 %v3524_v15 }
0x169d   :  { %v3308_v37 = vpop.xlane.xlu1 %3307 }
0x169e   :  { %v3309_v32 = vcvt.f32.s32 %v3308_v37  ;;  %v6800_v37 = vsel %vm1007_vm1, %v1646_v50, 2147483647 }
0x169f   :  { %3393 = vmin.xlane.f32.xlu1 %v6719_v58  ;;  %v3539_v48 = vand.u32 65535, %v6800_v37 }
0x16a0   :  { %v3312_v0 = vadd.s32 %v3311_v20, %v3309_v32  ;;  %v6803_v20 = vpop.xlane.xlu0 %3378  ;;  %v3540_v32 = vshra.s32 %v6800_v37, 16 }
0x16a1   :  { %vm3380_vm5 = vcmp.eq.f32.partialorder %v6657_v1, %v6803_v20 }
0x16a2   :  { %3679 = vst.msk [vmem:[%s6960_s3 + $0x370] sm:$0xff] %vm3568_vm15, %v3312_v0  ;;  %v6806_v59 = vcvt.s32.f32 %v3540_v32 }
0x16a5   :  { %v6737_v36 = vpop.xlane.xlu1 %3333 }
0x16a6   :  { %vm3335_vm13 = vcmp.eq.f32.partialorder %v3332_v38, %v6737_v36  ;;  %v1637_v38 = vsel %vm1509_vm0, %v4693_v61, 64  ;;  %v3376_v61 = vcvt.s32.f32 %v3374_v60 }
0x16a7   :  { %3438 = vmin.xlane.f32.xlu1 %v6739_v52  ;;  %v3336_v56 = vsel %vm3335_vm13, %v3331_v53, inf  ;;  %v6765_v4 = vsel %vm1007_vm1, %v1637_v38, 2147483647  ;;  %v3340_v38 = vcvt.f32.s32 %v6737_v36 }
0x16a8   :  { %3337 = vmin.xlane.f32.xlu2 %v3336_v56  ;;  %v3405_v26 = vshra.s32 %v6765_v4, 16  ;;  %v6810_v0 = vpop.xlane.xlu0 %3423  ;;  %v3381_v57 = vsel %vm3380_vm5, %v3376_v61, inf  ;;  %v3404_v7 = vand.u32 65535, %v6765_v4  ;;  %v3451_v4 = vcvt.s32.f32 %v3449_v25 }
0x16a9   :  { %vm3425_vm1 = vcmp.eq.f32.partialorder %v6671_v63, %v6810_v0  ;;  %v3511_v63 = vcvt.s32.f32 %v3509_v46  ;;  %v3341_v39 = vshll.u32 %v3340_v38, 16 }
0x16aa   :  { %v6776_v49 = vcvt.s32.f32 %v3405_v26  ;;  %v3426_v29 = vsel %vm3425_vm1, %v3421_v43, inf  ;;  %v3406_v50 = vcvt.s32.f32 %v3404_v7 }
0x16af   :  { %3483 = vmin.xlane.f32.xlu1 %v6757_v44 }
0x16b0   :  { %3363 = vmin.xlane.f32.xlu2 %v6762_v23  ;;  %v6817_v35 = vpop.xlane.xlu0 %3468 }
0x16b1   :  { %vm3470_vm6 = vcmp.eq.f32.partialorder %v6681_v16, %v6817_v35  ;;  %v3556_v16 = vcvt.s32.f32 %v3554_v17 }
0x16b2   :  { %v3471_v53 = vsel %vm3470_vm6, %v3466_v3, inf }
0x16b7   :  { %3528 = vmin.xlane.f32.xlu1 %v6774_v21 }
0x16b8   :  { %3408 = vmin.xlane.f32.xlu2 %v6776_v49  ;;  %v6822_v1 = vpop.xlane.xlu0 %3513 }
0x16b9   :  { %vm3515_vm7 = vcmp.eq.f32.partialorder %v6691_v51, %v6822_v1  ;;  %v3389_v51 = vand.u32 65535, %v6713_v31  ;;  %v3436_v31 = vcvt.s32.f32 %v3434_v13  ;;  %v3520_v27 = vcvt.f32.s32 %v6822_v1 }
0x16ba   :  { %v3516_v56 = vsel %vm3515_vm7, %v3511_v63, inf }
0x16bb   :  { %v3391_v62 = vcvt.s32.f32 %v3389_v51 }
0x16c0   :  { %3453 = vmin.xlane.f32.xlu2 %v6787_v33  ;;  %v6827_v5 = vpop.xlane.xlu0 %3558 }
0x16c1   :  { %vm3560_vm8 = vcmp.eq.f32.partialorder %v6698_v2, %v6827_v5 }
0x16c2   :  { %v3561_v10 = vsel %vm3560_vm8, %v3556_v16, inf }
0x16c8   :  { %3498 = vmin.xlane.f32.xlu2 %v6797_v34 }
0x16d0   :  { %3543 = vmin.xlane.f32.xlu2 %v6806_v59 }
0x16d8   :  { %3382 = vmin.xlane.f32.xlu2 %v3381_v57 }
0x16e0   :  { %3427 = vmin.xlane.f32.xlu2 %v3426_v29  ;;  %v3541_v29 = vcvt.s32.f32 %v3539_v48 }
0x16e8   :  { %3472 = vmin.xlane.f32.xlu2 %v3471_v53 }
0x16f0   :  { %3517 = vmin.xlane.f32.xlu2 %v3516_v56 }
0x16f8   :  { %3562 = vmin.xlane.f32.xlu2 %v3561_v10 }
0x170a   :  { %v3353_v54 = vpop.xlane.xlu1 %3352 }
0x170b   :  { %v3354_v9 = vcvt.f32.s32 %v3353_v54 }
0x170d   :  { %v3357_v30 = vadd.s32 %v3356_v42, %v3354_v9  ;;  %v3521_v42 = vshll.u32 %v3520_v27, 16 }
0x170f   :  { %3682 = vst.msk [vmem:[%s6960_s3 + $0x388] sm:$0xff] %vm3568_vm15, %v3357_v30  ;;  %v3565_v30 = vcvt.f32.s32 %v6827_v5 }
0x1712   :  { %v6838_v14 = vpop.xlane.xlu1 %3393 }
0x1713   :  { %vm3395_vm9 = vcmp.eq.f32.partialorder %v6719_v58, %v6838_v14  ;;  %v3479_v58 = vand.u32 65535, %v6742_v6  ;;  %v3400_v13 = vcvt.f32.s32 %v6838_v14 }
0x1714   :  { %v3396_v2 = vsel %vm3395_vm9, %v3391_v62, inf  ;;  %v3566_v62 = vshll.u32 %v3565_v30, 16 }
0x1715   :  { %3397 = vmin.xlane.f32.xlu0 %v3396_v2  ;;  %v3481_v36 = vcvt.s32.f32 %v3479_v58 }
0x171a   :  { %v6844_v40 = vpop.xlane.xlu1 %3438 }
0x171b   :  { %vm3440_vm10 = vcmp.eq.f32.partialorder %v6739_v52, %v6844_v40  ;;  %v3338_v28 = vpop.xlane.xlu2 %3337 }
0x171c   :  { %v3339_v26 = vcvt.f32.s32 %v3338_v28  ;;  %v3441_v12 = vsel %vm3440_vm10, %v3436_v31, inf  ;;  %v3401_v31 = vshll.u32 %v3400_v13, 16 }
0x171d   :  { %3442 = vmin.xlane.f32.xlu0 %v3441_v12 }
0x171e   :  { %v3342_v47 = vadd.s32 %v3341_v39, %v3339_v26  ;;  %v3445_v39 = vcvt.f32.s32 %v6844_v40 }
0x1720   :  { %3681 = vst.msk [vmem:[%s6960_s3 + $0x380] sm:$0xff] %vm3568_vm15, %v3342_v47  ;;  %v3446_v12 = vshll.u32 %v3445_v39, 16 }
0x1722   :  { %v6854_v8 = vpop.xlane.xlu1 %3483 }
0x1723   :  { %vm3485_vm11 = vcmp.eq.f32.partialorder %v6757_v44, %v6854_v8  ;;  %v6858_v52 = vpop.xlane.xlu2 %3363  ;;  %v3490_v18 = vcvt.f32.s32 %v6854_v8 }
0x1724   :  { %vm3365_vm12 = vcmp.eq.f32.partialorder %v6762_v23, %v6858_v52  ;;  %v3486_v6 = vsel %vm3485_vm11, %v3481_v36, inf  ;;  %v3370_v14 = vcvt.f32.s32 %v6858_v52 }
0x1725   :  { %3487 = vmin.xlane.f32.xlu0 %v3486_v6  ;;  %v3366_v22 = vsel %vm3365_vm12, %v3361_v55, inf  ;;  %v3491_v40 = vshll.u32 %v3490_v18, 16 }
0x1726   :  { %3367 = vmin.xlane.f32.xlu1 %v3366_v22  ;;  %v3371_v22 = vshll.u32 %v3370_v14, 16 }
0x172a   :  { %v6864_v41 = vpop.xlane.xlu1 %3528 }
0x172b   :  { %vm3530_vm13 = vcmp.eq.f32.partialorder %v6774_v21, %v6864_v41  ;;  %v6868_v44 = vpop.xlane.xlu2 %3408  ;;  %v3494_v21 = vand.u32 65535, %v6790_v24  ;;  %v3385_v24 = vcvt.f32.s32 %v6803_v20 }
0x172c   :  { %vm3410_vm14 = vcmp.eq.f32.partialorder %v6776_v49, %v6868_v44  ;;  %v3531_v23 = vsel %vm3530_vm13, %v3526_v11, inf  ;;  %v3415_v8 = vcvt.f32.s32 %v6868_v44 }
0x172d   :  { %3532 = vmin.xlane.f32.xlu0 %v3531_v23  ;;  %v3411_v32 = vsel %vm3410_vm14, %v3406_v50, inf  ;;  %v3496_v45 = vcvt.s32.f32 %v3494_v21  ;;  %v3386_v3 = vshll.u32 %v3385_v24, 16  ;;  %v3535_v50 = vcvt.f32.s32 %v6864_v41 }
0x172e   :  { %3412 = vmin.xlane.f32.xlu1 %v3411_v32 }
0x172f   :  { %v3536_v23 = vshll.u32 %v3535_v50, 16 }
0x1733   :  { %v6873_v60 = vpop.xlane.xlu2 %3453 }
0x1734   :  { %vm3455_vm0 = vcmp.eq.f32.partialorder %v6787_v33, %v6873_v60  ;;  %v3460_v44 = vcvt.f32.s32 %v6873_v60 }
0x1735   :  { %v3456_v61 = vsel %vm3455_vm0, %v3451_v4, inf  ;;  %v3416_v4 = vshll.u32 %v3415_v8, 16 }
0x1736   :  { %3457 = vmin.xlane.f32.xlu1 %v3456_v61 }
0x173b   :  { %v6878_v57 = vpop.xlane.xlu2 %3498 }
0x173c   :  { %vm3500_vm2 = vcmp.eq.f32.partialorder %v6797_v34, %v6878_v57  ;;  %v3430_v34 = vcvt.f32.s32 %v6810_v0 }
0x173d   :  { %v3501_v49 = vsel %vm3500_vm2, %v3496_v45, inf }
0x173e   :  { %3502 = vmin.xlane.f32.xlu1 %v3501_v49  ;;  %v3431_v63 = vshll.u32 %v3430_v34, 16  ;;  %v3461_v49 = vshll.u32 %v3460_v44, 16 }
0x1743   :  { %v6883_v43 = vpop.xlane.xlu2 %3543 }
0x1744   :  { %vm3545_vm3 = vcmp.eq.f32.partialorder %v6806_v59, %v6883_v43  ;;  %v3475_v59 = vcvt.f32.s32 %v6817_v35 }
0x1745   :  { %v3546_v33 = vsel %vm3545_vm3, %v3541_v29, inf }
0x1746   :  { %3547 = vmin.xlane.f32.xlu1 %v3546_v33  ;;  %v3476_v16 = vshll.u32 %v3475_v59, 16  ;;  %v3505_v33 = vcvt.f32.s32 %v6878_v57 }
0x174b   :  { %v3383_v19 = vpop.xlane.xlu2 %3382 }
0x174c   :  { %v3384_v53 = vcvt.f32.s32 %v3383_v19  ;;  %v3506_v19 = vshll.u32 %v3505_v33, 16 }
0x174e   :  { %v3387_v46 = vadd.s32 %v3386_v3, %v3384_v53  ;;  %v3550_v53 = vcvt.f32.s32 %v6883_v43 }
0x1750   :  { %3684 = vst.msk [vmem:[%s6960_s3 + $0x398] sm:$0xff] %vm3568_vm15, %v3387_v46  ;;  %v3551_v34 = vshll.u32 %v3550_v53, 16 }
0x1753   :  { %v3428_v37 = vpop.xlane.xlu2 %3427 }
0x1754   :  { %v3429_v56 = vcvt.f32.s32 %v3428_v37 }
0x1756   :  { %v3432_v17 = vadd.s32 %v3431_v63, %v3429_v56 }
0x1758   :  { %3687 = vst.msk [vmem:[%s6960_s3 + $0x3b0] sm:$0xff] %vm3568_vm15, %v3432_v17 }
0x175b   :  { %v3473_v20 = vpop.xlane.xlu2 %3472 }
0x175c   :  { %v3474_v10 = vcvt.f32.s32 %v3473_v20 }
0x175e   :  { %v3477_v0 = vadd.s32 %v3476_v16, %v3474_v10 }
0x1760   :  { %3690 = vst.msk [vmem:[%s6960_s3 + $0x3c8] sm:$0xff] %vm3568_vm15, %v3477_v0 }
0x1763   :  { %v3518_v54 = vpop.xlane.xlu2 %3517 }
0x1764   :  { %v3519_v9 = vcvt.f32.s32 %v3518_v54 }
0x1766   :  { %v3522_v35 = vadd.s32 %v3521_v42, %v3519_v9 }
0x1768   :  { %3693 = vst.msk [vmem:[%s6960_s3 + $0x3e0] sm:$0xff] %vm3568_vm15, %v3522_v35 }
0x176b   :  { %v3563_v51 = vpop.xlane.xlu2 %3562 }
0x176c   :  { %v3564_v2 = vcvt.f32.s32 %v3563_v51 }
0x176e   :  { %v3567_v1 = vadd.s32 %v3566_v62, %v3564_v2 }
0x1770   :  { %3696 = vst.msk [vmem:[%s6960_s3 + $0x3f8] sm:$0xff] %vm3568_vm15, %v3567_v1 }
0x1788   :  { %v3398_v38 = vpop.xlane.xlu0 %3397 }
0x1789   :  { %v3399_v28 = vcvt.f32.s32 %v3398_v38 }
0x178b   :  { %v3402_v5 = vadd.s32 %v3401_v31, %v3399_v28 }
0x178d   :  { %3685 = vst.msk [vmem:[%s6960_s3 + $0x3a0] sm:$0xff] %vm3568_vm15, %v3402_v5 }
0x1790   :  { %v3443_v26 = vpop.xlane.xlu0 %3442 }
0x1791   :  { %v3444_v47 = vcvt.f32.s32 %v3443_v26 }
0x1793   :  { %v3447_v58 = vadd.s32 %v3446_v12, %v3444_v47 }
0x1795   :  { %3688 = vst.msk [vmem:[%s6960_s3 + $0x3b8] sm:$0xff] %vm3568_vm15, %v3447_v58 }
0x1798   :  { %v3488_v36 = vpop.xlane.xlu0 %3487 }
0x1799   :  { %v3489_v55 = vcvt.f32.s32 %v3488_v36  ;;  %v3368_v6 = vpop.xlane.xlu1 %3367 }
0x179a   :  { %v3369_v15 = vcvt.f32.s32 %v3368_v6 }
0x179b   :  { %v3492_v7 = vadd.s32 %v3491_v40, %v3489_v55 }
0x179c   :  { %v3372_v11 = vadd.s32 %v3371_v22, %v3369_v15 }
0x179d   :  { %3691 = vst.msk [vmem:[%s6960_s3 + $0x3d0] sm:$0xff] %vm3568_vm15, %v3492_v7 }
0x179e   :  { %3683 = vst.msk [vmem:[%s6960_s3 + $0x390] sm:$0xff] %vm3568_vm15, %v3372_v11 }
0x17a0   :  { %v3533_v52 = vpop.xlane.xlu0 %3532 }
0x17a1   :  { %v3534_v32 = vcvt.f32.s32 %v3533_v52  ;;  %v3413_v25 = vpop.xlane.xlu1 %3412 }
0x17a2   :  { %v3414_v61 = vcvt.f32.s32 %v3413_v25 }
0x17a3   :  { %v3537_v21 = vadd.s32 %v3536_v23, %v3534_v32 }
0x17a4   :  { %v3417_v41 = vadd.s32 %v3416_v4, %v3414_v61 }
0x17a5   :  { %3694 = vst.msk [vmem:[%s6960_s3 + $0x3e8] sm:$0xff] %vm3568_vm15, %v3537_v21 }
0x17a6   :  { %3686 = vst.msk [vmem:[%s6960_s3 + $0x3a8] sm:$0xff] %vm3568_vm15, %v3417_v41 }
0x17a9   :  { %v3458_v45 = vpop.xlane.xlu1 %3457 }
0x17aa   :  { %v3459_v48 = vcvt.f32.s32 %v3458_v45 }
0x17ac   :  { %v3462_v29 = vadd.s32 %v3461_v49, %v3459_v48 }
0x17ae   :  { %3689 = vst.msk [vmem:[%s6960_s3 + $0x3c0] sm:$0xff] %vm3568_vm15, %v3462_v29 }
0x17b1   :  { %v3503_v24 = vpop.xlane.xlu1 %3502 }
0x17b2   :  { %v3504_v3 = vcvt.f32.s32 %v3503_v24 }
0x17b4   :  { %v3507_v60 = vadd.s32 %v3506_v19, %v3504_v3 }
0x17b6   :  { %3692 = vst.msk [vmem:[%s6960_s3 + $0x3d8] sm:$0xff] %vm3568_vm15, %v3507_v60 }
0x17b9   :  { %v3548_v46 = vpop.xlane.xlu1 %3547 }
0x17ba   :  { %v3549_v37 = vcvt.f32.s32 %v3548_v46 }
0x17bc   :  { %v3552_v57 = vadd.s32 %v3551_v34, %v3549_v37 }
0x17be   :  { %3695 = vst.msk [vmem:[%s6960_s3 + $0x3f0] sm:$0xff] %vm3568_vm15, %v3552_v57 }

</bundles_post_ra>
